<compile_context>
chip_gen: v6e
topology: v6e:2x2x1
jax: 0.10.0
libtpu: 0.0.40
codegen_flags: <defaults>
</compile_context>

<pallas_src>
from functools import partial

import jax
import jax.numpy as jnp
import numpy as np
from jax.experimental import pallas as pl
from jax.experimental.pallas import tpu as pltpu

_X0 = 8  # column offset of the 3x3 interior inside the padded scratch (sublane-aligned store)


def _round_up(n, m):
    return -(-n // m) * m


def _resblock_kernel(x_ref, w1_ref, b1_ref, w2_ref, b2_ref, o_ref, pad_ref, *, H, W, x0):
    """One residual block for one batch element (grid = (batch, block)).

    x_ref : (1, H*W, Cp)    f32 original input (only read at block 0)
    w1_ref: (1, Cp, Cmp)    bf16 1x1 conv weights, BN1 scale folded in
    b1_ref: (1, 1, Cmp)     f32 folded BN1 bias
    w2_ref: (1, 9, Cmp, Cp) bf16 3x3 conv weights (tap-major k = dy*3+dx), BN2 scale folded in
    b2_ref: (1, 1, Cp)      f32 folded BN2 bias
    o_ref : (1, H*W, Cp)    f32 running activation; its block index is constant along the block
                            grid axis so it stays resident in VMEM across all blocks of a batch.
    pad_ref: VMEM (H+2, Wp, Cmp) bf16 zero-padded y1 scratch.
    """
    Cmp = pad_ref.shape[-1]
    blk = pl.program_id(1)

    # Block 0: load the running activation from the kernel input.
    @pl.when(blk == 0)
    def _():
        o_ref[...] = x_ref[...]

    x = o_ref[0]                                         # (H*W, Cp) f32, pre-block activation

    # ---- CNNBlock 1: 1x1 conv (bf16 MXU, f32 acc) + folded-BN bias + LeakyReLU(0.1)
    y1 = jnp.dot(x.astype(jnp.bfloat16), w1_ref[0],
                 preferred_element_type=jnp.float32)
    y1 = y1 + b1_ref[0]
    y1 = jnp.maximum(y1, 0.1 * y1)

    # Zero-padded bf16 copy of y1 for the 3x3 window reads.  Zeroed every grid step: cheap, and
    # correct no matter how the "parallel" batch axis is sharded across TensorCores.
    pad_ref[...] = jnp.zeros_like(pad_ref)
    pad_ref[1:H + 1, x0:x0 + W, :] = y1.reshape(H, W, Cmp).astype(jnp.bfloat16)

    # ---- CNNBlock 2: 3x3 conv (pad=1) as 9 per-tap bf16 MXU matmuls, f32 accumulation.
    acc = None
    for k in range(9):                                   # static unroll over the 3x3 taps
        dy, dx = divmod(k, 3)
        tap = pad_ref[dy:dy + H, x0 - 1 + dx:x0 - 1 + dx + W, :].reshape(H * W, Cmp)
        part = jnp.dot(tap, w2_ref[0, k], preferred_element_type=jnp.float32)
        acc = part if acc is None else acc + part
    y2 = acc + b2_ref[0]
    y2 = jnp.maximum(y2, 0.1 * y2)

    # ---- residual add into the block-resident output tile
    o_ref[0] = x + y2


def _prepare_kernel_params(params, channels):
    """Fold BN (eval) scale into the conv weights, pad channel dims to lane width, stack blocks."""
    cmid = channels // 2
    cp = _round_up(channels, 128)
    cmp_ = _round_up(cmid, 128)
    w1s, b1s, w2s, b2s = [], [], [], []
    for (w1, s1, b1, w2, s2, b2) in params:
        w1f = w1 * s1                    # (C, cmid)  * (1, cmid): BN1 scale per output column
        w2f = w2 * s2[None, :, :]        # (9, cmid, C) * (1, 1, C): BN2 scale per output channel
        w1s.append(jnp.pad(w1f, ((0, cp - channels), (0, cmp_ - cmid))).astype(jnp.bfloat16))
        w2s.append(jnp.pad(w2f, ((0, 0), (0, cmp_ - cmid), (0, cp - channels))).astype(jnp.bfloat16))
        b1s.append(jnp.pad(b1, ((0, 0), (0, cmp_ - cmid))))
        b2s.append(jnp.pad(b2, ((0, 0), (0, cp - channels))))
    stack = lambda xs: jnp.stack(xs, axis=0)
    return (stack(w1s), stack(b1s), stack(w2s), stack(b2s)), cp, cmp_


def residual_block_apply(x_nhwc, params):
    """Apply all residual blocks with one pallas_call; grid = (batch, block)."""
    N, H, W, C = x_nhwc.shape
    (w1a, b1a, w2a, b2a), Cp, Cmp = _prepare_kernel_params(params, C)
    Bn = w1a.shape[0]
    Wp = _round_up(_X0 + W + 1, 8)

    # Channel-pad once (padded channels carry exact zeros through the whole chain), flatten
    # spatial dims so every matmul / output store is lane-dense.
    x_flat = jnp.pad(x_nhwc, ((0, 0), (0, 0), (0, 0), (0, Cp - C))).reshape(N, H * W, Cp)

    # Scoped-VMEM budget from the actual working set (double-buffered activation tiles + one
    # block's weights + padded scratch), with headroom for compiler temporaries.
    act_b = H * W * Cp * 4
    w_b = (Cp * Cmp + 9 * Cmp * Cp) * 2 + (Cmp + Cp) * 4
    pad_b = (H + 2) * Wp * Cmp * 2
    vmem_limit = min(max(2 * (4 * act_b + 2 * w_b + pad_b) + (4 << 20), 16 << 20), 100 << 20)

    out = pl.pallas_call(
        partial(_resblock_kernel, H=H, W=W, x0=_X0),
        out_shape=jax.ShapeDtypeStruct((N, H * W, Cp), jnp.float32),
        grid_spec=pltpu.PrefetchScalarGridSpec(
            num_scalar_prefetch=0,
            grid=(N, Bn),                                   # batch (parallel) x block (arbitrary)
            in_specs=[
                pl.BlockSpec((1, H * W, Cp), lambda n, b: (n, 0, 0)),
                pl.BlockSpec((1, Cp, Cmp), lambda n, b: (b, 0, 0)),
                pl.BlockSpec((1, 1, Cmp), lambda n, b: (b, 0, 0)),
                pl.BlockSpec((1, 9, Cmp, Cp), lambda n, b: (b, 0, 0, 0)),
                pl.BlockSpec((1, 1, Cp), lambda n, b: (b, 0, 0)),
            ],
            # Output block index is constant along the block axis -> running activation stays
            # resident in VMEM across blocks and is written back once per batch element.
            out_specs=pl.BlockSpec((1, H * W, Cp), lambda n, b: (n, 0, 0)),
            scratch_shapes=[pltpu.VMEM((H + 2, Wp, Cmp), jnp.bfloat16)],
        ),
        compiler_params=pltpu.CompilerParams(
            dimension_semantics=("parallel", "arbitrary"),
            vmem_limit_bytes=vmem_limit),
    )(x_flat, w1a, b1a, w2a, b2a)
    return out.reshape(N, H, W, Cp)[..., :C]


def init_params(key, channels, num_blocks):
    """Deterministic synthetic params. BatchNorm (eval) is expressed as scale/bias."""
    eps = 1e-5
    params = []
    cmid = channels // 2
    for i in range(num_blocks):
        ks = jax.random.split(jax.random.fold_in(key, i), 10)
        # conv1: torch weight [cmid, C, 1, 1] -> stored as [C, cmid]
        w1 = jax.random.normal(ks[0], (channels, cmid), jnp.float32) * 0.1
        g1 = 1.0 + 0.1 * jax.random.normal(ks[1], (cmid,), jnp.float32)
        be1 = 0.1 * jax.random.normal(ks[2], (cmid,), jnp.float32)
        m1 = 0.1 * jax.random.normal(ks[3], (cmid,), jnp.float32)
        v1 = jax.random.uniform(ks[4], (cmid,), jnp.float32, 0.5, 1.5)
        s1 = (g1 / jnp.sqrt(v1 + eps)).reshape(1, cmid)
        b1 = (be1 - m1 * g1 / jnp.sqrt(v1 + eps)).reshape(1, cmid)
        # conv2: torch weight [C, cmid, 3, 3] -> stored as [9, cmid, C], k = dy*3+dx
        w2 = jax.random.normal(ks[5], (3, 3, cmid, channels), jnp.float32) * 0.1
        w2 = w2.reshape(9, cmid, channels)
        g2 = 1.0 + 0.1 * jax.random.normal(ks[6], (channels,), jnp.float32)
        be2 = 0.1 * jax.random.normal(ks[7], (channels,), jnp.float32)
        m2 = 0.1 * jax.random.normal(ks[8], (channels,), jnp.float32)
        v2 = jax.random.uniform(ks[9], (channels,), jnp.float32, 0.5, 1.5)
        s2 = (g2 / jnp.sqrt(v2 + eps)).reshape(1, channels)
        b2 = (be2 - m2 * g2 / jnp.sqrt(v2 + eps)).reshape(1, channels)
        params.append((w1, s1, b1, w2, s2, b2))
    return params


def residual_block_ref(x_nhwc, params):
    """Pure-JAX f32 reference (same math as the PyTorch module, no Pallas)."""
    N, H, W, C = x_nhwc.shape
    for (w1, s1, b1, w2, s2, b2) in params:
        y1 = jnp.einsum('nhwc,cd->nhwd', x_nhwc, w1)
        y1 = y1 * s1 + b1
        y1 = jnp.where(y1 > 0, y1, 0.1 * y1)
        y1p = jnp.pad(y1, ((0, 0), (1, 1), (1, 1), (0, 0)))
        acc = jnp.zeros((N, H, W, C), jnp.float32)
        for k in range(9):
            dy, dx = divmod(k, 3)
            acc = acc + jnp.einsum('nhwd,dc->nhwc',
                                   y1p[:, dy:dy + H, dx:dx + W, :], w2[k])
        y2 = acc * s2 + b2
        y2 = jnp.where(y2 > 0, y2, 0.1 * y2)
        x_nhwc = x_nhwc + y2
    return x_nhwc


if __name__ == "__main__":
    key = jax.random.PRNGKey(0)
    N, C, H, W = 2, 4, 16, 16          # small NCHW input like the PyTorch module
    num_blocks = 2

    kx, kp = jax.random.split(key)
    x_nchw = jax.random.normal(kx, (N, C, H, W), jnp.float32)
    params = init_params(kp, C, num_blocks)

    x_nhwc = jnp.transpose(x_nchw, (0, 2, 3, 1))       # NCHW -> NHWC for the kernel
    out_nhwc = residual_block_apply(x_nhwc, params)
    out_nchw = jnp.transpose(out_nhwc, (0, 3, 1, 2))   # back to NCHW
    out_nchw = jax.block_until_ready(out_nchw)

    ref_nchw = jnp.transpose(residual_block_ref(x_nhwc, params), (0, 3, 1, 2))
    # bf16 matmul operands (f32 accumulation) -> slightly looser tolerance than pure f32.
    np.testing.assert_allclose(np.asarray(out_nchw), np.asarray(ref_nchw),
                               rtol=2e-2, atol=2e-2)
    print("KERNEL_OK")
</pallas_src>

<mosaic_0001>
module attributes {stable_mosaic.version = 11 : i64} {
  func.func @_resblock_kernel(%arg0: i32, %arg1: i32, %arg2: memref<1x256x128xf32, #tpu.memory_space<vmem>>, %arg3: memref<1x128x128xbf16, #tpu.memory_space<vmem>>, %arg4: memref<1x1x128xf32, #tpu.memory_space<vmem>>, %arg5: memref<1x9x128x128xbf16, #tpu.memory_space<vmem>>, %arg6: memref<1x1x128xf32, #tpu.memory_space<vmem>>, %arg7: memref<1x256x128xf32, #tpu.memory_space<vmem>>, %arg8: memref<18x32x128xbf16, #tpu.memory_space<vmem>>) attributes {dimension_semantics = [#tpu.dimension_semantics<parallel>, #tpu.dimension_semantics<arbitrary>], iteration_bounds = array<i64: 2, 2>, scalar_prefetch = 0 : i64, scratch_operands = 1 : i64, tpu.core_type = #tpu.core_type<tc>, window_params = [{transform_indices = @transform_0, window_bounds = array<i64: 1, 256, 128>}, {transform_indices = @transform_1, window_bounds = array<i64: 1, 128, 128>}, {transform_indices = @transform_2, window_bounds = array<i64: 1, 1, 128>}, {transform_indices = @transform_3, window_bounds = array<i64: 1, 9, 128, 128>}, {transform_indices = @transform_4, window_bounds = array<i64: 1, 1, 128>}, {transform_indices = @transform_5, window_bounds = array<i64: 1, 256, 128>}]} {
    %c0_i32 = arith.constant 0 : i32
    %0 = arith.cmpi eq, %arg1, %c0_i32 : i32
    %1 = arith.extui %0 : i1 to i32
    %c0_i32_0 = arith.constant 0 : i32
    %2 = arith.cmpi ne, %1, %c0_i32_0 : i32
    scf.if %2 {
      %c0_87 = arith.constant 0 : index
      %c0_88 = arith.constant 0 : index
      %c0_89 = arith.constant 0 : index
      %85 = vector.load %arg2[%c0_87, %c0_88, %c0_89] : memref<1x256x128xf32, #tpu.memory_space<vmem>>, vector<1x256x128xf32>
      %c0_90 = arith.constant 0 : index
      %c0_91 = arith.constant 0 : index
      %c0_92 = arith.constant 0 : index
      %86 = vector.load %arg7[%c0_90, %c0_91, %c0_92] : memref<1x256x128xf32, #tpu.memory_space<vmem>>, vector<1x256x128xf32>
      tpu.vector_store %arg7[%c0_90, %c0_91, %c0_92], %85 {strides = array<i32>} : memref<1x256x128xf32, #tpu.memory_space<vmem>>, vector<1x256x128xf32>,
    } else {
    }
    %c0 = arith.constant 0 : index
    %c0_1 = arith.constant 0 : index
    %c0_2 = arith.constant 0 : index
    %3 = vector.load %arg7[%c0, %c0_1, %c0_2] : memref<1x256x128xf32, #tpu.memory_space<vmem>>, vector<1x256x128xf32>
    %4 = vector.shape_cast %3 : vector<1x256x128xf32> to vector<256x128xf32>
    %5 = arith.truncf %4 : vector<256x128xf32> to vector<256x128xbf16>
    %c0_3 = arith.constant 0 : index
    %c0_4 = arith.constant 0 : index
    %c0_5 = arith.constant 0 : index
    %6 = vector.load %arg3[%c0_3, %c0_4, %c0_5] : memref<1x128x128xbf16, #tpu.memory_space<vmem>>, vector<1x128x128xbf16>
    %7 = vector.shape_cast %6 : vector<1x128x128xbf16> to vector<128x128xbf16>
    %cst = arith.constant dense<0.000000e+00> : vector<256x128xf32>
    %8 = tpu.matmul %5, %7, %cst {dimension_numbers = #tpu.dot_dimension_numbers<[1], [0], [0], [1], [0, 0, 1, 1], [], []>} : vector<256x128xbf16>, vector<128x128xbf16>, vector<256x128xf32> -> vector<256x128xf32>
    %c0_6 = arith.constant 0 : index
    %c0_7 = arith.constant 0 : index
    %c0_8 = arith.constant 0 : index
    %9 = vector.load %arg4[%c0_6, %c0_7, %c0_8] : memref<1x1x128xf32, #tpu.memory_space<vmem>>, vector<1x1x128xf32>
    %10 = vector.shape_cast %9 : vector<1x1x128xf32> to vector<1x128xf32>
    %11 = vector.broadcast %10 : vector<1x128xf32> to vector<256x128xf32>
    %12 = arith.addf %8, %11 : vector<256x128xf32>
    %cst_9 = arith.constant 1.000000e-01 : f32
    %13 = vector.broadcast %cst_9 : f32 to vector<256x128xf32>
    %14 = arith.mulf %13, %12 : vector<256x128xf32>
    %15 = arith.maximumf %12, %14 : vector<256x128xf32>
    %cst_10 = arith.constant 0.000000e+00 : bf16
    %16 = vector.broadcast %cst_10 : bf16 to vector<18x32x128xbf16>
    %c0_11 = arith.constant 0 : index
    %c0_12 = arith.constant 0 : index
    %c0_13 = arith.constant 0 : index
    %17 = vector.load %arg8[%c0_11, %c0_12, %c0_13] : memref<18x32x128xbf16, #tpu.memory_space<vmem>>, vector<18x32x128xbf16>
    tpu.vector_store %arg8[%c0_11, %c0_12, %c0_13], %16 {strides = array<i32>} : memref<18x32x128xbf16, #tpu.memory_space<vmem>>, vector<18x32x128xbf16>,
    %18 = vector.shape_cast %15 : vector<256x128xf32> to vector<16x16x128xf32>
    %19 = arith.truncf %18 : vector<16x16x128xf32> to vector<16x16x128xbf16>
    %c1 = arith.constant 1 : index
    %c8 = arith.constant 8 : index
    %c0_14 = arith.constant 0 : index
    %20 = vector.load %arg8[%c1, %c8, %c0_14] : memref<18x32x128xbf16, #tpu.memory_space<vmem>>, vector<16x16x128xbf16>
    tpu.vector_store %arg8[%c1, %c8, %c0_14], %19 {strides = array<i32>} : memref<18x32x128xbf16, #tpu.memory_space<vmem>>, vector<16x16x128xbf16>,
    %c0_15 = arith.constant 0 : index
    %c7 = arith.constant 7 : index
    %c0_16 = arith.constant 0 : index
    %21 = vector.load %arg8[%c0_15, %c7, %c0_16] : memref<18x32x128xbf16, #tpu.memory_space<vmem>>, vector<16x16x128xbf16>
    %22 = vector.shape_cast %21 : vector<16x16x128xbf16> to vector<256x128xbf16>
    %c0_17 = arith.constant 0 : index
    %c0_18 = arith.constant 0 : index
    %c0_19 = arith.constant 0 : index
    %c0_20 = arith.constant 0 : index
    %23 = vector.load %arg5[%c0_17, %c0_18, %c0_19, %c0_20] : memref<1x9x128x128xbf16, #tpu.memory_space<vmem>>, vector<1x1x128x128xbf16>
    %24 = vector.shape_cast %23 : vector<1x1x128x128xbf16> to vector<128x128xbf16>
    %cst_21 = arith.constant dense<0.000000e+00> : vector<256x128xf32>
    %25 = tpu.matmul %22, %24, %cst_21 {dimension_numbers = #tpu.dot_dimension_numbers<[1], [0], [0], [1], [0, 0, 1, 1], [], []>} : vector<256x128xbf16>, vector<128x128xbf16>, vector<256x128xf32> -> vector<256x128xf32>
    %c0_22 = arith.constant 0 : index
    %c8_23 = arith.constant 8 : index
    %c0_24 = arith.constant 0 : index
    %26 = vector.load %arg8[%c0_22, %c8_23, %c0_24] : memref<18x32x128xbf16, #tpu.memory_space<vmem>>, vector<16x16x128xbf16>
    %27 = vector.shape_cast %26 : vector<16x16x128xbf16> to vector<256x128xbf16>
    %c0_25 = arith.constant 0 : index
    %c1_26 = arith.constant 1 : index
    %c0_27 = arith.constant 0 : index
    %c0_28 = arith.constant 0 : index
    %28 = vector.load %arg5[%c0_25, %c1_26, %c0_27, %c0_28] : memref<1x9x128x128xbf16, #tpu.memory_space<vmem>>, vector<1x1x128x128xbf16>
    %29 = vector.shape_cast %28 : vector<1x1x128x128xbf16> to vector<128x128xbf16>
    %cst_29 = arith.constant dense<0.000000e+00> : vector<256x128xf32>
    %30 = tpu.matmul %27, %29, %cst_29 {dimension_numbers = #tpu.dot_dimension_numbers<[1], [0], [0], [1], [0, 0, 1, 1], [], []>} : vector<256x128xbf16>, vector<128x128xbf16>, vector<256x128xf32> -> vector<256x128xf32>
    %31 = arith.addf %25, %30 : vector<256x128xf32>
    %c0_30 = arith.constant 0 : index
    %c9 = arith.constant 9 : index
    %c0_31 = arith.constant 0 : index
    %32 = vector.load %arg8[%c0_30, %c9, %c0_31] : memref<18x32x128xbf16, #tpu.memory_space<vmem>>, vector<16x16x128xbf16>
    %33 = vector.shape_cast %32 : vector<16x16x128xbf16> to vector<256x128xbf16>
    %c0_32 = arith.constant 0 : index
    %c2 = arith.constant 2 : index
    %c0_33 = arith.constant 0 : index
    %c0_34 = arith.constant 0 : index
    %34 = vector.load %arg5[%c0_32, %c2, %c0_33, %c0_34] : memref<1x9x128x128xbf16, #tpu.memory_space<vmem>>, vector<1x1x128x128xbf16>
    %35 = vector.shape_cast %34 : vector<1x1x128x128xbf16> to vector<128x128xbf16>
    %cst_35 = arith.constant dense<0.000000e+00> : vector<256x128xf32>
    %36 = tpu.matmul %33, %35, %cst_35 {dimension_numbers = #tpu.dot_dimension_numbers<[1], [0], [0], [1], [0, 0, 1, 1], [], []>} : vector<256x128xbf16>, vector<128x128xbf16>, vector<256x128xf32> -> vector<256x128xf32>
    %37 = arith.addf %31, %36 : vector<256x128xf32>
    %c1_36 = arith.constant 1 : index
    %c7_37 = arith.constant 7 : index
    %c0_38 = arith.constant 0 : index
    %38 = vector.load %arg8[%c1_36, %c7_37, %c0_38] : memref<18x32x128xbf16, #tpu.memory_space<vmem>>, vector<16x16x128xbf16>
    %39 = vector.shape_cast %38 : vector<16x16x128xbf16> to vector<256x128xbf16>
    %c0_39 = arith.constant 0 : index
    %c3 = arith.constant 3 : index
    %c0_40 = arith.constant 0 : index
    %c0_41 = arith.constant 0 : index
    %40 = vector.load %arg5[%c0_39, %c3, %c0_40, %c0_41] : memref<1x9x128x128xbf16, #tpu.memory_space<vmem>>, vector<1x1x128x128xbf16>
    %41 = vector.shape_cast %40 : vector<1x1x128x128xbf16> to vector<128x128xbf16>
    %cst_42 = arith.constant dense<0.000000e+00> : vector<256x128xf32>
    %42 = tpu.matmul %39, %41, %cst_42 {dimension_numbers = #tpu.dot_dimension_numbers<[1], [0], [0], [1], [0, 0, 1, 1], [], []>} : vector<256x128xbf16>, vector<128x128xbf16>, vector<256x128xf32> -> vector<256x128xf32>
    %43 = arith.addf %37, %42 : vector<256x128xf32>
    %c1_43 = arith.constant 1 : index
    %c8_44 = arith.constant 8 : index
    %c0_45 = arith.constant 0 : index
    %44 = vector.load %arg8[%c1_43, %c8_44, %c0_45] : memref<18x32x128xbf16, #tpu.memory_space<vmem>>, vector<16x16x128xbf16>
    %45 = vector.shape_cast %44 : vector<16x16x128xbf16> to vector<256x128xbf16>
    %c0_46 = arith.constant 0 : index
    %c4 = arith.constant 4 : index
    %c0_47 = arith.constant 0 : index
    %c0_48 = arith.constant 0 : index
    %46 = vector.load %arg5[%c0_46, %c4, %c0_47, %c0_48] : memref<1x9x128x128xbf16, #tpu.memory_space<vmem>>, vector<1x1x128x128xbf16>
    %47 = vector.shape_cast %46 : vector<1x1x128x128xbf16> to vector<128x128xbf16>
    %cst_49 = arith.constant dense<0.000000e+00> : vector<256x128xf32>
    %48 = tpu.matmul %45, %47, %cst_49 {dimension_numbers = #tpu.dot_dimension_numbers<[1], [0], [0], [1], [0, 0, 1, 1], [], []>} : vector<256x128xbf16>, vector<128x128xbf16>, vector<256x128xf32> -> vector<256x128xf32>
    %49 = arith.addf %43, %48 : vector<256x128xf32>
    %c1_50 = arith.constant 1 : index
    %c9_51 = arith.constant 9 : index
    %c0_52 = arith.constant 0 : index
    %50 = vector.load %arg8[%c1_50, %c9_51, %c0_52] : memref<18x32x128xbf16, #tpu.memory_space<vmem>>, vector<16x16x128xbf16>
    %51 = vector.shape_cast %50 : vector<16x16x128xbf16> to vector<256x128xbf16>
    %c0_53 = arith.constant 0 : index
    %c5 = arith.constant 5 : index
    %c0_54 = arith.constant 0 : index
    %c0_55 = arith.constant 0 : index
    %52 = vector.load %arg5[%c0_53, %c5, %c0_54, %c0_55] : memref<1x9x128x128xbf16, #tpu.memory_space<vmem>>, vector<1x1x128x128xbf16>
    %53 = vector.shape_cast %52 : vector<1x1x128x128xbf16> to vector<128x128xbf16>
    %cst_56 = arith.constant dense<0.000000e+00> : vector<256x128xf32>
    %54 = tpu.matmul %51, %53, %cst_56 {dimension_numbers = #tpu.dot_dimension_numbers<[1], [0], [0], [1], [0, 0, 1, 1], [], []>} : vector<256x128xbf16>, vector<128x128xbf16>, vector<256x128xf32> -> vector<256x128xf32>
    %55 = arith.addf %49, %54 : vector<256x128xf32>
    %c2_57 = arith.constant 2 : index
    %c7_58 = arith.constant 7 : index
    %c0_59 = arith.constant 0 : index
    %56 = vector.load %arg8[%c2_57, %c7_58, %c0_59] : memref<18x32x128xbf16, #tpu.memory_space<vmem>>, vector<16x16x128xbf16>
    %57 = vector.shape_cast %56 : vector<16x16x128xbf16> to vector<256x128xbf16>
    %c0_60 = arith.constant 0 : index
    %c6 = arith.constant 6 : index
    %c0_61 = arith.constant 0 : index
    %c0_62 = arith.constant 0 : index
    %58 = vector.load %arg5[%c0_60, %c6, %c0_61, %c0_62] : memref<1x9x128x128xbf16, #tpu.memory_space<vmem>>, vector<1x1x128x128xbf16>
    %59 = vector.shape_cast %58 : vector<1x1x128x128xbf16> to vector<128x128xbf16>
    %cst_63 = arith.constant dense<0.000000e+00> : vector<256x128xf32>
    %60 = tpu.matmul %57, %59, %cst_63 {dimension_numbers = #tpu.dot_dimension_numbers<[1], [0], [0], [1], [0, 0, 1, 1], [], []>} : vector<256x128xbf16>, vector<128x128xbf16>, vector<256x128xf32> -> vector<256x128xf32>
    %61 = arith.addf %55, %60 : vector<256x128xf32>
    %c2_64 = arith.constant 2 : index
    %c8_65 = arith.constant 8 : index
    %c0_66 = arith.constant 0 : index
    %62 = vector.load %arg8[%c2_64, %c8_65, %c0_66] : memref<18x32x128xbf16, #tpu.memory_space<vmem>>, vector<16x16x128xbf16>
    %63 = vector.shape_cast %62 : vector<16x16x128xbf16> to vector<256x128xbf16>
    %c0_67 = arith.constant 0 : index
    %c7_68 = arith.constant 7 : index
    %c0_69 = arith.constant 0 : index
    %c0_70 = arith.constant 0 : index
    %64 = vector.load %arg5[%c0_67, %c7_68, %c0_69, %c0_70] : memref<1x9x128x128xbf16, #tpu.memory_space<vmem>>, vector<1x1x128x128xbf16>
    %65 = vector.shape_cast %64 : vector<1x1x128x128xbf16> to vector<128x128xbf16>
    %cst_71 = arith.constant dense<0.000000e+00> : vector<256x128xf32>
    %66 = tpu.matmul %63, %65, %cst_71 {dimension_numbers = #tpu.dot_dimension_numbers<[1], [0], [0], [1], [0, 0, 1, 1], [], []>} : vector<256x128xbf16>, vector<128x128xbf16>, vector<256x128xf32> -> vector<256x128xf32>
    %67 = arith.addf %61, %66 : vector<256x128xf32>
    %c2_72 = arith.constant 2 : index
    %c9_73 = arith.constant 9 : index
    %c0_74 = arith.constant 0 : index
    %68 = vector.load %arg8[%c2_72, %c9_73, %c0_74] : memref<18x32x128xbf16, #tpu.memory_space<vmem>>, vector<16x16x128xbf16>
    %69 = vector.shape_cast %68 : vector<16x16x128xbf16> to vector<256x128xbf16>
    %c0_75 = arith.constant 0 : index
    %c8_76 = arith.constant 8 : index
    %c0_77 = arith.constant 0 : index
    %c0_78 = arith.constant 0 : index
    %70 = vector.load %arg5[%c0_75, %c8_76, %c0_77, %c0_78] : memref<1x9x128x128xbf16, #tpu.memory_space<vmem>>, vector<1x1x128x128xbf16>
    %71 = vector.shape_cast %70 : vector<1x1x128x128xbf16> to vector<128x128xbf16>
    %cst_79 = arith.constant dense<0.000000e+00> : vector<256x128xf32>
    %72 = tpu.matmul %69, %71, %cst_79 {dimension_numbers = #tpu.dot_dimension_numbers<[1], [0], [0], [1], [0, 0, 1, 1], [], []>} : vector<256x128xbf16>, vector<128x128xbf16>, vector<256x128xf32> -> vector<256x128xf32>
    %73 = arith.addf %67, %72 : vector<256x128xf32>
    %c0_80 = arith.constant 0 : index
    %c0_81 = arith.constant 0 : index
    %c0_82 = arith.constant 0 : index
    %74 = vector.load %arg6[%c0_80, %c0_81, %c0_82] : memref<1x1x128xf32, #tpu.memory_space<vmem>>, vector<1x1x128xf32>
    %75 = vector.shape_cast %74 : vector<1x1x128xf32> to vector<1x128xf32>
    %76 = vector.broadcast %75 : vector<1x128xf32> to vector<256x128xf32>
    %77 = arith.addf %73, %76 : vector<256x128xf32>
    %cst_83 = arith.constant 1.000000e-01 : f32
    %78 = vector.broadcast %cst_83 : f32 to vector<256x128xf32>
    %79 = arith.mulf %78, %77 : vector<256x128xf32>
    %80 = arith.maximumf %77, %79 : vector<256x128xf32>
    %81 = arith.addf %4, %80 : vector<256x128xf32>
    %c0_84 = arith.constant 0 : index
    %c0_85 = arith.constant 0 : index
    %c0_86 = arith.constant 0 : index
    %82 = vector.load %arg7[%c0_84, %c0_85, %c0_86] : memref<1x256x128xf32, #tpu.memory_space<vmem>>, vector<1x256x128xf32>
    %83 = vector.shape_cast %82 : vector<1x256x128xf32> to vector<256x128xf32>
    %84 = vector.shape_cast %81 : vector<256x128xf32> to vector<1x256x128xf32>
    tpu.vector_store %arg7[%c0_84, %c0_85, %c0_86], %84 {strides = array<i32>} : memref<1x256x128xf32, #tpu.memory_space<vmem>>, vector<1x256x128xf32>,
    return
  }
  func.func @transform_0(%arg0: i32, %arg1: i32) -> (i32, i32, i32) {
    %c0_i32 = arith.constant 0 : i32
    %c0_i32_0 = arith.constant 0 : i32
    %c0_i32_1 = arith.constant 0 : i32
    return %arg0, %c0_i32, %c0_i32_0 : i32, i32, i32
  }
  func.func @transform_1(%arg0: i32, %arg1: i32) -> (i32, i32, i32) {
    %c0_i32 = arith.constant 0 : i32
    %c0_i32_0 = arith.constant 0 : i32
    %c0_i32_1 = arith.constant 0 : i32
    return %arg1, %c0_i32, %c0_i32_0 : i32, i32, i32
  }
  func.func @transform_2(%arg0: i32, %arg1: i32) -> (i32, i32, i32) {
    %c0_i32 = arith.constant 0 : i32
    %c0_i32_0 = arith.constant 0 : i32
    %c0_i32_1 = arith.constant 0 : i32
    return %arg1, %c0_i32, %c0_i32_0 : i32, i32, i32
  }
  func.func @transform_3(%arg0: i32, %arg1: i32) -> (i32, i32, i32, i32) {
    %c0_i32 = arith.constant 0 : i32
    %c0_i32_0 = arith.constant 0 : i32
    %c0_i32_1 = arith.constant 0 : i32
    %c0_i32_2 = arith.constant 0 : i32
    return %arg1, %c0_i32, %c0_i32_0, %c0_i32_1 : i32, i32, i32, i32
  }
  func.func @transform_4(%arg0: i32, %arg1: i32) -> (i32, i32, i32) {
    %c0_i32 = arith.constant 0 : i32
    %c0_i32_0 = arith.constant 0 : i32
    %c0_i32_1 = arith.constant 0 : i32
    return %arg1, %c0_i32, %c0_i32_0 : i32, i32, i32
  }
  func.func @transform_5(%arg0: i32, %arg1: i32) -> (i32, i32, i32) {
    %c0_i32 = arith.constant 0 : i32
    %c0_i32_0 = arith.constant 0 : i32
    %c0_i32_1 = arith.constant 0 : i32
    return %arg0, %c0_i32, %c0_i32_0 : i32, i32, i32
  }
}

</mosaic_0001>

<bundles_post_ra>
// kernel: tpu_custom_call.1
= control target key start
LH: loop header
LB: loop body
LE: loop exit
PB: predicated region body
PF: predicated region fallthrough
CT: control target
= control target key end

     0   :  { %s10983_s0 = inlined_call_operand.hbm [shape: f32[2,256,128], index: 0, kind: input, shape index: {}]   ;;  %s10984_s1 = inlined_call_operand.hbm [shape: bf16[2,128,128], index: 1, kind: input, shape index: {}]   ;;  %s10985_s2 = inlined_call_operand.vmem [shape: f32[2,1,128], index: 2, kind: input, shape index: {}]   ;;  %s10986_s3 = inlined_call_operand.hbm [shape: bf16[2,9,128,128], index: 3, kind: input, shape index: {}]   ;;  %s10987_s4 = inlined_call_operand.vmem [shape: f32[2,1,128], index: 4, kind: input, shape index: {}]   ;;  %s10988_s5 = inlined_call_operand.hbm [shape: f32[2,256,128], index: 5, kind: output, shape index: {}]  }
   0x1   :  { %11003 = sst [smem:[#allocation59_spill]] %s10983_s0 }
   0x2   :  { %11004 = sst [smem:[#allocation60_spill]] %s10984_s1 }
   0x3   :  { %11005 = sst [smem:[#allocation61_spill]] %s10985_s2 }
   0x4   :  { %11006 = sst [smem:[#allocation62_spill]] %s10987_s4 }
   0x5   :  { %11007 = sst [smem:[#allocation63_spill]] %s10988_s5 }
   0x6   :  { %10 = vsyncpa [#allocation4], 0 }
   0x7   :  { %12 = vsyncpa [#allocation4 + $0x1], 0 }
   0x8   :  { %13 = vsyncpa [#allocation7], 0 }
   0x9   :  { %15 = vsyncpa [#allocation7 + $0x1], 0 }
   0xa   :  { %16 = vsyncpa [#allocation5], 0 }
   0xb   :  { %18 = vsyncpa [#allocation5 + $0x1], 0  ;;  %s8517_s18 = smov 0   ;;  %s8519_s19 = smov 0  }
   0xc   :  { %s8521_s20 = smov 0   ;;  %s8523_s21 = smov 0  }
   0xd   :  { %s8525_s22 = smov 0   ;;  %s8527_s23 = smov 0  }
   0xe   :  { %s8529_s24 = smov 0   ;;  %s8531_s25 = smov 0  }
   0xf   :  { %s8533_s26 = smov 0   ;;  %s8535_s27 = smov 0  }
  0x10   :  { %s8537_s28 = smov 0  }
  0x11 LB: > { %11008 = sst [smem:[#allocation13_spill]] %s8442_s20  ;;  %s8571_s29 = sadd.s32 4294967295, %s8474_s28   ;;  %s8474_s28 = sphi %s8537_s28, %s24_s28   ;;  %s8470_s27 = sphi %s8535_s27, %s11209_s27   ;;  %s8466_s26 = sphi %s8533_s26, %s11216_s26   ;;  %s8462_s25 = sphi %s8531_s25, %s11207_s25   ;;  %s8458_s24 = sphi %s8529_s24, %s11215_s24   ;;  %s8454_s23 = sphi %s8527_s23, %s11214_s23   ;;  %s8450_s22 = sphi %s8525_s22, %s11213_s22   ;;  %s8446_s21 = sphi %s8523_s21, %s11212_s21   ;;  %s8442_s20 = sphi %s8521_s20, %s11205_s20   ;;  %s8438_s19 = sphi %s8519_s19, %s11211_s19   ;;  %s8434_s18 = sphi %s8517_s18, %s11210_s18  }
  0x12   : > { %11009 = sst [smem:[#allocation14_spill]] %s8446_s21  ;;  %s33_s30 = sadd.s32 1, %s8466_s26 }
  0x13   : > { %11010 = sst [smem:[#allocation15_spill]] %s8458_s24  ;;  %p8574_p0 = scmp.ge.s32.totalorder %s33_s30, 2 }
  0x14   : > { %11011 = sst [smem:[#allocation16_spill]] %s8462_s25  ;;  %p51_p1 = scmp.eq.s32.totalorder %s8474_s28, 0 }
  0x15   : > { %11012 = sst [smem:[#allocation17_spill]] %s8470_s27  ;;  %p57_p2 = scmp.eq.s32.totalorder %s8571_s29, 0 }
  0x16   : > { %s69_s7 = sadd.s32 1, %s8442_s20  ;;  %s11218_s30 = smov (%p8574_p0, %s33_s30), 0 }
  0x17   : > { %11014 = sst [smem:[#allocation18_spill]] %s11218_s30  ;;  %p76_p3 = scmp.ne.s32.totalorder %s8442_s20, %s8438_s19 }
  0x18   : > { %p82_p4 = scmp.ne.s32.totalorder %s8438_s19, %s8434_s18  ;;  %s66_s8 = ssub.s32 %s8466_s26, %s11218_s30 }
  0x19   : > { %p67_p5 = scmp.eq.s32.totalorder %s66_s8, 0  ;;  %p78_p6 = por %p76_p3, %p51_p1 }
  0x1a   : > { %p8594_p7 = por %p82_p4, %p57_p2  ;;  %p10992_p8 = scmp.lt.s32.totalorder %s8474_s28, 4 }
  0x1b   : > { %s8600_s10 = scalar_select %p67_p5, %s8442_s20, %s69_s7  }
  0x1c   : > { %s231_s11 = sand.u32 1, %s8474_s28   ;;  %s233_s12 = sand.u32 1, %s8442_s20  }
  0x1d   : > { %11016 = sst [smem:[#allocation19_spill]] %s8600_s10  ;;  %s6771_s13 = sshll.u32 %s233_s12, 6 }
  0x1e   : > { %s7220_s14 = sshll.u32 %s8466_s26, 10  ;;  %s11017_s1 = sld [smem:[#allocation60_spill]] }
  0x1f   : > { %s235_s18 = scalar_lea.vmem [#allocation6], %s6771_s13  ;;  %p8610_p9 = pnand %p10992_p8, %p78_p6 }
  0x20   : > { %s242_s8 = sshll.u32 %s235_s18, 4  ;;  %s8614_s7 = smul.u32 576, %s233_s12  ;;  %s243_s8 = int_to_ptr.vmem [resolvable:$true] %s242_s8 }
  0x21   : > { %s8616_s10 = scalar_lea.sflag [#allocation7], %s231_s11  ;;  %p10991_p10 = pneg %p8610_p9 }
  0x22   : > { %s8279_s20 = scalar_lea.vmem %s243_s8, 1024  ;;  %s8476_s13 = smov [#allocation6]  }
  0x23   : > { %p8280_p11 = scmp.ne.s32.totalorder %s243_s8, %s8279_s20 }
  0x24   : > { %s241_s17 = scalar_lea.hbm %s11017_s1, %s7220_s14  ;;  %s8284_s14 = sshll.u32 %s8476_s13, 4  ;;  %s8285_s14 = int_to_ptr.vmem [resolvable:$false] %s8284_s14 }
  0x25   : > { %p8282_p12 = pnand %p8280_p11, %p10991_p10  ;;  %s8286_s15 = scalar_lea.vmem %s8285_s14, 2048 }
  0x26   : > { %p8287_p3 = scmp.lt.s32.totalorder %s243_s8, %s8285_s14  ;;  %p8288_p4 = scmp.lt.s32.totalorder %s8286_s15, %s8279_s20 }
  0x27   : > { %p8283_p13 = pneg %p8282_p12 }
  0x28   : > { %p8289_p5 = por %p8288_p4, %p8287_p3 }
  0x2a   : > { %p8290_p6 = pnand %p8289_p5, %p8283_p13 }
  0x2c   : > { %8293 = shalt.err (!%p8290_p6)
}
  0x2d   : > { %s10993_s12 = smov 64   ;;  %s10994_s20 = smov 4  }
  0x2e   : > { %7991 = dma.hbm_to_vmem [thread:$0]  (!%p8610_p9), %s241_s17, 1024, %s243_s8, %s8616_s10, %s10993_s12, %s10993_s12, %s10994_s20  }
  0x2f   : > { %p6775_p11 = scmp.ge.s32.totalorder %s8474_s28, 1  ;;  %p283_p12 = scmp.lt.s32.totalorder %s8474_s28, 5 }
  0x30   : > { %s6765_s16 = sadd.s32 4294967294, %s8474_s28   ;;  %s36_s18 = sadd.s32 1, %s8470_s27 }
  0x31   : > { %p8631_p13 = pnand %p6775_p11, %p283_p12  ;;  %s11220_s18 = smov (!%p8574_p0, %s36_s18), %s8470_s27 }
  0x32   : > { %s43_s13 = sadd.s32 1, %s8454_s23  ;;  %p50_p3 = scmp.ne.s32.totalorder %s8454_s23, %s8450_s22 }
  0x33   : > { %p38_p4 = scmp.ge.s32.totalorder %s11220_s18, 2  ;;  %p56_p5 = scmp.ne.s32.totalorder %s8450_s22, %s8446_s21 }
  0x34   : > { %p8647_p6 = por %p51_p1, %p50_p3  ;;  %p184_p11 = scmp.eq.s32.totalorder %s8571_s29, 3 }
  0x35   : > { %s11222_s18 = smov (%p38_p4, %s11220_s18), 0  ;;  %p8656_p12 = por %p57_p2, %p56_p5 }
  0x36   : > { %11021 = sst [smem:[#allocation20_spill]] %s11222_s18  ;;  %p8660_p0 = por %p184_p11, %p50_p3 }
  0x37   : > { %s40_s14 = ssub.s32 %s8470_s27, %s11222_s18  ;;  %p190_p1 = scmp.eq.s32.totalorder %s6765_s16, 3 }
  0x38   : > { %s11023_s8 = scalar_select %p8660_p0, 1, 0 }
  0x39   : > { %p41_p10 = scmp.eq.s32.totalorder %s40_s14, 0  ;;  %s210_s15 = sand.u32 1, %s8454_s23  }
  0x3a   : > { %p8667_p8 = por %p190_p1, %p56_p5  ;;  %s6768_s1 = sshll.u32 %s210_s15, 8 }
  0x3b   : > { %s8672_s20 = scalar_select %p41_p10, %s8454_s23, %s43_s13  }
  0x3c   : > { %s11024_s12 = scalar_select %p8667_p8, 1, 0 }
  0x3d   : > { %11025 = sst [smem:[#allocation21_spill]] %s8672_s20  ;;  %s7219_s21 = sshll.u32 %s8470_s27, 12 }
  0x3e   : > { %s11026_s0 = sld [smem:[#allocation59_spill]]  ;;  %s214_s2 = scalar_lea.vmem [#allocation3], %s6768_s1 }
  0x3f   : > { %s221_s24 = sshll.u32 %s214_s2, 4  ;;  %p11027_p2 = scmp.lt.s32.totalorder %s8474_s28, 4  ;;  %s222_s24 = int_to_ptr.vmem [resolvable:$true] %s221_s24 }
  0x40   : > { %s211_s14 = scalar_lea.sflag [#allocation4], %s210_s15  ;;  %s8307_s13 = scalar_lea.vmem %s222_s24, 4096 }
  0x41   : > { %p8682_p3 = pnand %p11027_p2, %p8647_p6  ;;  %p8308_p4 = scmp.ne.s32.totalorder %s222_s24, %s8307_s13 }
  0x42   : > { %s8479_s18 = smov [#allocation3]  }
  0x43   : > { %p8296_p10 = pneg %p8682_p3  ;;  %s8312_s5 = sshll.u32 %s8479_s18, 4  ;;  %s8313_s5 = int_to_ptr.vmem [resolvable:$false] %s8312_s5 }
  0x44   : > { %s220_s4 = scalar_lea.hbm %s11026_s0, %s7219_s21  ;;  %s8314_s1 = scalar_lea.vmem %s8313_s5, 8192 }
  0x45   : > { %p8310_p5 = pnand %p8308_p4, %p8296_p10  ;;  %p8315_p1 = scmp.lt.s32.totalorder %s222_s24, %s8313_s5 }
  0x46   : > { %p8316_p8 = scmp.lt.s32.totalorder %s8314_s1, %s8307_s13 }
  0x47   : > { %p8311_p11 = pneg %p8310_p5 }
  0x48   : > { %p8317_p0 = por %p8316_p8, %p8315_p1 }
  0x4a   : > { %p8318_p6 = pnand %p8317_p0, %p8311_p11 }
  0x4c   : > { %8321 = shalt.err (!%p8318_p6)
}
  0x4d   : > { %s8480_s2 = smov 128   ;;  %s8481_s21 = smov 8  }
  0x4e   : > { %7988 = dma.hbm_to_vmem [thread:$0]  (!%p8682_p3), %s220_s4, 4096, %s222_s24, %s211_s14, %s8480_s2, %s8480_s2, %s8481_s21  }
  0x4f   : > { %s7975_s25 = smul.u32 9216, %s8466_s26  ;;  %s262_s17 = scalar_lea.vmem [#allocation8], %s8614_s7 }
  0x50   : > { %s269_s15 = sshll.u32 %s262_s17, 4  ;;  %p11029_p0 = pneg %p8610_p9  ;;  %s270_s15 = int_to_ptr.vmem [resolvable:$true] %s269_s15 }
  0x51   : > { %s268_s5 = scalar_lea.hbm %s10986_s3, %s7975_s25  ;;  %s8335_s13 = scalar_lea.vmem %s270_s15, 9216 }
  0x52   : > { %p8336_p8 = scmp.ne.s32.totalorder %s270_s15, %s8335_s13  ;;  %s8482_s1 = smov [#allocation8]  }
  0x53   : > { %s8340_s27 = sshll.u32 %s8482_s1, 4  ;;  %s8341_s27 = int_to_ptr.vmem [resolvable:$false] %s8340_s27 }
  0x54   : > { %p8338_p2 = pnand %p8336_p8, %p11029_p0  ;;  %s8342_s20 = scalar_lea.vmem %s8341_s27, 18432 }
  0x55   : > { %p8343_p4 = scmp.lt.s32.totalorder %s270_s15, %s8341_s27  ;;  %p8344_p3 = scmp.lt.s32.totalorder %s8342_s20, %s8335_s13 }
  0x56   : > { %p8339_p10 = pneg %p8338_p2 }
  0x57   : > { %p8345_p5 = por %p8344_p3, %p8343_p4 }
  0x59   : > { %p8346_p11 = pnand %p8345_p5, %p8339_p10 }
  0x5b   : > { %8349 = shalt.err (!%p8346_p11)
}
  0x5c   : > { %s11030_s4 = smov 4   ;;  %s11031_s0 = smov 64  }
  0x5d   : > { %7994 = dma.hbm_to_vmem [thread:$0]  (!%p8610_p9), %s268_s5, 9216, %s270_s15, %s8616_s10, %s11031_s0, %s11031_s0, %s11030_s4  }
  0x5e   : > { %287 = sbr.rel (%p8631_p13) target bundleno = 1018 (0x3fa), region = 40 }
  0x63   : > { %s8707_s24 = sand.u32 1, %s8450_s22  }
  0x64   : > { %s6776_s27 = sshll.u32 %s8707_s24, 8  ;;  %s290_s7 = scalar_lea.sflag [#allocation4], %s8707_s24 }
  0x65   : > { %s8711_s20 = scalar_lea.vmem [#allocation3], %s6776_s27 }
  0x66   : > { %8421 = dma.done.wait (%p8656_p12), %s290_s7, 4096  }
  0x67   : > { %8423 = vsyncadd (%p8656_p12), %s290_s7, 4294963200  ;;  %s298_s30 = sand.u32 1, %s8571_s29   ;;  %s300_s10 = sand.u32 1, %s8438_s19  }
  0x68   : > { %s6777_s11 = sshll.u32 %s300_s10, 6  ;;  %s299_s16 = scalar_lea.sflag [#allocation7], %s298_s30 }
  0x69   : > { %s8719_s14 = scalar_lea.vmem [#allocation6], %s6777_s11 }
  0x6a   : > { %8425 = dma.done.wait (%p8594_p7), %s299_s16, 10240  }
  0x6b   : > { %8427 = vsyncadd (%p8594_p7), %s299_s16, 4294957056  ;;  %s11032_s2 = sld [smem:[#allocation15_spill]]  ;;  %s7976_s21 = smul.u32 576, %s300_s10 }
  0x6c   : > { %s11033_s29 = sld [smem:[#allocation61_spill]]  ;;  %s8739_s9 = scalar_lea.vmem [#allocation9], %s6776_s27 }
  0x6d   : > { %s11034_s13 = sld [smem:[#allocation62_spill]]  ;;  %s8737_s4 = scalar_lea.vmem [#allocation8], %s7976_s21 }
  0x71   : > { %p354_p9 = scmp.lt.s32.totalorder %s11032_s2, 1  ;;  %p6779_p7 = scmp.ne.s32.totalorder %s11032_s2, 0 }
  0x73   : > { %s8727_s6 = scalar_select %p354_p9, %s11032_s2, 1 }
  0x74   : > { %364 = sbr.rel (%p6779_p7) target bundleno = 138 (0x8a), region = 56 }
  0x75   : > { %s356_s15 = scalar_lea.vmem %s11033_s29, %s8727_s6  ;;  %s359_s1 = scalar_lea.vmem %s11034_s13, %s8727_s6 }
  0x79   : > { %v365_v0 = vld [vmem:[%s8711_s20] sm:$0xff]  ;;  %v366_v1 = vld [vmem:[%s8711_s20 + $0x8] sm:$0xff]  ;;  %v367_v2 = vld [vmem:[%s8711_s20 + $0x10] sm:$0xff] }
  0x7a   : > { %397 = vst [vmem:[%s8739_s9] sm:$0xff] %v365_v0  ;;  %398 = vst [vmem:[%s8739_s9 + $0x8] sm:$0xff] %v366_v1  ;;  %v368_v3 = vld [vmem:[%s8711_s20 + $0x18] sm:$0xff]  ;;  %v369_v4 = vld [vmem:[%s8711_s20 + $0x20] sm:$0xff] }
  0x7b   : > { %399 = vst [vmem:[%s8739_s9 + $0x10] sm:$0xff] %v367_v2  ;;  %v370_v5 = vld [vmem:[%s8711_s20 + $0x28] sm:$0xff]  ;;  %400 = vst [vmem:[%s8739_s9 + $0x18] sm:$0xff] %v368_v3  ;;  %v371_v6 = vld [vmem:[%s8711_s20 + $0x30] sm:$0xff] }
  0x7c   : > { %401 = vst [vmem:[%s8739_s9 + $0x20] sm:$0xff] %v369_v4  ;;  %402 = vst [vmem:[%s8739_s9 + $0x28] sm:$0xff] %v370_v5  ;;  %v372_v7 = vld [vmem:[%s8711_s20 + $0x38] sm:$0xff]  ;;  %v373_v8 = vld [vmem:[%s8711_s20 + $0x40] sm:$0xff] }
  0x7d   : > { %403 = vst [vmem:[%s8739_s9 + $0x30] sm:$0xff] %v371_v6  ;;  %404 = vst [vmem:[%s8739_s9 + $0x38] sm:$0xff] %v372_v7  ;;  %v374_v9 = vld [vmem:[%s8711_s20 + $0x48] sm:$0xff]  ;;  %v375_v10 = vld [vmem:[%s8711_s20 + $0x50] sm:$0xff] }
  0x7e   : > { %405 = vst [vmem:[%s8739_s9 + $0x40] sm:$0xff] %v373_v8  ;;  %v376_v11 = vld [vmem:[%s8711_s20 + $0x58] sm:$0xff]  ;;  %406 = vst [vmem:[%s8739_s9 + $0x48] sm:$0xff] %v374_v9  ;;  %v377_v12 = vld [vmem:[%s8711_s20 + $0x60] sm:$0xff] }
  0x7f   : > { %407 = vst [vmem:[%s8739_s9 + $0x50] sm:$0xff] %v375_v10  ;;  %408 = vst [vmem:[%s8739_s9 + $0x58] sm:$0xff] %v376_v11  ;;  %v378_v13 = vld [vmem:[%s8711_s20 + $0x68] sm:$0xff]  ;;  %v379_v14 = vld [vmem:[%s8711_s20 + $0x70] sm:$0xff] }
  0x80   : > { %409 = vst [vmem:[%s8739_s9 + $0x60] sm:$0xff] %v377_v12  ;;  %410 = vst [vmem:[%s8739_s9 + $0x68] sm:$0xff] %v378_v13  ;;  %v380_v15 = vld [vmem:[%s8711_s20 + $0x78] sm:$0xff]  ;;  %v381_v16 = vld [vmem:[%s8711_s20 + $0x80] sm:$0xff] }
  0x81   : > { %411 = vst [vmem:[%s8739_s9 + $0x70] sm:$0xff] %v379_v14  ;;  %v382_v17 = vld [vmem:[%s8711_s20 + $0x88] sm:$0xff]  ;;  %412 = vst [vmem:[%s8739_s9 + $0x78] sm:$0xff] %v380_v15  ;;  %v383_v18 = vld [vmem:[%s8711_s20 + $0x90] sm:$0xff] }
  0x82   : > { %413 = vst [vmem:[%s8739_s9 + $0x80] sm:$0xff] %v381_v16  ;;  %414 = vst [vmem:[%s8739_s9 + $0x88] sm:$0xff] %v382_v17  ;;  %v384_v19 = vld [vmem:[%s8711_s20 + $0x98] sm:$0xff]  ;;  %v385_v20 = vld [vmem:[%s8711_s20 + $0xa0] sm:$0xff] }
  0x83   : > { %415 = vst [vmem:[%s8739_s9 + $0x90] sm:$0xff] %v383_v18  ;;  %416 = vst [vmem:[%s8739_s9 + $0x98] sm:$0xff] %v384_v19  ;;  %v386_v21 = vld [vmem:[%s8711_s20 + $0xa8] sm:$0xff]  ;;  %v387_v22 = vld [vmem:[%s8711_s20 + $0xb0] sm:$0xff] }
  0x84   : > { %417 = vst [vmem:[%s8739_s9 + $0xa0] sm:$0xff] %v385_v20  ;;  %v388_v23 = vld [vmem:[%s8711_s20 + $0xb8] sm:$0xff]  ;;  %418 = vst [vmem:[%s8739_s9 + $0xa8] sm:$0xff] %v386_v21  ;;  %v389_v24 = vld [vmem:[%s8711_s20 + $0xc0] sm:$0xff] }
  0x85   : > { %419 = vst [vmem:[%s8739_s9 + $0xb0] sm:$0xff] %v387_v22  ;;  %420 = vst [vmem:[%s8739_s9 + $0xb8] sm:$0xff] %v388_v23  ;;  %v390_v25 = vld [vmem:[%s8711_s20 + $0xc8] sm:$0xff]  ;;  %v391_v26 = vld [vmem:[%s8711_s20 + $0xd0] sm:$0xff] }
  0x86   : > { %421 = vst [vmem:[%s8739_s9 + $0xc0] sm:$0xff] %v389_v24  ;;  %422 = vst [vmem:[%s8739_s9 + $0xc8] sm:$0xff] %v390_v25  ;;  %v392_v27 = vld [vmem:[%s8711_s20 + $0xd8] sm:$0xff]  ;;  %v393_v28 = vld [vmem:[%s8711_s20 + $0xe0] sm:$0xff] }
  0x87   : > { %423 = vst [vmem:[%s8739_s9 + $0xd0] sm:$0xff] %v391_v26  ;;  %v394_v29 = vld [vmem:[%s8711_s20 + $0xe8] sm:$0xff]  ;;  %424 = vst [vmem:[%s8739_s9 + $0xd8] sm:$0xff] %v392_v27  ;;  %v395_v30 = vld [vmem:[%s8711_s20 + $0xf0] sm:$0xff] }
  0x88   : > { %425 = vst [vmem:[%s8739_s9 + $0xe0] sm:$0xff] %v393_v28  ;;  %426 = vst [vmem:[%s8739_s9 + $0xe8] sm:$0xff] %v394_v29  ;;  %v396_v31 = vld [vmem:[%s8711_s20 + $0xf8] sm:$0xff] }
  0x89   : > { %427 = vst [vmem:[%s8739_s9 + $0xf0] sm:$0xff] %v395_v30  ;;  %428 = vst [vmem:[%s8739_s9 + $0xf8] sm:$0xff] %v396_v31 }
  0x8a PF: > { %v8096_v32 = vld [vmem:[%s8719_s14 + $0x38] sm:$0xff]   ;;  %v8097_v33 = vld [vmem:[%s8719_s14 + $0x30] sm:$0xff]   ;;  %v8098_v34 = vld [vmem:[%s8719_s14 + $0x28] sm:$0xff]   ;;  %v8483_v30 = vmov 0   ;;  %vm1054_vm0 = vsmask.f32 256 }
  0x8b   : > { %7494 = vmatprep.subr.bf16.mxu0 %v8096_v32  ;;  %v8099_v35 = vld [vmem:[%s8719_s14 + $0x20] sm:$0xff]   ;;  %v430_v37 = vld [vmem:[%s8739_s9 + $0x8] sm:$0xff]  ;;  %v8100_v39 = vld [vmem:[%s8719_s14 + $0x18] sm:$0xff]   ;;  %782 = vst [vmem:[#allocation2 + $0x24] sm:$0xf] %v8483_v30  ;;  %s11199_s11 = sld [smem:[#allocation16_spill]] }
  0x8c   : > { %7495 = vmatpush3.bf16.msra.mxu0 %v8096_v32  ;;  %v429_v36 = vld [vmem:[%s8739_s9] sm:$0xff]  ;;  %v8101_v40 = vld [vmem:[%s8719_s14 + $0x10] sm:$0xff]   ;;  %v8102_v41 = vld [vmem:[%s8719_s14 + $0x8] sm:$0xff]   ;;  %773 = vst [vmem:[#allocation2] sm:$0xf] %v8483_v30  ;;  %s11200_s6 = sld [smem:[#allocation63_spill]] }
  0x8d   : > { %7496 = vmatprep.subr.bf16.mxu0 %v8097_v33  ;;  %v461_v38 = vpack.c.bf16 %v430_v37, %v429_v36  ;;  %v8104_v42 = vld [vmem:[%s8737_s4 + $0x78] sm:$0xff]   ;;  %v8105_v43 = vld [vmem:[%s8737_s4 + $0x70] sm:$0xff]   ;;  %v8103_v44 = vld [vmem:[%s8719_s14] sm:$0xff]   ;;  %774 = vst [vmem:[#allocation2 + $0x4] sm:$0xf] %v8483_v30  ;;  %s6619_s14 = sshll.u32 %s8739_s9, 4  ;;  %s10918_s14 = int_to_ptr.vmem [resolvable:$true] %s6619_s14 }
  0x8e   : > { %7542 = vmatprep.subr.bf16.mxu1 %v8104_v42  ;;  %v431_v45 = vld [vmem:[%s8739_s9 + $0x10] sm:$0xff]  ;;  %v432_v46 = vld [vmem:[%s8739_s9 + $0x18] sm:$0xff]  ;;  %v433_v47 = vld [vmem:[%s8739_s9 + $0x20] sm:$0xff]  ;;  %775 = vst [vmem:[#allocation2 + $0x8] sm:$0xf] %v8483_v30  ;;  %s6606_s17 = scalar_lea.sflag [#allocation5], %s8707_s24 }
  0x8f   : > { %7510 = vmatprep.mubr.bf16.mxu0 %v461_v38  ;;  %7543 = vmatpush3.bf16.msra.mxu1 %v8104_v42  ;;  %v434_v48 = vld [vmem:[%s8739_s9 + $0x28] sm:$0xff]  ;;  %v462_v49 = vpack.c.bf16 %v432_v46, %v431_v45  ;;  %v435_v51 = vld [vmem:[%s8739_s9 + $0x30] sm:$0xff]  ;;  %v436_v52 = vld [vmem:[%s8739_s9 + $0x38] sm:$0xff]  ;;  %776 = vst [vmem:[#allocation2 + $0xc] sm:$0xf] %v8483_v30  ;;  %s8350_s29 = scalar_lea.vmem %s10918_s14, 4096 }
  0x90   : > { %7497 = vmatpush3.bf16.msra.mxu0 %v8097_v33  ;;  %7544 = vmatprep.subr.bf16.mxu1 %v8105_v43  ;;  %v463_v50 = vpack.c.bf16 %v434_v48, %v433_v47  ;;  %v437_v53 = vld [vmem:[%s8739_s9 + $0x40] sm:$0xff]  ;;  %v438_v54 = vld [vmem:[%s8739_s9 + $0x48] sm:$0xff]  ;;  %v464_v55 = vpack.c.bf16 %v436_v52, %v435_v51  ;;  %v439_v57 = vld [vmem:[%s8739_s9 + $0x50] sm:$0xff]  ;;  %777 = vst [vmem:[#allocation2 + $0x10] sm:$0xf] %v8483_v30  ;;  %p8351_p13 = scmp.ne.s32.totalorder %s10918_s14, %s8350_s29  ;;  %p11201_p12 = scmp.ne.s32.totalorder %s11023_s8, 0 }
  0x91   : > { %7498 = vmatprep.subr.bf16.mxu0 %v8098_v34  ;;  %v465_v56 = vpack.c.bf16 %v438_v54, %v437_v53  ;;  %v440_v58 = vld [vmem:[%s8739_s9 + $0x58] sm:$0xff]  ;;  %v441_v59 = vld [vmem:[%s8739_s9 + $0x60] sm:$0xff]  ;;  %v442_v60 = vld [vmem:[%s8739_s9 + $0x68] sm:$0xff]  ;;  %778 = vst [vmem:[#allocation2 + $0x14] sm:$0xf] %v8483_v30  ;;  %s7253_s16 = sshll.u32 %s11199_s11, 12 }
  0x92   : > { %v466_v61 = vpack.c.bf16 %v440_v58, %v439_v57  ;;  %v467_v62 = vpack.c.bf16 %v442_v60, %v441_v59  ;;  %v443_v63 = vld [vmem:[%s8739_s9 + $0x70] sm:$0xff]  ;;  %v444_v0 = vld [vmem:[%s8739_s9 + $0x78] sm:$0xff]  ;;  %v445_v1 = vld [vmem:[%s8739_s9 + $0x80] sm:$0xff]  ;;  %779 = vst [vmem:[#allocation2 + $0x18] sm:$0xf] %v8483_v30  ;;  %s10916_s25 = scalar_lea.hbm %s11200_s6, %s7253_s16  ;;  %p8352_p1 = pnand %p8351_p13, %p11201_p12 }
  0x93   : > { %7545 = vmatpush3.bf16.msra.mxu1 %v8105_v43  ;;  %v446_v2 = vld [vmem:[%s8739_s9 + $0x88] sm:$0xff]  ;;  %v468_v3 = vpack.c.bf16 %v444_v0, %v443_v63  ;;  %v447_v5 = vld [vmem:[%s8739_s9 + $0x90] sm:$0xff]  ;;  %v448_v6 = vld [vmem:[%s8739_s9 + $0x98] sm:$0xff]  ;;  %780 = vst [vmem:[#allocation2 + $0x1c] sm:$0xf] %v8483_v30 }
  0x94   : > { %7499 = vmatpush3.bf16.msra.mxu0 %v8098_v34  ;;  %v469_v4 = vpack.c.bf16 %v446_v2, %v445_v1  ;;  %v449_v7 = vld [vmem:[%s8739_s9 + $0xa0] sm:$0xff]  ;;  %v450_v8 = vld [vmem:[%s8739_s9 + $0xa8] sm:$0xff]  ;;  %v470_v9 = vpack.c.bf16 %v448_v6, %v447_v5  ;;  %v451_v11 = vld [vmem:[%s8739_s9 + $0xb0] sm:$0xff]  ;;  %781 = vst [vmem:[#allocation2 + $0x20] sm:$0xf] %v8483_v30  ;;  %p8353_p6 = pneg %p8352_p1 }
  0x95   : > { %7500 = vmatprep.subr.bf16.mxu0 %v8099_v35  ;;  %v471_v10 = vpack.c.bf16 %v450_v8, %v449_v7  ;;  %v452_v12 = vld [vmem:[%s8739_s9 + $0xb8] sm:$0xff]  ;;  %v453_v13 = vld [vmem:[%s8739_s9 + $0xc0] sm:$0xff]  ;;  %v454_v14 = vld [vmem:[%s8739_s9 + $0xc8] sm:$0xff]  ;;  %783 = vst [vmem:[#allocation2 + $0x28] sm:$0xf] %v8483_v30 }
  0x96   : > { %v472_v15 = vpack.c.bf16 %v452_v12, %v451_v11  ;;  %v473_v16 = vpack.c.bf16 %v454_v14, %v453_v13  ;;  %v455_v17 = vld [vmem:[%s8739_s9 + $0xd0] sm:$0xff]  ;;  %v456_v18 = vld [vmem:[%s8739_s9 + $0xd8] sm:$0xff]  ;;  %v457_v19 = vld [vmem:[%s8739_s9 + $0xe0] sm:$0xff]  ;;  %784 = vst [vmem:[#allocation2 + $0x2c] sm:$0xf] %v8483_v30 }
  0x97   : > { %v458_v20 = vld [vmem:[%s8739_s9 + $0xe8] sm:$0xff]  ;;  %v474_v21 = vpack.c.bf16 %v456_v18, %v455_v17  ;;  %v459_v23 = vld [vmem:[%s8739_s9 + $0xf0] sm:$0xff]  ;;  %v460_v24 = vld [vmem:[%s8739_s9 + $0xf8] sm:$0xff]  ;;  %785 = vst [vmem:[#allocation2 + $0x30] sm:$0xf] %v8483_v30 }
  0x98   : > { %7501 = vmatpush3.bf16.msra.mxu0 %v8099_v35  ;;  %v475_v22 = vpack.c.bf16 %v458_v20, %v457_v19  ;;  %v476_v25 = vpack.c.bf16 %v460_v24, %v459_v23  ;;  %v8107_v26 = vld [vmem:[%s8737_s4 + $0x38] sm:$0xff]   ;;  %v8106_v27 = vld [vmem:[%s8737_s4 + $0x68] sm:$0xff]   ;;  %v8109_v28 = vld [vmem:[%s8737_s4 + $0x30] sm:$0xff]   ;;  %786 = vst [vmem:[#allocation2 + $0x34] sm:$0xf] %v8483_v30 }
  0x99   : > { %7502 = vmatprep.subr.bf16.mxu0 %v8100_v39  ;;  %7546 = vmatprep.subr.bf16.mxu1 %v8106_v27  ;;  %v8852_v29 = vld [vmem:[%s8737_s4 + $0x60] sm:$0xff]   ;;  %787 = vst [vmem:[#allocation2 + $0x38] sm:$0xf] %v8483_v30  ;;  %788 = vst [vmem:[#allocation2 + $0x3c] sm:$0xf] %v8483_v30  ;;  %v8111_v31 = vld [vmem:[%s8737_s4 + $0x28] sm:$0xff]  }
  0x9a   : > { %7547 = vmatpush3.bf16.msra.mxu1 %v8106_v27  ;;  %789 = vst [vmem:[#allocation2 + $0x40] sm:$0xf] %v8483_v30  ;;  %790 = vst [vmem:[#allocation2 + $0x44] sm:$0xf] %v8483_v30  ;;  %v8110_v32 = vld [vmem:[%s8737_s4 + $0x58] sm:$0xff]   ;;  %v8113_v33 = vld [vmem:[%s8737_s4 + $0x20] sm:$0xff]  }
  0x9b   : > { %7548 = vmatprep.subr.bf16.mxu1 %v8852_v29  ;;  %791 = vst [vmem:[#allocation2 + $0x48] sm:$0xf] %v8483_v30  ;;  %792 = vst [vmem:[#allocation2 + $0x4c] sm:$0xf] %v8483_v30  ;;  %v8112_v34 = vld [vmem:[%s8737_s4 + $0x50] sm:$0xff]   ;;  %v8115_v35 = vld [vmem:[%s8737_s4 + $0x18] sm:$0xff]  }
  0x9c   : > { %7503 = vmatpush3.bf16.msra.mxu0 %v8100_v39  ;;  %793 = vst [vmem:[#allocation2 + $0x50] sm:$0xf] %v8483_v30  ;;  %794 = vst [vmem:[#allocation2 + $0x54] sm:$0xf] %v8483_v30  ;;  %v8114_v36 = vld [vmem:[%s8737_s4 + $0x48] sm:$0xff]   ;;  %v8117_v37 = vld [vmem:[%s8737_s4 + $0x10] sm:$0xff]  }
  0x9d   : > { %7504 = vmatprep.subr.bf16.mxu0 %v8101_v40  ;;  %795 = vst [vmem:[#allocation2 + $0x58] sm:$0xf] %v8483_v30  ;;  %796 = vst [vmem:[#allocation2 + $0x5c] sm:$0xf] %v8483_v30  ;;  %v8116_v38 = vld [vmem:[%s8737_s4 + $0x40] sm:$0xff]   ;;  %v8947_v60 = vld [vmem:[%s8737_s4 + $0xb8] sm:$0xff]  }
  0x9e   : > { %797 = vst [vmem:[#allocation2 + $0x60] sm:$0xf] %v8483_v30  ;;  %798 = vst [vmem:[#allocation2 + $0x64] sm:$0xf] %v8483_v30  ;;  %7549 = vmatpush3.bf16.msra.mxu1 %v8852_v29  ;;  %v1007_v39 = vld [vmem:[#allocation2 + $0x4] sm:$0xf] }
  0x9f   : > { %799 = vst [vmem:[#allocation2 + $0x68] sm:$0xf] %v8483_v30  ;;  %800 = vst [vmem:[#allocation2 + $0x6c] sm:$0xf] %v8483_v30  ;;  %7550 = vmatprep.subr.bf16.mxu1 %v8110_v32  ;;  %v1066_v46 = vshll.u32 %v1007_v39, 16  ;;  %v8123_v54 = vld [vmem:[%s8737_s4] sm:$0xff]  }
  0xa0   : > { %7505 = vmatpush3.bf16.msra.mxu0 %v8101_v40  ;;  %801 = vst [vmem:[#allocation2 + $0x70] sm:$0xf] %v8483_v30  ;;  %802 = vst [vmem:[#allocation2 + $0x74] sm:$0xf] %v8483_v30  ;;  %v1008_v40 = vld [vmem:[#allocation2 + $0x8] sm:$0xf] }
  0xa1   : > { %7506 = vmatprep.subr.bf16.mxu0 %v8102_v41  ;;  %803 = vst [vmem:[#allocation2 + $0x78] sm:$0xf] %v8483_v30  ;;  %804 = vst [vmem:[#allocation2 + $0x7c] sm:$0xf] %v8483_v30  ;;  %v1072_v42 = vshrl.u32 %v1008_v40, 16  ;;  %v6853_v43 = vcombine.low %v1007_v39, %v1008_v40  ;;  %v1075_v48 = vshll.u32 %v1008_v40, 16 }
  0xa2   : > { %805 = vst [vmem:[#allocation2 + $0x80] sm:$0xf] %v8483_v30  ;;  %806 = vst [vmem:[#allocation2 + $0x84] sm:$0xf] %v8483_v30  ;;  %7551 = vmatpush3.bf16.msra.mxu1 %v8110_v32  ;;  %vm1055_vm1 = vsmask.f32 4368 }
  0xa3   : > { %807 = vst [vmem:[#allocation2 + $0x88] sm:$0xf] %v8483_v30  ;;  %808 = vst [vmem:[#allocation2 + $0x8c] sm:$0xf] %v8483_v30  ;;  %7552 = vmatprep.subr.bf16.mxu1 %v8112_v34  ;;  %v1074_v47 = vrot.slane %v1072_v42, 7  ;;  %7558 = vmatprep.mubr.bf16.mxu1 %v6853_v43 }
  0xa4   : > { %7507 = vmatpush3.bf16.msra.mxu0 %v8102_v41  ;;  %809 = vst [vmem:[#allocation2 + $0x90] sm:$0xf] %v8483_v30  ;;  %810 = vst [vmem:[#allocation2 + $0x94] sm:$0xf] %v8483_v30  ;;  %v1063_v41 = vshrl.u32 %v1007_v39, 16 }
  0xa5   : > { %7508 = vmatprep.subr.bf16.mxu0 %v8103_v44  ;;  %811 = vst [vmem:[#allocation2 + $0x98] sm:$0xf] %v8483_v30  ;;  %812 = vst [vmem:[#allocation2 + $0x9c] sm:$0xf] %v8483_v30  ;;  %v1077_v52 = vor.u32 %v1075_v48, %v1074_v47  ;;  %v1009_v63 = vld [vmem:[#allocation2 + $0x10] sm:$0x8] }
  0xa6   : > { %813 = vst [vmem:[#allocation2 + $0xa0] sm:$0xf] %v8483_v30  ;;  %814 = vst [vmem:[#allocation2 + $0xa4] sm:$0xf] %v8483_v30  ;;  %7553 = vmatpush3.bf16.msra.mxu1 %v8112_v34  ;;  %v1065_v45 = vrot.slane %v1063_v41, 7 }
  0xa7   : > { %815 = vst [vmem:[#allocation2 + $0xa8] sm:$0xf] %v8483_v30  ;;  %816 = vst [vmem:[#allocation2 + $0xac] sm:$0xf] %v8483_v30  ;;  %7554 = vmatprep.subr.bf16.mxu1 %v8114_v36  ;;  %v1018_v0 = vld [vmem:[#allocation2 + $0x40] sm:$0x8] }
  0xa8   : > { %7509 = vmatpush3.bf16.msra.mxu0 %v8103_v44  ;;  %817 = vst [vmem:[#allocation2 + $0xb0] sm:$0xf] %v8483_v30  ;;  %818 = vst [vmem:[#allocation2 + $0xb4] sm:$0xf] %v8483_v30  ;;  %v8119_v44 = vld [vmem:[%s8737_s4 + $0x8] sm:$0xff]   ;;  %v1070_v51 = vrot.slane %v1065_v45, 4 }
  0xa9   : > { %7590 = vmatprep.subr.bf16.mxu0 %v8107_v26  ;;  %819 = vst [vmem:[#allocation2 + $0xb8] sm:$0xf] %v8483_v30  ;;  %820 = vst [vmem:[#allocation2 + $0xbc] sm:$0xf] %v8483_v30  ;;  %v1015_v2 = vld [vmem:[#allocation2 + $0x30] sm:$0x8] }
  0xaa   : > { %821 = vst [vmem:[#allocation2 + $0xc0] sm:$0xf] %v8483_v30  ;;  %822 = vst [vmem:[#allocation2 + $0xc4] sm:$0xf] %v8483_v30  ;;  %7555 = vmatpush3.bf16.msra.mxu1 %v8114_v36  ;;  %v1146_v5 = vshrl.u32 %v1018_v0, 16  ;;  %v1124_v8 = vshrl.u32 %v1015_v2, 16 }
  0xab   : > { %7511 = vmatmul.mubr.bf16.vlgmr.msra.gmra.mxu0 %v462_v49  ;;  %823 = vst [vmem:[#allocation2 + $0xc8] sm:$0xf] %v8483_v30  ;;  %824 = vst [vmem:[#allocation2 + $0xcc] sm:$0xf] %v8483_v30  ;;  %7556 = vmatprep.subr.bf16.mxu1 %v8116_v38  ;;  %v1006_v49 = vld [vmem:[#allocation2] sm:$0x8] }
  0xac   : > { %7514 = vmatprep.mubr.bf16.mxu0 %v463_v50  ;;  %7591 = vmatpush3.bf16.msra.mxu0 %v8107_v26  ;;  %825 = vst [vmem:[#allocation2 + $0xd0] sm:$0xf] %v8483_v30  ;;  %826 = vst [vmem:[#allocation2 + $0xd4] sm:$0xf] %v8483_v30  ;;  %v1068_v50 = vor.u32 %v1066_v46, %v1065_v45  ;;  %v1058_v53 = vshrl.u32 %v1006_v49, 16  ;;  %v8960_v23 = vrot.slane %v1146_v5, 11 }
  0xad   : > { %7592 = vmatprep.subr.bf16.mxu0 %v8109_v28  ;;  %827 = vst [vmem:[#allocation2 + $0xd8] sm:$0xf] %v8483_v30  ;;  %828 = vst [vmem:[#allocation2 + $0xdc] sm:$0xf] %v8483_v30  ;;  %v1021_v6 = vld [vmem:[#allocation2 + $0x50] sm:$0x8] }
  0xae   : > { %829 = vst [vmem:[#allocation2 + $0xe0] sm:$0xf] %v8483_v30  ;;  %830 = vst [vmem:[#allocation2 + $0xe4] sm:$0xf] %v8483_v30  ;;  %7557 = vmatpush3.bf16.msra.mxu1 %v8116_v38  ;;  %v1030_v7 = vld [vmem:[#allocation2 + $0x80] sm:$0x8] }
  0xaf   : > { %831 = vst [vmem:[#allocation2 + $0xe8] sm:$0xf] %v8483_v30  ;;  %832 = vst [vmem:[#allocation2 + $0xec] sm:$0xf] %v8483_v30  ;;  %7638 = vmatprep.subr.bf16.mxu1 %v8947_v60  ;;  %v1036_v11 = vld [vmem:[#allocation2 + $0xa0] sm:$0x8] }
  0xb0   : > { %7593 = vmatpush3.bf16.msra.mxu0 %v8109_v28  ;;  %833 = vst [vmem:[#allocation2 + $0xf0] sm:$0xf] %v8483_v30  ;;  %834 = vst [vmem:[#allocation2 + $0xf4] sm:$0xf] %v8483_v30  ;;  %v1168_v13 = vshrl.u32 %v1021_v6, 16  ;;  %v1234_v14 = vshrl.u32 %v1030_v7, 16 }
  0xb1   : > { %835 = vst [vmem:[#allocation2 + $0xf8] sm:$0xf] %v8483_v30  ;;  %836 = vst [vmem:[#allocation2 + $0xfc] sm:$0xf] %v8483_v30  ;;  %7594 = vmatprep.subr.bf16.mxu0 %v8111_v31  ;;  %v1278_v18 = vshrl.u32 %v1036_v11, 16 }
  0xb2   : > { %837 = vst [vmem:[#allocation2 + $0x100] sm:$0xf] %v8483_v30  ;;  %838 = vst [vmem:[#allocation2 + $0x104] sm:$0xf] %v8483_v30  ;;  %v2020_v19 = vld [vmem:[#allocation2 + $0x4] sm:$0xf] }
  0xb3   : > { %7515 = vmatmul.mubr.bf16.gmra.mxu0 %v464_v55  ;;  %839 = vst [vmem:[#allocation2 + $0x108] sm:$0xf] %v8483_v30  ;;  %840 = vst [vmem:[#allocation2 + $0x10c] sm:$0xf] %v8483_v30  ;;  %v6821_v55 = vrot.slane %v1058_v53, 11  ;;  %v8970_v38 = vrot.slane %v1278_v18, 11 }
  0xb4   : > { %7518 = vmatprep.mubr.bf16.mxu0 %v465_v56  ;;  %841 = vst [vmem:[#allocation2 + $0x110] sm:$0xf] %v8483_v30  ;;  %842 = vst [vmem:[#allocation2 + $0x114] sm:$0xf] %v8483_v30  ;;  %7595 = vmatpush3.bf16.msra.mxu0 %v8111_v31  ;;  %v2021_v20 = vld [vmem:[#allocation2 + $0x8] sm:$0xf] }
  0xb5   : > { %843 = vst [vmem:[#allocation2 + $0x118] sm:$0xf] %v8483_v30  ;;  %844 = vst [vmem:[#allocation2 + $0x11c] sm:$0xf] %v8483_v30  ;;  %7596 = vmatprep.subr.bf16.mxu0 %v8113_v33  ;;  %v1045_v28 = vld [vmem:[#allocation2 + $0xd0] sm:$0x8] }
  0xb6   : > { %vm8938_vm2 = vmor %vm1054_vm0, %vm1055_vm1  ;;  %v1048_v29 = vld [vmem:[#allocation2 + $0xe0] sm:$0x8]  ;;  %v2072_v30 = vshrl.u32 %v2020_v19, 16  ;;  %v2075_v31 = vshll.u32 %v2020_v19, 16  ;;  %v2081_v32 = vshll.u32 %v2021_v20, 16  ;;  %v1344_v41 = vshrl.u32 %v1045_v28, 16 }
  0xb7   : > { %v1069_v57 = vsel %vm8938_vm2, %v6821_v55, %v1068_v50  ;;  %v1078_v58 = vsel %vm8938_vm2, %v1070_v51, %v1077_v52  ;;  %v2777_v34 = vld [vmem:[#allocation2 + $0x10] sm:$0x8]  ;;  %v2025_v39 = vld [vmem:[#allocation2 + $0x1c] sm:$0x1]  ;;  %v2780_v43 = vld [vmem:[#allocation2 + $0x20] sm:$0x8] }
  0xb8   : > { %7597 = vmatpush3.bf16.msra.mxu0 %v8113_v33  ;;  %v6877_v59 = vcombine.low %v1069_v57, %v1078_v58  ;;  %v2085_v33 = vshrl.u32 %v2021_v20, 16  ;;  %v1051_v42 = vld [vmem:[#allocation2 + $0xf0] sm:$0x8]  ;;  %v1366_v46 = vshrl.u32 %v1048_v29, 16  ;;  %v2022_v47 = vld [vmem:[#allocation2 + $0xc] sm:$0x1] }
  0xb9   : > { %7598 = vmatprep.subr.bf16.mxu0 %v8115_v35  ;;  %v2826_v48 = vshrl.u32 %v2777_v34, 16  ;;  %v8981_v49 = vld [vmem:[%s356_s15] ss:$0 sm:$0xff]  ;;  %vm2068_vm3 = vsmask.f32 3328  ;;  %v2074_v50 = vrot.slane %v2072_v30, 4 }
  0xba   : > { %vm2069_vm4 = vsmask.f32 7440  ;;  %v2077_v51 = vrot.slane %v2075_v31, 5  ;;  %v8983_v52 = vrot.slane %v2081_v32, 5  ;;  %v2087_v53 = vrot.slane %v2085_v33, 4  ;;  %s8484_s15 = smov [#allocation9]  }
  0xbb   : > { %7519 = vmatmul.mubr.bf16.gmra.mxu0 %v466_v61  ;;  %v8951_v61 = vld [vmem:[%s8737_s4 + $0xf8] sm:$0xff]   ;;  %v2028_v55 = vld [vmem:[#allocation2 + $0x2c] sm:$0x1]  ;;  %v2848_v57 = vshrl.u32 %v2780_v43, 16  ;;  %v2091_v0 = vshll.u32 %v2022_v47, 16  ;;  %vm9021_vm5 = vmor %vm2068_vm3, %vm2069_vm4  ;;  %s8354_s18 = sshll.u32 %s8484_s15, 4  ;;  %s8355_s18 = int_to_ptr.vmem [resolvable:$false] %s8354_s18 }
  0xbc   : > { %7522 = vmatprep.mubr.bf16.mxu0 %v467_v62  ;;  %7599 = vmatpush3.bf16.msra.mxu0 %v8115_v35  ;;  %v1012_v62 = vld [vmem:[#allocation2 + $0x20] sm:$0x8]  ;;  %v8964_v35 = vrot.slane %v1168_v13, 11  ;;  %v2031_v58 = vld [vmem:[#allocation2 + $0x3c] sm:$0x1]  ;;  %s8356_s5 = scalar_lea.vmem %s8355_s18, 8192  ;;  %p8357_p8 = scmp.lt.s32.totalorder %s10918_s14, %s8355_s18 }
  0xbd   : > { %7600 = vmatprep.subr.bf16.mxu0 %v8117_v37  ;;  %v1102_v1 = vshrl.u32 %v1012_v62, 16  ;;  %v2783_v5 = vld [vmem:[#allocation2 + $0x30] sm:$0x8]  ;;  %v2786_v6 = vld [vmem:[#allocation2 + $0x40] sm:$0x8]  ;;  %v2163_v11 = vshll.u32 %v2031_v58, 16  ;;  %p8358_p0 = scmp.lt.s32.totalorder %s8356_s5, %s8350_s29 }
  0xbe   : > { %v9000_v18 = vrot.slane %v2091_v0, 5  ;;  %v2870_v20 = vshrl.u32 %v2783_v5, 16  ;;  %v2034_v29 = vld [vmem:[#allocation2 + $0x4c] sm:$0x1]  ;;  %v2037_v30 = vld [vmem:[#allocation2 + $0x5c] sm:$0x1] }
  0xbf   : > { %v8954_v12 = vrot.slane %v1102_v1, 11  ;;  %v2115_v1 = vshll.u32 %v2025_v39, 16  ;;  %v9011_v39 = vrot.slane %v2163_v11, 5  ;;  %v2792_v47 = vld [vmem:[#allocation2 + $0x60] sm:$0x8]  ;;  %v11038_v0 = vmov 0  ;;  %p8359_p2 = por %p8358_p0, %p8357_p8 }
  0xc0   : > { %7601 = vmatpush3.bf16.msra.mxu0 %v8117_v37  ;;  %v8968_v37 = vrot.slane %v1234_v14, 11  ;;  %v11039_v0 = vsel %vm9021_vm5, 4294967295, %v11038_v0  ;;  %v2798_v11 = vld [vmem:[#allocation2 + $0x80] sm:$0x8] }
  0xc1   : > { %7602 = vmatprep.subr.bf16.mxu0 %v8119_v44  ;;  %v9002_v19 = vrot.slane %v2115_v1, 5  ;;  %11040 = vst [vmem:[#allocation22_spill] sm:$0xff] %v11039_v0  ;;  %v2040_v1 = vld [vmem:[#allocation2 + $0x6c] sm:$0x1]  ;;  %p8360_p10 = pnand %p8359_p2, %p8353_p6 }
  0xc3   : > { %7523 = vmatmul.mubr.bf16.gmra.mxu0 %v468_v3  ;;  %v1024_v3 = vld [vmem:[#allocation2 + $0x60] sm:$0x8] }
  0xc4   : > { %7526 = vmatprep.mubr.bf16.mxu0 %v469_v4  ;;  %7603 = vmatpush3.bf16.msra.mxu0 %v8119_v44  ;;  %v1080_v4 = vshrl.u32 %v1009_v63, 16  ;;  %v8987_v63 = vrot.slane %v1344_v41, 11 }
  0xc5   : > { %7604 = vmatprep.subr.bf16.mxu0 %v8123_v54 }
  0xc8   : > { %7605 = vmatpush3.bf16.msra.mxu0 %v8123_v54  ;;  %v1388_v54 = vshrl.u32 %v1051_v42, 16 }
  0xc9   : > { %7686 = vmatprep.subr.bf16.mxu0 %v8951_v61 }
  0xcb   : > { %7527 = vmatmul.mubr.bf16.gmra.mxu0 %v470_v9  ;;  %v1190_v9 = vshrl.u32 %v1024_v3, 16  ;;  %v8990_v3 = vrot.slane %v1366_v46, 11  ;;  %v2789_v46 = vld [vmem:[#allocation2 + $0x50] sm:$0x8] }
  0xcc   : > { %7530 = vmatprep.mubr.bf16.mxu0 %v471_v10  ;;  %v1027_v10 = vld [vmem:[#allocation2 + $0x70] sm:$0x8] }
  0xcd   : > { %v1212_v17 = vshrl.u32 %v1027_v10, 16  ;;  %v8962_v24 = vrot.slane %v1190_v9, 11  ;;  %v2088_v9 = vor.u32 %v2087_v53, %v8983_v52  ;;  %v2139_v10 = vshll.u32 %v2028_v55, 16 }
  0xcf   : > { %v8966_v36 = vrot.slane %v1212_v17, 11  ;;  %v9007_v33 = vrot.slane %v2088_v9, 4  ;;  %v9009_v34 = vrot.slane %v2139_v10, 5  ;;  %v2936_v9 = vshrl.u32 %v2792_v47, 16  ;;  %v2795_v10 = vld [vmem:[#allocation2 + $0x70] sm:$0x8] }
  0xd3   : > { %7531 = vmatmul.mubr.bf16.gmra.mxu0 %v472_v15  ;;  %v1033_v15 = vld [vmem:[#allocation2 + $0x90] sm:$0x8] }
  0xd4   : > { %7534 = vmatprep.mubr.bf16.mxu0 %v473_v16  ;;  %v1039_v16 = vld [vmem:[#allocation2 + $0xb0] sm:$0x8]  ;;  %v1256_v26 = vshrl.u32 %v1033_v15, 16  ;;  %v8996_v15 = vrot.slane %v1388_v54, 11  ;;  %v2211_v54 = vshll.u32 %v2037_v30, 16 }
  0xd5   : > { %v1300_v27 = vshrl.u32 %v1039_v16, 16  ;;  %v8998_v16 = vrot.slane %v2848_v57, 11 }
  0xd6   : > { %v8972_v44 = vrot.slane %v1256_v26, 11 }
  0xd7   : > { %v8974_v45 = vrot.slane %v1300_v27, 11 }
  0xdb   : > { %7535 = vmatmul.mubr.bf16.gmra.mxu0 %v474_v21  ;;  %v8956_v21 = vrot.slane %v1080_v4, 11  ;;  %v8992_v4 = vrot.slane %v2826_v48, 11 }
  0xdc   : > { %7538 = vmatprep.mubr.bf16.mxu0 %v475_v22  ;;  %v8958_v22 = vrot.slane %v1124_v8, 11  ;;  %v2078_v8 = vor.u32 %v2077_v51, %v2074_v50  ;;  %v9014_v50 = vrot.slane %v2870_v20, 11  ;;  %v2187_v51 = vshll.u32 %v2034_v29, 16 }
  0xde   : > { %v9005_v32 = vrot.slane %v2078_v8, 4  ;;  %v2914_v8 = vshrl.u32 %v2789_v46, 16 }
  0xe3   : > { %7539 = vmatmul.mubr.bf16.gmra.mxu0 %v476_v25  ;;  %v1042_v25 = vld [vmem:[#allocation2 + $0xc0] sm:$0x8] }
  0xe4   : > { %7606 = vmatprep.mubr.bf16.mxu0 %v6877_v59  ;;  %v1322_v40 = vshrl.u32 %v1042_v25, 16  ;;  %v2892_v25 = vshrl.u32 %v2786_v6, 16  ;;  %v2084_v6 = vsel %vm9021_vm5, %v9005_v32, %v8983_v52  ;;  %v2980_v52 = vshrl.u32 %v2798_v11, 16 }
  0xe6   : > { %v8985_v62 = vrot.slane %v1322_v40, 11  ;;  %v9016_v53 = vrot.slane %v2892_v25, 11 }
 0x16b   : > { %v7512_v59 = vpop.f32.mrf.mxu0 }
 0x16c   : > { %v591_v2 = vadd.f32 %v7512_v59, %v8981_v49 }
 0x16d   : > { %v582_v7 = vpop.f32.mrf.mxu0 }
 0x16e   : > { %v711_v13 = vmul.f32 0.1, %v591_v2  ;;  %v583_v14 = vadd.f32 %v8981_v49, %v582_v7  ;;  %v2094_v7 = vsel %vm9021_vm5, %v9007_v33, %v9000_v18  ;;  %v9035_v33 = vrot.slane %v2187_v51, 5 }
 0x16f   : > { %v7513_v17 = vpop.f32.mrf.mxu0 }
 0x170   : > { %v743_v26 = vmax.f32 %v591_v2, %v711_v13  ;;  %v709_v27 = vmul.f32 0.1, %v583_v14  ;;  %v594_v28 = vadd.f32 %v7513_v17, %v8981_v49  ;;  %v2043_v2 = vld [vmem:[#allocation2 + $0x7c] sm:$0x1] }
 0x171   : > { %v585_v31 = vpop.f32.mrf.mxu0 }
 0x172   : > { %v7223_v40 = vpack.c.bf16 %v743_v26, %v743_v26  ;;  %v741_v41 = vmax.f32 %v583_v14, %v709_v27  ;;  %v712_v42 = vmul.f32 0.1, %v594_v28  ;;  %v586_v43 = vadd.f32 %v8981_v49, %v585_v31 }
 0x173   : > { %v7516_v48 = vpop.f32.mrf.mxu0  ;;  %v2235_v26 = vshll.u32 %v2040_v1, 16  ;;  %v2259_v27 = vshll.u32 %v2043_v2, 16 }
 0x174   : > { %976 = vst [vmem:[#allocation2 + $0x24] sm:$0xf] %v7223_v40  ;;  %v7221_v55 = vpack.c.bf16 %v741_v41, %v741_v41  ;;  %v744_v57 = vmax.f32 %v594_v28, %v712_v42  ;;  %v710_v58 = vmul.f32 0.1, %v586_v43  ;;  %v607_v59 = vadd.f32 %v7516_v48, %v8981_v49 }
 0x175   : > { %v598_v5 = vpop.f32.mrf.mxu0  ;;  %v2958_v28 = vshrl.u32 %v2795_v10, 16  ;;  %v9037_v40 = vrot.slane %v2211_v54, 5  ;;  %v9039_v41 = vrot.slane %v2914_v8, 11  ;;  %v9041_v42 = vrot.slane %v2936_v9, 11 }
 0x176   : > { %974 = vst [vmem:[#allocation2 + $0x14] sm:$0xf] %v7221_v55  ;;  %v7224_v13 = vpack.c.bf16 %v744_v57, %v744_v57  ;;  %v742_v14 = vmax.f32 %v586_v43, %v710_v58  ;;  %v715_v17 = vmul.f32 0.1, %v607_v59  ;;  %v599_v20 = vadd.f32 %v8981_v49, %v598_v5 }
 0x177   : > { %v7517_v25 = vpop.f32.mrf.mxu0  ;;  %v9046_v58 = vrot.slane %v2235_v26, 5  ;;  %v9050_v51 = vrot.slane %v2958_v28, 11  ;;  %v9052_v54 = vrot.slane %v2980_v52, 11 }
 0x178   : > { %977 = vst [vmem:[#allocation2 + $0x28] sm:$0xf] %v7224_v13  ;;  %v7222_v29 = vpack.c.bf16 %v742_v14, %v742_v14  ;;  %v747_v30 = vmax.f32 %v607_v59, %v715_v17  ;;  %v713_v31 = vmul.f32 0.1, %v599_v20  ;;  %v610_v18 = vadd.f32 %v7517_v25, %v8981_v49 }
 0x179   : > { %v601_v32 = vpop.f32.mrf.mxu0  ;;  %v9048_v59 = vrot.slane %v2259_v27, 5  ;;  %11042 = vst [vmem:[#allocation24_spill] sm:$0xff] %v9050_v51  ;;  %11043 = vst [vmem:[#allocation25_spill] sm:$0xff] %v9052_v54  ;;  %v9057_v14 = vcombine.low %v2084_v6, %v2094_v7 }
 0x17a   : > { %975 = vst [vmem:[#allocation2 + $0x18] sm:$0xf] %v7222_v29  ;;  %v7227_v43 = vpack.c.bf16 %v747_v30, %v747_v30  ;;  %v745_v46 = vmax.f32 %v599_v20, %v713_v31  ;;  %v716_v47 = vmul.f32 0.1, %v610_v18  ;;  %v602_v48 = vadd.f32 %v8981_v49, %v601_v32 }
 0x17b   : > { %v7520_v55 = vpop.f32.mrf.mxu0  ;;  %v9044_v57 = vld [vmem:[#allocation2 + $0x24] sm:$0xf]  ;;  %11041 = vst [vmem:[#allocation23_spill] sm:$0xff] %v9048_v59 }
 0x17c   : > { %980 = vst [vmem:[#allocation2 + $0x44] sm:$0xf] %v7227_v43  ;;  %v7225_v1 = vpack.c.bf16 %v745_v46, %v745_v46  ;;  %v748_v2 = vmax.f32 %v610_v18, %v716_v47  ;;  %v714_v5 = vmul.f32 0.1, %v602_v48  ;;  %v623_v8 = vadd.f32 %v7520_v55, %v8981_v49 }
 0x17d   : > { %v614_v9 = vpop.f32.mrf.mxu0  ;;  %v1010_v10 = vld [vmem:[#allocation2 + $0x14] sm:$0xf]  ;;  %v1107_v11 = vshrl.u32 %v9044_v57, 16  ;;  %v1110_v13 = vshll.u32 %v9044_v57, 16 }
 0x17e   : > { %v9059_v17 = vld [vmem:[#allocation2 + $0x14] sm:$0xf]  ;;  %978 = vst [vmem:[#allocation2 + $0x34] sm:$0xf] %v7225_v1  ;;  %v7228_v20 = vpack.c.bf16 %v748_v2, %v748_v2  ;;  %v746_v25 = vmax.f32 %v602_v48, %v714_v5  ;;  %v719_v26 = vmul.f32 0.1, %v623_v8  ;;  %v615_v27 = vadd.f32 %v8981_v49, %v614_v9 }
 0x17f   : > { %v7521_v28 = vpop.f32.mrf.mxu0  ;;  %v1085_v52 = vshrl.u32 %v1010_v10, 16  ;;  %v1088_v29 = vshll.u32 %v1010_v10, 16  ;;  %v9062_v30 = vld [vmem:[#allocation2 + $0x28] sm:$0xf]  ;;  %v9064_v31 = vrot.slane %v1107_v11, 7 }
 0x180   : > { %981 = vst [vmem:[#allocation2 + $0x48] sm:$0xf] %v7228_v20  ;;  %v7226_v6 = vpack.c.bf16 %v746_v25, %v746_v25  ;;  %v751_v7 = vmax.f32 %v623_v8, %v719_v26  ;;  %v717_v32 = vmul.f32 0.1, %v615_v27  ;;  %v626_v43 = vadd.f32 %v7521_v28, %v8981_v49 }
 0x181   : > { %v617_v46 = vpop.f32.mrf.mxu0  ;;  %v1011_v47 = vld [vmem:[#allocation2 + $0x18] sm:$0xf]  ;;  %v1087_v48 = vrot.slane %v1085_v52, 7  ;;  %v1116_v55 = vshrl.u32 %v9062_v30, 16  ;;  %v6855_v2 = vcombine.low %v9044_v57, %v9062_v30 }
 0x182   : > { %979 = vst [vmem:[#allocation2 + $0x38] sm:$0xf] %v7226_v6  ;;  %v7231_v5 = vpack.c.bf16 %v751_v7, %v751_v7  ;;  %v749_v9 = vmax.f32 %v615_v27, %v717_v32  ;;  %v720_v11 = vmul.f32 0.1, %v626_v43  ;;  %v618_v20 = vadd.f32 %v8981_v49, %v617_v46  ;;  %v8124_v32 = vld [vmem:[%s8737_s4 + $0xb0] sm:$0xff]  }
 0x183   : > { %v7524_v8 = vpop.f32.mrf.mxu0  ;;  %v1090_v25 = vor.u32 %v1088_v29, %v1087_v48  ;;  %v1092_v26 = vrot.slane %v1087_v48, 4  ;;  %v1094_v28 = vshrl.u32 %v1011_v47, 16  ;;  %v1097_v18 = vshll.u32 %v1011_v47, 16 }
 0x184   : > { %984 = vst [vmem:[#allocation2 + $0x64] sm:$0xf] %v7231_v5  ;;  %v7229_v52 = vpack.c.bf16 %v749_v9, %v749_v9  ;;  %v752_v54 = vmax.f32 %v626_v43, %v720_v11  ;;  %v718_v59 = vmul.f32 0.1, %v618_v20  ;;  %v639_v1 = vadd.f32 %v7524_v8, %v8981_v49 }
 0x185   : > { %v1096_v51 = vrot.slane %v1094_v28, 7  ;;  %v6854_v57 = vcombine.low %v1010_v10, %v1011_v47  ;;  %v630_v6 = vpop.f32.mrf.mxu0  ;;  %v1118_v7 = vrot.slane %v1116_v55, 7  ;;  %v1091_v27 = vsel %vm8938_vm2, %v8956_v21, %v1090_v25  ;;  %v9078_v46 = vld [vmem:[#allocation2 + $0x34] sm:$0xf] }
 0x186   : > { %982 = vst [vmem:[#allocation2 + $0x54] sm:$0xf] %v7229_v52  ;;  %v7232_v29 = vpack.c.bf16 %v752_v54, %v752_v54  ;;  %v750_v48 = vmax.f32 %v618_v20, %v718_v59  ;;  %v723_v5 = vmul.f32 0.1, %v639_v1  ;;  %v631_v43 = vadd.f32 %v8981_v49, %v630_v6 }
 0x187   : > { %v1099_v9 = vor.u32 %v1097_v18, %v1096_v51  ;;  %7559 = vmatmul.mubr.bf16.vlgmr.msra.gmra.mxu1 %v6854_v57  ;;  %v7525_v11 = vpop.f32.mrf.mxu0  ;;  %v1129_v10 = vshrl.u32 %v9078_v46, 16  ;;  %v1132_v47 = vshll.u32 %v9078_v46, 16  ;;  %v1112_v55 = vor.u32 %v1110_v13, %v9064_v31 }
 0x188   : > { %985 = vst [vmem:[#allocation2 + $0x68] sm:$0xf] %v7232_v29  ;;  %v7230_v21 = vpack.c.bf16 %v750_v48, %v750_v48  ;;  %v755_v8 = vmax.f32 %v639_v1, %v723_v5  ;;  %7639 = vmatpush3.bf16.msra.mxu1 %v8947_v60  ;;  %v721_v54 = vmul.f32 0.1, %v631_v43  ;;  %7562 = vmatprep.mubr.bf16.mxu1 %v6855_v2  ;;  %v1114_v60 = vrot.slane %v9064_v31, 4  ;;  %v8127_v1 = vld [vmem:[%s8737_s4 + $0xa8] sm:$0xff]  }
 0x189   : > { %v642_v59 = vadd.f32 %v7525_v11, %v8981_v49  ;;  %v633_v20 = vpop.f32.mrf.mxu0  ;;  %v1100_v51 = vsel %vm8938_vm2, %v1092_v26, %v1099_v9  ;;  %7640 = vmatprep.subr.bf16.mxu1 %v8124_v32  ;;  %v9088_v18 = vld [vmem:[#allocation2 + $0x38] sm:$0xf]  ;;  %v9090_v25 = vrot.slane %v1129_v10, 7  ;;  %v1113_v13 = vsel %vm8938_vm2, %v8954_v12, %v1112_v55  ;;  %v9098_v26 = vld [vmem:[#allocation2 + $0x44] sm:$0xf]  ;;  %v8140_v31 = vld [vmem:[%s8737_s4 + $0xf0] sm:$0xff]  }
 0x18a   : > { %983 = vst [vmem:[#allocation2 + $0x58] sm:$0xf] %v7230_v21  ;;  %v7235_v2 = vpack.c.bf16 %v755_v8, %v755_v8  ;;  %v753_v28 = vmax.f32 %v631_v43, %v721_v54  ;;  %v634_v57 = vadd.f32 %v8981_v49, %v633_v20  ;;  %v6878_v29 = vcombine.low %v1091_v27, %v1100_v51  ;;  %v9106_v55 = vld [vmem:[#allocation2 + $0x48] sm:$0xf] }
 0x18b   : > { %v724_v52 = vmul.f32 0.1, %v642_v59  ;;  %v7528_v6 = vpop.f32.mrf.mxu0  ;;  %v1138_v48 = vshrl.u32 %v9088_v18, 16  ;;  %v1141_v5 = vshll.u32 %v9088_v18, 16  ;;  %v6856_v12 = vcombine.low %v9078_v46, %v9088_v18  ;;  %v8130_v18 = vld [vmem:[%s8737_s4 + $0xa0] sm:$0xff]  }
 0x18c   : > { %988 = vst [vmem:[#allocation2 + $0x84] sm:$0xf] %v7235_v2  ;;  %v7233_v9 = vpack.c.bf16 %v753_v28, %v753_v28  ;;  %v722_v43 = vmul.f32 0.1, %v634_v57  ;;  %v655_v10 = vadd.f32 %v7528_v6, %v8981_v49  ;;  %7641 = vmatpush3.bf16.msra.mxu1 %v8124_v32  ;;  %7607 = vmatmul.mubr.bf16.vlgmr.msra.gmra.mxu0 %v6878_v29  ;;  %v11044_v21 = vshll.u32 %v9062_v30, 16 }
 0x18d   : > { %v756_v11 = vmax.f32 %v642_v59, %v724_v52  ;;  %v1140_v27 = vrot.slane %v1138_v48, 7  ;;  %v646_v54 = vpop.f32.mrf.mxu0  ;;  %v1151_v20 = vshrl.u32 %v9098_v26, 16  ;;  %v1154_v51 = vshll.u32 %v9098_v26, 16  ;;  %7642 = vmatprep.subr.bf16.mxu1 %v8127_v1  ;;  %7687 = vmatpush3.bf16.msra.mxu0 %v8951_v61  ;;  %v8142_v48 = vld [vmem:[%s8737_s4 + $0xe8] sm:$0xff]   ;;  %v9122_v61 = vld [vmem:[#allocation2 + $0x54] sm:$0xf] }
 0x18e   : > { %v1121_v8 = vor.u32 %v11044_v21, %v1118_v7  ;;  %986 = vst [vmem:[#allocation2 + $0x74] sm:$0xf] %v7233_v9  ;;  %v754_v2 = vmax.f32 %v634_v57, %v722_v43  ;;  %v727_v28 = vmul.f32 0.1, %v655_v10  ;;  %v647_v32 = vadd.f32 %v8981_v49, %v646_v54  ;;  %7688 = vmatprep.subr.bf16.mxu0 %v8140_v31 }
 0x18f   : > { %v7236_v59 = vpack.c.bf16 %v756_v11, %v756_v11  ;;  %7563 = vmatmul.mubr.bf16.gmra.mxu1 %v6856_v12  ;;  %v9117_v7 = vrot.slane %v1151_v20, 7  ;;  %v1160_v52 = vshrl.u32 %v9106_v55, 16  ;;  %v1163_v6 = vshll.u32 %v9106_v55, 16  ;;  %v7529_v29 = vpop.f32.mrf.mxu0  ;;  %v8133_v20 = vld [vmem:[%s8737_s4 + $0x98] sm:$0xff]  }
 0x190   : > { %v1122_v30 = vsel %vm8938_vm2, %v1114_v60, %v1121_v8  ;;  %v7234_v57 = vpack.c.bf16 %v754_v2, %v754_v2  ;;  %v759_v9 = vmax.f32 %v655_v10, %v727_v28  ;;  %v725_v43 = vmul.f32 0.1, %v647_v32  ;;  %7643 = vmatpush3.bf16.msra.mxu1 %v8127_v1 }
 0x191   : > { %989 = vst [vmem:[#allocation2 + $0x88] sm:$0xf] %v7236_v59  ;;  %v6879_v11 = vcombine.low %v1113_v13, %v1122_v30  ;;  %v1162_v12 = vrot.slane %v1160_v52, 7  ;;  %v6857_v60 = vcombine.low %v9098_v26, %v9106_v55  ;;  %v658_v21 = vadd.f32 %v7529_v29, %v8981_v49  ;;  %v649_v8 = vpop.f32.mrf.mxu0  ;;  %7644 = vmatprep.subr.bf16.mxu1 %v8130_v18  ;;  %v9133_v2 = vld [vmem:[#allocation2 + $0x58] sm:$0xf] }
 0x192   : > { %v1134_v54 = vor.u32 %v1132_v47, %v9090_v25  ;;  %987 = vst [vmem:[#allocation2 + $0x78] sm:$0xf] %v7234_v57  ;;  %v7239_v13 = vpack.c.bf16 %v759_v9, %v759_v9  ;;  %v757_v10 = vmax.f32 %v647_v32, %v725_v43  ;;  %v650_v1 = vadd.f32 %v8981_v49, %v649_v8  ;;  %v8145_v32 = vld [vmem:[%s8737_s4 + $0xe0] sm:$0xff]  }
 0x193   : > { %7610 = vmatprep.mubr.bf16.mxu0 %v6879_v11  ;;  %v1136_v59 = vrot.slane %v9090_v25, 4  ;;  %7689 = vmatpush3.bf16.msra.mxu0 %v8140_v31  ;;  %v728_v28 = vmul.f32 0.1, %v658_v21  ;;  %v7532_v30 = vpop.f32.mrf.mxu0  ;;  %v1143_v47 = vor.u32 %v1141_v5, %v1140_v27  ;;  %v1173_v52 = vshrl.u32 %v9122_v61, 16  ;;  %v8136_v27 = vld [vmem:[%s8737_s4 + $0x90] sm:$0xff]  }
 0x194   : > { %7566 = vmatprep.mubr.bf16.mxu1 %v6857_v60  ;;  %v1135_v46 = vsel %vm8938_vm2, %v8958_v22, %v1134_v54  ;;  %7690 = vmatprep.subr.bf16.mxu0 %v8142_v48  ;;  %992 = vst [vmem:[#allocation2 + $0xa4] sm:$0xf] %v7239_v13  ;;  %v7237_v29 = vpack.c.bf16 %v757_v10, %v757_v10  ;;  %v726_v57 = vmul.f32 0.1, %v650_v1  ;;  %v1176_v31 = vshll.u32 %v9122_v61, 16 }
 0x195   : > { %v671_v25 = vadd.f32 %v7532_v30, %v8981_v49  ;;  %7645 = vmatpush3.bf16.msra.mxu1 %v8130_v18  ;;  %v760_v9 = vmax.f32 %v658_v21, %v728_v28  ;;  %v1144_v11 = vsel %vm8938_vm2, %v1136_v59, %v1143_v47  ;;  %v9144_v43 = vrot.slane %v1173_v52, 7  ;;  %v662_v5 = vpop.f32.mrf.mxu0  ;;  %v9149_v10 = vld [vmem:[#allocation2 + $0x64] sm:$0xf]  ;;  %v9156_v30 = vld [vmem:[#allocation2 + $0x68] sm:$0xf] }
 0x196   : > { %v1182_v22 = vshrl.u32 %v9133_v2, 16  ;;  %7646 = vmatprep.subr.bf16.mxu1 %v8133_v20  ;;  %990 = vst [vmem:[#allocation2 + $0x94] sm:$0xf] %v7237_v29  ;;  %v758_v60 = vmax.f32 %v650_v1, %v726_v57  ;;  %v6880_v54 = vcombine.low %v1135_v46, %v1144_v11  ;;  %v1185_v13 = vshll.u32 %v9133_v2, 16  ;;  %v8147_v1 = vld [vmem:[%s8737_s4 + $0xd8] sm:$0xff]  }
 0x197   : > { %v731_v8 = vmul.f32 0.1, %v671_v25  ;;  %7691 = vmatpush3.bf16.msra.mxu0 %v8142_v48  ;;  %v7240_v18 = vpack.c.bf16 %v760_v9, %v760_v9  ;;  %v6858_v59 = vcombine.low %v9122_v61, %v9133_v2  ;;  %v1156_v28 = vor.u32 %v1154_v51, %v9117_v7  ;;  %v7533_v47 = vpop.f32.mrf.mxu0 }
 0x198   : > { %v1184_v21 = vrot.slane %v1182_v22, 7  ;;  %7692 = vmatprep.subr.bf16.mxu0 %v8145_v32  ;;  %v7238_v46 = vpack.c.bf16 %v758_v60, %v758_v60  ;;  %7611 = vmatmul.mubr.bf16.gmra.mxu0 %v6880_v54  ;;  %v1158_v29 = vrot.slane %v9117_v7, 4  ;;  %v1165_v48 = vor.u32 %v1163_v6, %v1162_v12 }
 0x199   : > { %v763_v52 = vmax.f32 %v671_v25, %v731_v8  ;;  %7647 = vmatpush3.bf16.msra.mxu1 %v8133_v20  ;;  %993 = vst [vmem:[#allocation2 + $0xa8] sm:$0xf] %v7240_v18  ;;  %v1157_v26 = vsel %vm8938_vm2, %v8960_v23, %v1156_v28  ;;  %v663_v51 = vadd.f32 %v8981_v49, %v662_v5  ;;  %v1195_v2 = vshrl.u32 %v9149_v10, 16  ;;  %v665_v25 = vpop.f32.mrf.mxu0  ;;  %v8141_v20 = vld [vmem:[%s8737_s4 + $0x88] sm:$0xff]   ;;  %v9177_v60 = vld [vmem:[#allocation2 + $0x78] sm:$0xf] }
 0x19a   : > { %7567 = vmatmul.mubr.bf16.gmra.mxu1 %v6858_v59  ;;  %v1198_v57 = vshll.u32 %v9149_v10, 16  ;;  %7648 = vmatprep.subr.bf16.mxu1 %v8136_v27  ;;  %991 = vst [vmem:[#allocation2 + $0x98] sm:$0xf] %v7238_v46  ;;  %v1166_v7 = vsel %vm8938_vm2, %v1158_v29, %v1165_v48  ;;  %v1204_v6 = vshrl.u32 %v9156_v30, 16  ;;  %v1207_v12 = vshll.u32 %v9156_v30, 16  ;;  %v8149_v8 = vld [vmem:[%s8737_s4 + $0xd0] sm:$0xff]  }
 0x19b   : > { %v7243_v55 = vpack.c.bf16 %v763_v52, %v763_v52  ;;  %7693 = vmatpush3.bf16.msra.mxu0 %v8145_v32  ;;  %v6881_v23 = vcombine.low %v1157_v26, %v1166_v7  ;;  %v729_v9 = vmul.f32 0.1, %v663_v51  ;;  %v9173_v11 = vrot.slane %v1195_v2, 7  ;;  %v7536_v5 = vpop.f32.mrf.mxu0  ;;  %v9183_v28 = vld [vmem:[#allocation2 + $0x74] sm:$0xf]  ;;  %v8146_v26 = vld [vmem:[%s8737_s4 + $0x80] sm:$0xff]  }
 0x19c   : > { %v6859_v22 = vcombine.low %v9149_v10, %v9156_v30  ;;  %7694 = vmatprep.subr.bf16.mxu0 %v8147_v1  ;;  %v1206_v54 = vrot.slane %v1204_v6, 7  ;;  %v674_v18 = vadd.f32 %v7533_v47, %v8981_v49  ;;  %v666_v59 = vadd.f32 %v8981_v49, %v665_v25 }
 0x19d   : > { %996 = vst [vmem:[#allocation2 + $0xc4] sm:$0xf] %v7243_v55  ;;  %v687_v32 = vadd.f32 %v7536_v5, %v8981_v49  ;;  %7649 = vmatpush3.bf16.msra.mxu1 %v8136_v27  ;;  %7614 = vmatprep.mubr.bf16.mxu0 %v6881_v23  ;;  %v761_v46 = vmax.f32 %v663_v51, %v729_v9  ;;  %v1180_v52 = vrot.slane %v9144_v43, 4  ;;  %v678_v48 = vpop.f32.mrf.mxu0  ;;  %v9198_v23 = vld [vmem:[#allocation2 + $0x84] sm:$0xf]  ;;  %v9202_v9 = vld [vmem:[%s8737_s4 + $0x138] sm:$0xff]  }
 0x19e   : > { %7570 = vmatprep.mubr.bf16.mxu1 %v6859_v22  ;;  %v1178_v30 = vor.u32 %v1176_v31, %v9144_v43  ;;  %v1187_v29 = vor.u32 %v1185_v13, %v1184_v21  ;;  %v732_v47 = vmul.f32 0.1, %v674_v18  ;;  %v730_v2 = vmul.f32 0.1, %v666_v59  ;;  %7650 = vmatprep.subr.bf16.mxu1 %v8141_v20 }
 0x19f   : > { %v735_v25 = vmul.f32 0.1, %v687_v32  ;;  %v6860_v55 = vcombine.low %v9183_v28, %v9177_v60  ;;  %7695 = vmatpush3.bf16.msra.mxu0 %v8147_v1  ;;  %v7241_v27 = vpack.c.bf16 %v761_v46, %v761_v46  ;;  %v1217_v43 = vshrl.u32 %v9183_v28, 16  ;;  %v7537_v13 = vpop.f32.mrf.mxu0  ;;  %v8150_v1 = vld [vmem:[%s8737_s4 + $0xc8] sm:$0xff]  }
 0x1a0   : > { %v1179_v61 = vsel %vm8938_vm2, %v8964_v35, %v1178_v30  ;;  %v1188_v31 = vsel %vm8938_vm2, %v1180_v52, %v1187_v29  ;;  %7696 = vmatprep.subr.bf16.mxu0 %v8149_v8  ;;  %v764_v21 = vmax.f32 %v674_v18, %v732_v47  ;;  %v762_v51 = vmax.f32 %v666_v59, %v730_v2  ;;  %v9207_v30 = vld [vmem:[#allocation2 + $0x88] sm:$0xf] }
 0x1a1   : > { %v767_v7 = vmax.f32 %v687_v32, %v735_v25  ;;  %v6882_v6 = vcombine.low %v1179_v61, %v1188_v31  ;;  %7651 = vmatpush3.bf16.msra.mxu1 %v8141_v20  ;;  %994 = vst [vmem:[#allocation2 + $0xb4] sm:$0xf] %v7241_v27  ;;  %v1219_v22 = vrot.slane %v1217_v43, 7  ;;  %v1220_v35 = vshll.u32 %v9183_v28, 16  ;;  %v681_v18 = vpop.f32.mrf.mxu0 }
 0x1a2   : > { %v1226_v5 = vshrl.u32 %v9177_v60, 16  ;;  %v1229_v46 = vshll.u32 %v9177_v60, 16  ;;  %7571 = vmatmul.mubr.bf16.gmra.mxu1 %v6860_v55  ;;  %7652 = vmatprep.subr.bf16.mxu1 %v8146_v26  ;;  %v7244_v59 = vpack.c.bf16 %v764_v21, %v764_v21  ;;  %v7242_v32 = vpack.c.bf16 %v762_v51, %v762_v51 }
 0x1a3   : > { %v7247_v52 = vpack.c.bf16 %v767_v7, %v767_v7  ;;  %7615 = vmatmul.mubr.bf16.gmra.mxu0 %v6882_v6  ;;  %v1200_v20 = vor.u32 %v1198_v57, %v9173_v11  ;;  %v1202_v28 = vrot.slane %v9173_v11, 4  ;;  %v1209_v47 = vor.u32 %v1207_v12, %v1206_v54  ;;  %v7540_v60 = vpop.f32.mrf.mxu0 }
 0x1a4   : > { %v1228_v29 = vrot.slane %v1226_v5, 7  ;;  %v679_v2 = vadd.f32 %v8981_v49, %v678_v48  ;;  %7697 = vmatpush3.bf16.msra.mxu0 %v8149_v8  ;;  %997 = vst [vmem:[#allocation2 + $0xc8] sm:$0xf] %v7244_v59  ;;  %995 = vst [vmem:[#allocation2 + $0xb8] sm:$0xf] %v7242_v32  ;;  %v1239_v55 = vshrl.u32 %v9198_v23, 16  ;;  %v6861_v54 = vcombine.low %v9198_v23, %v9207_v30 }
 0x1a5   : > { %1000 = vst [vmem:[#allocation2 + $0xe4] sm:$0xf] %v7247_v52  ;;  %v1201_v25 = vsel %vm8938_vm2, %v8962_v24, %v1200_v20  ;;  %v1242_v10 = vshll.u32 %v9198_v23, 16  ;;  %v1248_v57 = vshrl.u32 %v9207_v30, 16  ;;  %7653 = vmatpush3.bf16.msra.mxu1 %v8146_v26  ;;  %7698 = vmatprep.subr.bf16.mxu0 %v8150_v1  ;;  %v1210_v12 = vsel %vm8938_vm2, %v1202_v28, %v1209_v47  ;;  %v9225_v48 = vld [vmem:[#allocation2 + $0x94] sm:$0xf]  ;;  %v694_v43 = vpop.f32.mrf.mxu0 }
 0x1a6   : > { %v733_v11 = vmul.f32 0.1, %v679_v2  ;;  %v1251_v8 = vshll.u32 %v9207_v30, 16  ;;  %7734 = vmatprep.subr.bf16.mxu1 %v9202_v9  ;;  %v8152_v24 = vld [vmem:[%s8737_s4 + $0xc0] sm:$0xff]   ;;  %v6883_v27 = vcombine.low %v1201_v25, %v1210_v12  ;;  %v1241_v61 = vrot.slane %v1239_v55, 7  ;;  %7574 = vmatprep.mubr.bf16.mxu1 %v6861_v54 }
 0x1a7   : > { %v1250_v31 = vrot.slane %v1248_v57, 7  ;;  %v690_v26 = vadd.f32 %v7537_v13, %v8981_v49  ;;  %v682_v51 = vadd.f32 %v8981_v49, %v681_v18  ;;  %v703_v7 = vadd.f32 %v7540_v60, %v8981_v49  ;;  %v1035_v59 = vld [vmem:[#allocation2 + $0x98] sm:$0xf]  ;;  %v1037_v55 = vld [vmem:[#allocation2 + $0xa4] sm:$0xf] }
 0x1a8   : > { %v765_v21 = vmax.f32 %v679_v2, %v733_v11  ;;  %v1222_v6 = vor.u32 %v1220_v35, %v1219_v22  ;;  %7618 = vmatprep.mubr.bf16.mxu0 %v6883_v27  ;;  %v1224_v5 = vrot.slane %v1219_v22, 4  ;;  %v1231_v30 = vor.u32 %v1229_v46, %v1228_v29  ;;  %7699 = vmatpush3.bf16.msra.mxu0 %v8150_v1  ;;  %v9237_v18 = vld [vmem:[%s8737_s4 + $0x178] sm:$0xff]   ;;  %v7541_v29 = vpop.f32.mrf.mxu0  ;;  %v1038_v54 = vld [vmem:[#allocation2 + $0xa8] sm:$0xf] }
 0x1a9   : > { %v736_v23 = vmul.f32 0.1, %v690_v26  ;;  %v1261_v32 = vshrl.u32 %v9225_v48, 16  ;;  %v734_v20 = vmul.f32 0.1, %v682_v51  ;;  %7700 = vmatprep.subr.bf16.mxu0 %v8152_v24  ;;  %v1264_v46 = vshll.u32 %v9225_v48, 16 }
 0x1aa   : > { %v7245_v52 = vpack.c.bf16 %v765_v21, %v765_v21  ;;  %v739_v13 = vmul.f32 0.1, %v703_v7  ;;  %v1223_v28 = vsel %vm8938_vm2, %v8966_v36, %v1222_v6  ;;  %v1232_v35 = vsel %vm8938_vm2, %v1224_v5, %v1231_v30 }
 0x1ab   : > { %v768_v47 = vmax.f32 %v690_v26, %v736_v23  ;;  %v1263_v22 = vrot.slane %v1261_v32, 7  ;;  %v766_v1 = vmax.f32 %v682_v51, %v734_v20  ;;  %v6884_v60 = vcombine.low %v1223_v28, %v1232_v35  ;;  %v1041_v28 = vld [vmem:[#allocation2 + $0xb8] sm:$0xf] }
 0x1ac   : > { %998 = vst [vmem:[#allocation2 + $0xd4] sm:$0xf] %v7245_v52  ;;  %v771_v2 = vmax.f32 %v703_v7, %v739_v13  ;;  %v1270_v25 = vshrl.u32 %v1035_v59, 16  ;;  %v1273_v12 = vshll.u32 %v1035_v59, 16  ;;  %v6862_v36 = vcombine.low %v9225_v48, %v1035_v59  ;;  %7701 = vmatpush3.bf16.msra.mxu0 %v8152_v24  ;;  %v1040_v13 = vld [vmem:[#allocation2 + $0xb4] sm:$0xf] }
 0x1ad   : > { %v7248_v57 = vpack.c.bf16 %v768_v47, %v768_v47  ;;  %v1244_v11 = vor.u32 %v1242_v10, %v1241_v61  ;;  %v7246_v27 = vpack.c.bf16 %v766_v1, %v766_v1  ;;  %7619 = vmatmul.mubr.bf16.gmra.mxu0 %v6884_v60  ;;  %v1246_v6 = vrot.slane %v1241_v61, 4  ;;  %7782 = vmatprep.subr.bf16.mxu0 %v9237_v18  ;;  %v697_v10 = vpop.f32.mrf.mxu0 }
 0x1ae   : > { %v7251_v26 = vpack.c.bf16 %v771_v2, %v771_v2  ;;  %v1272_v21 = vrot.slane %v1270_v25, 7  ;;  %7575 = vmatmul.mubr.bf16.gmra.mxu1 %v6862_v36  ;;  %v1253_v7 = vor.u32 %v1251_v8, %v1250_v31  ;;  %v695_v23 = vadd.f32 %v8981_v49, %v694_v43 }
 0x1af   : > { %1001 = vst [vmem:[#allocation2 + $0xe8] sm:$0xf] %v7248_v57  ;;  %v1245_v51 = vsel %vm8938_vm2, %v8968_v37, %v1244_v11  ;;  %v1283_v48 = vshrl.u32 %v1037_v55, 16  ;;  %999 = vst [vmem:[#allocation2 + $0xd8] sm:$0xf] %v7246_v27  ;;  %v1286_v24 = vshll.u32 %v1037_v55, 16  ;;  %v6863_v59 = vcombine.low %v1037_v55, %v1038_v54 }
 0x1b0   : > { %1004 = vst [vmem:[#allocation2 + $0x104] sm:$0xf] %v7251_v26  ;;  %v1292_v5 = vshrl.u32 %v1038_v54, 16  ;;  %v1295_v30 = vshll.u32 %v1038_v54, 16  ;;  %v1254_v61 = vsel %vm8938_vm2, %v1246_v6, %v1253_v7  ;;  %v737_v32 = vmul.f32 0.1, %v695_v23 }
 0x1b1   : > { %v1285_v52 = vrot.slane %v1283_v48, 7  ;;  %v706_v20 = vadd.f32 %v7541_v29, %v8981_v49  ;;  %v6885_v37 = vcombine.low %v1245_v51, %v1254_v61  ;;  %7578 = vmatprep.mubr.bf16.mxu1 %v6863_v59  ;;  %v698_v31 = vadd.f32 %v8981_v49, %v697_v10 }
 0x1b2   : > { %v1294_v8 = vrot.slane %v1292_v5, 7  ;;  %v1266_v43 = vor.u32 %v1264_v46, %v1263_v22  ;;  %v769_v47 = vmax.f32 %v695_v23, %v737_v32  ;;  %v1268_v1 = vrot.slane %v1263_v22, 4  ;;  %v1043_v46 = vld [vmem:[#allocation2 + $0xc4] sm:$0xf] }
 0x1b3   : > { %v740_v35 = vmul.f32 0.1, %v706_v20  ;;  %v1275_v2 = vor.u32 %v1273_v12, %v1272_v21  ;;  %7622 = vmatprep.mubr.bf16.mxu0 %v6885_v37  ;;  %v738_v60 = vmul.f32 0.1, %v698_v31  ;;  %v1305_v55 = vshrl.u32 %v1040_v13, 16 }
 0x1b4   : > { %v1267_v25 = vsel %vm8938_vm2, %v8972_v44, %v1266_v43  ;;  %v1308_v29 = vshll.u32 %v1040_v13, 16  ;;  %v7249_v57 = vpack.c.bf16 %v769_v47, %v769_v47  ;;  %v1314_v49 = vshrl.u32 %v1041_v28, 16  ;;  %v1044_v12 = vld [vmem:[#allocation2 + $0xc8] sm:$0xf]  ;;  %v1046_v5 = vld [vmem:[#allocation2 + $0xd4] sm:$0xf] }
 0x1b5   : > { %v772_v36 = vmax.f32 %v706_v20, %v740_v35  ;;  %v1276_v11 = vsel %vm8938_vm2, %v1268_v1, %v1275_v2  ;;  %v770_v54 = vmax.f32 %v698_v31, %v738_v60  ;;  %v1307_v26 = vrot.slane %v1305_v55, 7  ;;  %v1049_v2 = vld [vmem:[#allocation2 + $0xe4] sm:$0xf] }
 0x1b6   : > { %v6886_v27 = vcombine.low %v1267_v25, %v1276_v11  ;;  %v1317_v22 = vshll.u32 %v1041_v28, 16  ;;  %1002 = vst [vmem:[#allocation2 + $0xf4] sm:$0xf] %v7249_v57  ;;  %v1316_v6 = vrot.slane %v1314_v49, 7  ;;  %v6864_v51 = vcombine.low %v1040_v13, %v1041_v28  ;;  %v1047_v37 = vld [vmem:[#allocation2 + $0xd8] sm:$0xf] }
 0x1b7   : > { %v7252_v21 = vpack.c.bf16 %v772_v36, %v772_v36  ;;  %v1288_v7 = vor.u32 %v1286_v24, %v1285_v52  ;;  %v7250_v44 = vpack.c.bf16 %v770_v54, %v770_v54  ;;  %v1290_v23 = vrot.slane %v1285_v52, 4  ;;  %v1050_v57 = vld [vmem:[#allocation2 + $0xe8] sm:$0xf] }
 0x1b8   : > { %7623 = vmatmul.mubr.bf16.gmra.mxu0 %v6886_v27  ;;  %v1297_v48 = vor.u32 %v1295_v30, %v1294_v8  ;;  %v1327_v10 = vshrl.u32 %v1043_v46, 16  ;;  %7579 = vmatmul.mubr.bf16.gmra.mxu1 %v6864_v51  ;;  %v1330_v61 = vshll.u32 %v1043_v46, 16  ;;  %v1336_v32 = vshrl.u32 %v1044_v12, 16 }
 0x1b9   : > { %1005 = vst [vmem:[#allocation2 + $0x108] sm:$0xf] %v7252_v21  ;;  %v1289_v59 = vsel %vm8938_vm2, %v8970_v38, %v1288_v7  ;;  %v1339_v20 = vshll.u32 %v1044_v12, 16  ;;  %1003 = vst [vmem:[#allocation2 + $0xf8] sm:$0xf] %v7250_v44  ;;  %v6865_v31 = vcombine.low %v1043_v46, %v1044_v12  ;;  %v1310_v52 = vor.u32 %v1308_v29, %v1307_v26 }
 0x1ba   : > { %v1298_v24 = vsel %vm8938_vm2, %v1290_v23, %v1297_v48  ;;  %v1329_v13 = vrot.slane %v1327_v10, 7  ;;  %v1338_v8 = vrot.slane %v1336_v32, 7  ;;  %v1312_v43 = vrot.slane %v1307_v26, 4 }
 0x1bb   : > { %v6887_v30 = vcombine.low %v1289_v59, %v1298_v24  ;;  %v1319_v28 = vor.u32 %v1317_v22, %v1316_v6  ;;  %7582 = vmatprep.mubr.bf16.mxu1 %v6865_v31  ;;  %v1311_v38 = vsel %vm8938_vm2, %v8974_v45, %v1310_v52  ;;  %v1349_v47 = vshrl.u32 %v1046_v5, 16 }
 0x1bc   : > { %v1352_v35 = vshll.u32 %v1046_v5, 16  ;;  %v1358_v1 = vshrl.u32 %v1047_v37, 16  ;;  %v1361_v25 = vshll.u32 %v1047_v37, 16  ;;  %v6866_v55 = vcombine.low %v1046_v5, %v1047_v37 }
 0x1bd   : > { %7626 = vmatprep.mubr.bf16.mxu0 %v6887_v30  ;;  %v1320_v60 = vsel %vm8938_vm2, %v1312_v43, %v1319_v28  ;;  %v1332_v29 = vor.u32 %v1330_v61, %v1329_v13  ;;  %v1351_v11 = vrot.slane %v1349_v47, 7  ;;  %v1334_v46 = vrot.slane %v1329_v13, 4  ;;  %v1052_v22 = vld [vmem:[#allocation2 + $0xf4] sm:$0xf] }
 0x1be   : > { %v6888_v36 = vcombine.low %v1311_v38, %v1320_v60  ;;  %v1360_v49 = vrot.slane %v1358_v1, 7  ;;  %v1341_v54 = vor.u32 %v1339_v20, %v1338_v8  ;;  %v1371_v27 = vshrl.u32 %v1049_v2, 16  ;;  %v2024_v8 = vld [vmem:[#allocation2 + $0x18] sm:$0xf] }
 0x1bf   : > { %v1333_v45 = vsel %vm8938_vm2, %v8985_v62, %v1332_v29  ;;  %v1374_v26 = vshll.u32 %v1049_v2, 16  ;;  %v1380_v12 = vshrl.u32 %v1050_v57, 16  ;;  %v1383_v21 = vshll.u32 %v1050_v57, 16 }
 0x1c0   : > { %7627 = vmatmul.mubr.bf16.gmra.mxu0 %v6888_v36  ;;  %v6867_v6 = vcombine.low %v1049_v2, %v1050_v57  ;;  %v1354_v51 = vor.u32 %v1352_v35, %v1351_v11  ;;  %7583 = vmatmul.mubr.bf16.gmra.mxu1 %v6866_v55  ;;  %v1342_v7 = vsel %vm8938_vm2, %v1334_v46, %v1341_v54  ;;  %v1373_v44 = vrot.slane %v1371_v27, 7  ;;  %v1053_v10 = vld [vmem:[#allocation2 + $0xf8] sm:$0xf] }
 0x1c1   : > { %v1356_v23 = vrot.slane %v1351_v11, 4  ;;  %v1363_v48 = vor.u32 %v1361_v25, %v1360_v49  ;;  %v6889_v5 = vcombine.low %v1333_v45, %v1342_v7  ;;  %v1382_v59 = vrot.slane %v1380_v12, 7  ;;  %v2779_v11 = vld [vmem:[#allocation2 + $0x18] sm:$0xf]  ;;  %v2027_v7 = vld [vmem:[#allocation2 + $0x28] sm:$0xf] }
 0x1c2   : > { %7586 = vmatprep.mubr.bf16.mxu1 %v6867_v6  ;;  %v1355_v62 = vsel %vm8938_vm2, %v8987_v63, %v1354_v51  ;;  %v1393_v61 = vshrl.u32 %v1052_v22, 16  ;;  %v1396_v20 = vshll.u32 %v1052_v22, 16  ;;  %v1402_v37 = vshrl.u32 %v1053_v10, 16  ;;  %v2778_v63 = vld [vmem:[#allocation2 + $0x14] sm:$0xf] }
 0x1c3   : > { %v1364_v32 = vsel %vm8938_vm2, %v1356_v23, %v1363_v48  ;;  %v1405_v24 = vshll.u32 %v1053_v10, 16  ;;  %7630 = vmatprep.mubr.bf16.mxu0 %v6889_v5  ;;  %v6868_v52 = vcombine.low %v1052_v22, %v1053_v10  ;;  %v1376_v30 = vor.u32 %v1374_v26, %v1373_v44 }
 0x1c4   : > { %v6890_v13 = vcombine.low %v1355_v62, %v1364_v32  ;;  %v1395_v31 = vrot.slane %v1393_v61, 7  ;;  %v1404_v43 = vrot.slane %v1402_v37, 7  ;;  %v1378_v28 = vrot.slane %v1373_v44, 4  ;;  %v2781_v61 = vld [vmem:[#allocation2 + $0x24] sm:$0xf] }
 0x1c5   : > { %v1385_v38 = vor.u32 %v1383_v21, %v1382_v59  ;;  %v11045_v47 = vshrl.u32 %v9059_v17, 16  ;;  %v1377_v1 = vsel %vm8938_vm2, %v8990_v3, %v1376_v30  ;;  %v2099_v25 = vshll.u32 %v9059_v17, 16  ;;  %v2026_v3 = vld [vmem:[#allocation2 + $0x24] sm:$0xf]  ;;  %v2782_v30 = vld [vmem:[#allocation2 + $0x28] sm:$0xf] }
 0x1c6   : > { %v1398_v2 = vor.u32 %v1396_v20, %v1395_v31  ;;  %v1400_v60 = vrot.slane %v1395_v31, 4  ;;  %v1407_v29 = vor.u32 %v1405_v24, %v1404_v43  ;;  %v2105_v57 = vshll.u32 %v2024_v8, 16 }
 0x1c7   : > { %v2098_v35 = vrot.slane %v11045_v47, 4  ;;  %v1386_v55 = vsel %vm8938_vm2, %v1378_v28, %v1385_v38  ;;  %v2109_v36 = vshrl.u32 %v2024_v8, 16  ;;  %v2101_v45 = vrot.slane %v2099_v25, 5  ;;  %v2029_v47 = vld [vmem:[#allocation2 + $0x34] sm:$0xf] }
 0x1c8   : > { %7631 = vmatmul.mubr.bf16.gmra.mxu0 %v6890_v13  ;;  %v6891_v49 = vcombine.low %v1377_v1, %v1386_v55  ;;  %v1399_v46 = vsel %vm8938_vm2, %v8996_v15, %v1398_v2  ;;  %v2831_v54 = vshrl.u32 %v2778_v63, 16  ;;  %7587 = vmatmul.mubr.bf16.gmra.mxu1 %v6868_v52  ;;  %v1408_v17 = vsel %vm8938_vm2, %v1400_v60, %v1407_v29  ;;  %v8153_v60 = vld [vmem:[%s8737_s4 + $0x130] sm:$0xff]  }
 0x1c9   : > { %v2107_v27 = vrot.slane %v2105_v57, 5  ;;  %v2111_v26 = vrot.slane %v2109_v36, 4  ;;  %v2834_v22 = vshll.u32 %v2778_v63, 16  ;;  %v6892_v12 = vcombine.low %v1399_v46, %v1408_v17  ;;  %7654 = vmatprep.mubr.bf16.mxu1 %v9057_v14  ;;  %v2030_v57 = vld [vmem:[#allocation2 + $0x38] sm:$0xf] }
 0x1ca   : > { %7634 = vmatprep.mubr.bf16.mxu0 %v6891_v49  ;;  %v2102_v21 = vor.u32 %v2101_v45, %v2098_v35  ;;  %v2833_v6 = vrot.slane %v2831_v54, 7  ;;  %v2840_v51 = vshrl.u32 %v2779_v11, 16  ;;  %v2843_v15 = vshll.u32 %v2779_v11, 16  ;;  %v2784_v46 = vld [vmem:[#allocation2 + $0x34] sm:$0xf] }
 0x1cb   : > { %v2112_v44 = vor.u32 %v2111_v26, %v2107_v27  ;;  %v2120_v23 = vshrl.u32 %v2026_v3, 16  ;;  %v2123_v48 = vshll.u32 %v2026_v3, 16  ;;  %v2129_v24 = vshll.u32 %v2027_v7, 16 }
 0x1cc   : > { %v2103_v10 = vrot.slane %v2102_v21, 4  ;;  %v2836_v5 = vor.u32 %v2834_v22, %v2833_v6  ;;  %v2838_v59 = vrot.slane %v2833_v6, 4  ;;  %v2842_v62 = vrot.slane %v2840_v51, 7  ;;  %v8154_v21 = vld [vmem:[%s8737_s4 + $0x128] sm:$0xff]  }
 0x1cd   : > { %v2113_v32 = vrot.slane %v2112_v44, 4  ;;  %v2122_v20 = vrot.slane %v2120_v23, 4  ;;  %v2125_v37 = vrot.slane %v2123_v48, 5  ;;  %v2133_v52 = vshrl.u32 %v2027_v7, 16  ;;  %v2785_v44 = vld [vmem:[#allocation2 + $0x38] sm:$0xf] }
 0x1ce   : > { %v2108_v14 = vsel %vm9021_vm5, %v2103_v10, %v2107_v27  ;;  %v2837_v13 = vsel %vm8938_vm2, %v8992_v4, %v2836_v5  ;;  %v2845_v31 = vor.u32 %v2843_v15, %v2842_v62  ;;  %v2131_v28 = vrot.slane %v2129_v24, 5  ;;  %v2032_v5 = vld [vmem:[#allocation2 + $0x44] sm:$0xf] }
 0x1cf   : > { %v2118_v8 = vsel %vm9021_vm5, %v2113_v32, %v9002_v19  ;;  %v2126_v43 = vor.u32 %v2125_v37, %v2122_v20  ;;  %v2853_v38 = vshrl.u32 %v2781_v61, 16  ;;  %v2135_v1 = vrot.slane %v2133_v52, 4  ;;  %v2033_v32 = vld [vmem:[#allocation2 + $0x48] sm:$0xf] }
 0x1d0   : > { %7635 = vmatmul.mubr.bf16.gmra.mxu0 %v6892_v12  ;;  %v6918_v35 = vcombine.low %v2108_v14, %v2118_v8  ;;  %v2846_v63 = vsel %vm8938_vm2, %v2838_v59, %v2845_v31  ;;  %v2856_v2 = vshll.u32 %v2781_v61, 16  ;;  %v2862_v29 = vshrl.u32 %v2782_v30, 16 }
 0x1d1   : > { %v6973_v4 = vcombine.low %v2837_v13, %v2846_v63  ;;  %v2127_v25 = vrot.slane %v2126_v43, 4  ;;  %v2855_v55 = vrot.slane %v2853_v38, 7  ;;  %v2136_v36 = vor.u32 %v2135_v1, %v2131_v28  ;;  %v8159_v13 = vld [vmem:[%s8737_s4 + $0x170] sm:$0xff]   ;;  %v2787_v43 = vld [vmem:[#allocation2 + $0x44] sm:$0xf] }
 0x1d2   : > { %7655 = vmatmul.mubr.bf16.vlgmr.msra.gmra.mxu1 %v6918_v35  ;;  %v2865_v19 = vshll.u32 %v2782_v30, 16  ;;  %v2144_v11 = vshrl.u32 %v2029_v47, 16  ;;  %v2147_v49 = vshll.u32 %v2029_v47, 16  ;;  %v2864_v17 = vrot.slane %v2862_v29, 7  ;;  %v2788_v63 = vld [vmem:[#allocation2 + $0x48] sm:$0xf] }
 0x1d3   : > { %7702 = vmatprep.mubr.bf16.mxu0 %v6973_v4  ;;  %7735 = vmatpush3.bf16.msra.mxu1 %v9202_v9  ;;  %v2132_v45 = vsel %vm9021_vm5, %v2127_v25, %v2131_v28  ;;  %v2858_v54 = vor.u32 %v2856_v2, %v2855_v55  ;;  %v2860_v3 = vrot.slane %v2855_v55, 4  ;;  %v2137_v27 = vrot.slane %v2136_v36, 4  ;;  %v8156_v36 = vld [vmem:[%s8737_s4 + $0x118] sm:$0xff]  }
 0x1d4   : > { %7736 = vmatprep.subr.bf16.mxu1 %v8153_v60  ;;  %v2146_v26 = vrot.slane %v2144_v11, 4  ;;  %v2149_v22 = vrot.slane %v2147_v49, 5  ;;  %v2153_v12 = vshll.u32 %v2030_v57, 16  ;;  %v2867_v51 = vor.u32 %v2865_v19, %v2864_v17 }
 0x1d5   : > { %v2859_v6 = vsel %vm8938_vm2, %v8998_v16, %v2858_v54  ;;  %v2157_v7 = vshrl.u32 %v2030_v57, 16  ;;  %v2875_v9 = vshrl.u32 %v2784_v46, 16  ;;  %v2142_v15 = vsel %vm9021_vm5, %v2137_v27, %v9009_v34  ;;  %v8155_v34 = vld [vmem:[%s8737_s4 + $0x120] sm:$0xff]   ;;  %v2036_v27 = vld [vmem:[#allocation2 + $0x58] sm:$0xf] }
 0x1d6   : > { %v2150_v23 = vor.u32 %v2149_v22, %v2146_v26  ;;  %v2155_v48 = vrot.slane %v2153_v12, 5  ;;  %v2878_v10 = vshll.u32 %v2784_v46, 16  ;;  %v6919_v59 = vcombine.low %v2132_v45, %v2142_v15  ;;  %v2035_v46 = vld [vmem:[#allocation2 + $0x54] sm:$0xf]  ;;  %v8161_v45 = vld [vmem:[%s8737_s4 + $0x168] sm:$0xff]  }
 0x1d7   : > { %v2868_v62 = vsel %vm8938_vm2, %v2860_v3, %v2867_v51  ;;  %v2159_v61 = vrot.slane %v2157_v7, 4  ;;  %v2877_v16 = vrot.slane %v2875_v9, 7  ;;  %7737 = vmatpush3.bf16.msra.mxu1 %v8153_v60  ;;  %v2884_v24 = vshrl.u32 %v2785_v44, 16  ;;  %v8162_v9 = vld [vmem:[%s8737_s4 + $0x160] sm:$0xff]  }
 0x1d8   : > { %v6974_v20 = vcombine.low %v2859_v6, %v2868_v62  ;;  %v2151_v37 = vrot.slane %v2150_v23, 4  ;;  %v2887_v14 = vshll.u32 %v2785_v44, 16  ;;  %7738 = vmatprep.subr.bf16.mxu1 %v8154_v21  ;;  %7658 = vmatprep.mubr.bf16.mxu1 %v6919_v59  ;;  %v2168_v8 = vshrl.u32 %v2032_v5, 16  ;;  %v8157_v44 = vld [vmem:[%s8737_s4 + $0x110] sm:$0xff]  }
 0x1d9   : > { %v2160_v31 = vor.u32 %v2159_v61, %v2155_v48  ;;  %v2880_v52 = vor.u32 %v2878_v10, %v2877_v16  ;;  %v2882_v30 = vrot.slane %v2877_v16, 4  ;;  %v2886_v38 = vrot.slane %v2884_v24, 7 }
 0x1da   : > { %7703 = vmatmul.mubr.bf16.vlgmr.msra.gmra.mxu0 %v6974_v20  ;;  %v2156_v28 = vsel %vm9021_vm5, %v2151_v37, %v2155_v48  ;;  %v2171_v47 = vshll.u32 %v2032_v5, 16  ;;  %v2177_v35 = vshll.u32 %v2033_v32, 16  ;;  %v2170_v60 = vrot.slane %v2168_v8, 4  ;;  %v2790_v5 = vld [vmem:[#allocation2 + $0x54] sm:$0xf]  ;;  %v8160_v8 = vld [vmem:[%s8737_s4 + $0x108] sm:$0xff]  }
 0x1db   : > { %v2161_v1 = vrot.slane %v2160_v31, 4  ;;  %v2881_v2 = vsel %vm8938_vm2, %v9014_v50, %v2880_v52  ;;  %v2181_v4 = vshrl.u32 %v2033_v32, 16  ;;  %7739 = vmatpush3.bf16.msra.mxu1 %v8154_v21  ;;  %7783 = vmatpush3.bf16.msra.mxu0 %v9237_v18  ;;  %v2889_v25 = vor.u32 %v2887_v14, %v2886_v38  ;;  %v2791_v32 = vld [vmem:[#allocation2 + $0x58] sm:$0xf] }
 0x1dc   : > { %v2173_v55 = vrot.slane %v2171_v47, 5  ;;  %v2179_v29 = vrot.slane %v2177_v35, 5  ;;  %v2897_v57 = vshrl.u32 %v2787_v43, 16  ;;  %7740 = vmatprep.subr.bf16.mxu1 %v8155_v34  ;;  %7784 = vmatprep.subr.bf16.mxu0 %v8159_v13  ;;  %v2900_v49 = vshll.u32 %v2787_v43, 16  ;;  %v8164_v43 = vld [vmem:[%s8737_s4 + $0x158] sm:$0xff]  }
 0x1dd   : > { %v2166_v19 = vsel %vm9021_vm5, %v2161_v1, %v9011_v39  ;;  %v2183_v11 = vrot.slane %v2181_v4, 4  ;;  %v2906_v50 = vshrl.u32 %v2788_v63, 16  ;;  %v2890_v18 = vsel %vm8938_vm2, %v2882_v30, %v2889_v25  ;;  %v2039_v30 = vld [vmem:[#allocation2 + $0x68] sm:$0xf] }
 0x1de   : > { %v6920_v54 = vcombine.low %v2156_v28, %v2166_v19  ;;  %v2174_v3 = vor.u32 %v2173_v55, %v2170_v60  ;;  %v2899_v17 = vrot.slane %v2897_v57, 7  ;;  %v6975_v26 = vcombine.low %v2881_v2, %v2890_v18 }
 0x1df   : > { %v2184_v22 = vor.u32 %v2183_v11, %v2179_v29  ;;  %v2908_v12 = vrot.slane %v2906_v50, 7  ;;  %v2909_v21 = vshll.u32 %v2788_v63, 16  ;;  %7741 = vmatpush3.bf16.msra.mxu1 %v8155_v34  ;;  %7785 = vmatpush3.bf16.msra.mxu0 %v8159_v13  ;;  %v2192_v7 = vshrl.u32 %v2035_v46, 16  ;;  %v2038_v34 = vld [vmem:[#allocation2 + $0x64] sm:$0xf]  ;;  %v8166_v50 = vld [vmem:[%s8737_s4 + $0x150] sm:$0xff]  }
 0x1e0   : > { %7659 = vmatmul.mubr.bf16.gmra.mxu1 %v6920_v54  ;;  %v2175_v39 = vrot.slane %v2174_v3, 4  ;;  %v2902_v6 = vor.u32 %v2900_v49, %v2899_v17  ;;  %v2904_v51 = vrot.slane %v2899_v17, 4  ;;  %7742 = vmatprep.subr.bf16.mxu1 %v8156_v36  ;;  %v2195_v48 = vshll.u32 %v2035_v46, 16  ;;  %v8163_v49 = vld [vmem:[%s8737_s4 + $0x100] sm:$0xff]   ;;  %v9349_v3 = vld [vmem:[#allocation2 + $0x68] sm:$0xf] }
 0x1e1   : > { %7706 = vmatprep.mubr.bf16.mxu0 %v6975_v26  ;;  %v2185_v15 = vrot.slane %v2184_v22, 4  ;;  %v2911_v23 = vor.u32 %v2909_v21, %v2908_v12  ;;  %v2201_v10 = vshll.u32 %v2036_v27, 16  ;;  %7786 = vmatprep.subr.bf16.mxu0 %v8161_v45  ;;  %v2194_v61 = vrot.slane %v2192_v7, 4  ;;  %v2041_v12 = vld [vmem:[#allocation2 + $0x74] sm:$0xf] }
 0x1e2   : > { %v2180_v59 = vsel %vm9021_vm5, %v2175_v39, %v2179_v29  ;;  %v2903_v62 = vsel %vm8938_vm2, %v9016_v53, %v2902_v6  ;;  %v2205_v16 = vshrl.u32 %v2036_v27, 16  ;;  %v2197_v24 = vrot.slane %v2195_v48, 5  ;;  %v9343_v29 = vld [vmem:[#allocation2 + $0x64] sm:$0xf] }
 0x1e3   : > { %v2190_v20 = vsel %vm9021_vm5, %v2185_v15, %v9035_v33  ;;  %v2912_v37 = vsel %vm8938_vm2, %v2904_v51, %v2911_v23  ;;  %v2203_v14 = vrot.slane %v2201_v10, 5  ;;  %7743 = vmatpush3.bf16.msra.mxu1 %v8156_v36  ;;  %7787 = vmatpush3.bf16.msra.mxu0 %v8161_v45  ;;  %v2919_v52 = vshrl.u32 %v2790_v5, 16  ;;  %v8167_v15 = vld [vmem:[%s8737_s4 + $0x148] sm:$0xff]   ;;  %v9364_v23 = vld [vmem:[%s8737_s4 + $0x1b8] sm:$0xff]  }
 0x1e4   : > { %v6921_v13 = vcombine.low %v2180_v59, %v2190_v20  ;;  %v6976_v31 = vcombine.low %v2903_v62, %v2912_v37  ;;  %v2207_v53 = vrot.slane %v2205_v16, 4  ;;  %7744 = vmatprep.subr.bf16.mxu1 %v8157_v44  ;;  %7788 = vmatprep.subr.bf16.mxu0 %v8162_v9  ;;  %v2198_v28 = vor.u32 %v2197_v24, %v2194_v61  ;;  %v9367_v20 = vld [vmem:[#allocation2 + $0x74] sm:$0xf] }
 0x1e5   : > { %v2922_v38 = vshll.u32 %v2790_v5, 16  ;;  %v2928_v33 = vshrl.u32 %v2791_v32, 16  ;;  %v2931_v47 = vshll.u32 %v2791_v32, 16  ;;  %v2921_v63 = vrot.slane %v2919_v52, 7 }
 0x1e6   : > { %7662 = vmatprep.mubr.bf16.mxu1 %v6921_v13  ;;  %7707 = vmatmul.mubr.bf16.gmra.mxu0 %v6976_v31  ;;  %v2208_v35 = vor.u32 %v2207_v53, %v2203_v14  ;;  %v2216_v1 = vshrl.u32 %v2038_v34, 16  ;;  %v2219_v2 = vshll.u32 %v2038_v34, 16  ;;  %v2199_v60 = vrot.slane %v2198_v28, 4  ;;  %v9371_v13 = vld [vmem:[#allocation2 + $0x78] sm:$0xf] }
 0x1e7   : > { %v2930_v4 = vrot.slane %v2928_v33, 7  ;;  %v2225_v25 = vshll.u32 %v2039_v30, 16  ;;  %v2229_v55 = vshrl.u32 %v2039_v30, 16  ;;  %7745 = vmatpush3.bf16.msra.mxu1 %v8157_v44  ;;  %7789 = vmatpush3.bf16.msra.mxu0 %v8162_v9  ;;  %v2924_v36 = vor.u32 %v2922_v38, %v2921_v63  ;;  %v2042_v9 = vld [vmem:[#allocation2 + $0x78] sm:$0xf] }
 0x1e8   : > { %v2209_v57 = vrot.slane %v2208_v35, 4  ;;  %v2926_v19 = vrot.slane %v2921_v63, 4  ;;  %v2218_v11 = vrot.slane %v2216_v1, 4  ;;  %7746 = vmatprep.subr.bf16.mxu1 %v8160_v8  ;;  %7790 = vmatprep.subr.bf16.mxu0 %v8164_v43  ;;  %v2204_v46 = vsel %vm9021_vm5, %v2199_v60, %v2203_v14  ;;  %v2045_v1 = vld [vmem:[#allocation2 + $0x88] sm:$0xf] }
 0x1e9   : > { %v2933_v45 = vor.u32 %v2931_v47, %v2930_v4  ;;  %v2221_v54 = vrot.slane %v2219_v2, 5  ;;  %v2227_v18 = vrot.slane %v2225_v25, 5  ;;  %v2925_v27 = vsel %vm8938_vm2, %v9039_v41, %v2924_v36  ;;  %v2044_v47 = vld [vmem:[#allocation2 + $0x84] sm:$0xf]  ;;  %v2046_v36 = vld [vmem:[#allocation2 + $0x8c] sm:$0x1] }
 0x1ea   : > { %v2214_v17 = vsel %vm9021_vm5, %v2209_v57, %v9037_v40  ;;  %v2231_v26 = vrot.slane %v2229_v55, 4  ;;  %v2941_v22 = vshrl.u32 %v9343_v29, 16  ;;  %v2944_v51 = vshll.u32 %v9343_v29, 16 }
 0x1eb   : > { %v6922_v21 = vcombine.low %v2204_v46, %v2214_v17  ;;  %v2934_v39 = vsel %vm8938_vm2, %v2926_v19, %v2933_v45  ;;  %v2222_v6 = vor.u32 %v2221_v54, %v2218_v11  ;;  %7747 = vmatpush3.bf16.msra.mxu1 %v8160_v8  ;;  %7791 = vmatpush3.bf16.msra.mxu0 %v8164_v43  ;;  %v2950_v41 = vshrl.u32 %v9349_v3, 16  ;;  %v8171_v8 = vld [vmem:[%s8737_s4 + $0x140] sm:$0xff]  }
 0x1ec   : > { %v6977_v40 = vcombine.low %v2925_v27, %v2934_v39  ;;  %v2232_v7 = vor.u32 %v2231_v26, %v2227_v18  ;;  %v2943_v44 = vrot.slane %v2941_v22, 7  ;;  %7748 = vmatprep.subr.bf16.mxu1 %v8163_v49  ;;  %7792 = vmatprep.subr.bf16.mxu0 %v8166_v50  ;;  %v2953_v10 = vshll.u32 %v9349_v3, 16 }
 0x1ed   : > { %7663 = vmatmul.mubr.bf16.gmra.mxu1 %v6922_v21  ;;  %v2223_v48 = vrot.slane %v2222_v6, 4  ;;  %v2240_v5 = vshrl.u32 %v2041_v12, 16  ;;  %v2243_v59 = vshll.u32 %v2041_v12, 16  ;;  %v2952_v32 = vrot.slane %v2950_v41, 7  ;;  %v11046_v12 = vld [vmem:[#allocation24_spill] sm:$0xff] }
 0x1ee   : > { %7710 = vmatprep.mubr.bf16.mxu0 %v6977_v40  ;;  %v2233_v62 = vrot.slane %v2232_v7, 4  ;;  %v2946_v61 = vor.u32 %v2944_v51, %v2943_v44  ;;  %v2948_v16 = vrot.slane %v2943_v44, 4  ;;  %v2249_v34 = vshll.u32 %v2042_v9, 16  ;;  %v9397_v40 = vld [vmem:[#allocation2 + $0x88] sm:$0xf] }
 0x1ef   : > { %v2228_v37 = vsel %vm9021_vm5, %v2223_v48, %v2227_v18  ;;  %v2242_v24 = vrot.slane %v2240_v5, 4  ;;  %v2245_v14 = vrot.slane %v2243_v59, 5  ;;  %7749 = vmatpush3.bf16.msra.mxu1 %v8163_v49  ;;  %7793 = vmatpush3.bf16.msra.mxu0 %v8166_v50  ;;  %v2955_v52 = vor.u32 %v2953_v10, %v2952_v32  ;;  %v9388_v49 = vld [vmem:[%s8737_s4 + $0x1f8] sm:$0xff]   ;;  %v9392_v18 = vld [vmem:[#allocation2 + $0x84] sm:$0xf]  ;;  %v11047_v7 = vld [vmem:[#allocation23_spill] sm:$0xff] }
 0x1f0   : > { %v2238_v31 = vsel %vm9021_vm5, %v2233_v62, %v9046_v58  ;;  %v2947_v53 = vsel %vm8938_vm2, %v9041_v42, %v2946_v61  ;;  %v2253_v30 = vshrl.u32 %v2042_v9, 16  ;;  %7794 = vmatprep.subr.bf16.mxu0 %v8167_v15  ;;  %7830 = vmatprep.subr.bf16.mxu1 %v9364_v23  ;;  %v2251_v38 = vrot.slane %v2249_v34, 5  ;;  %v2047_v48 = vld [vmem:[#allocation2 + $0x94] sm:$0xf] }
 0x1f1   : > { %v6923_v43 = vcombine.low %v2228_v37, %v2238_v31  ;;  %v2246_v28 = vor.u32 %v2245_v14, %v2242_v24  ;;  %v2963_v33 = vshrl.u32 %v9367_v20, 16  ;;  %v2956_v35 = vsel %vm8938_vm2, %v2948_v16, %v2955_v52  ;;  %v2048_v24 = vld [vmem:[#allocation2 + $0x98] sm:$0xf]  ;;  %v2049_v31 = vld [vmem:[#allocation2 + $0x9c] sm:$0x1] }
 0x1f2   : > { %v2255_v58 = vrot.slane %v2253_v30, 4  ;;  %v2966_v63 = vshll.u32 %v9367_v20, 16  ;;  %v2972_v42 = vshrl.u32 %v9371_v13, 16  ;;  %v6978_v2 = vcombine.low %v2947_v53, %v2956_v35 }
 0x1f3   : > { %7666 = vmatprep.mubr.bf16.mxu1 %v6923_v43  ;;  %v2247_v60 = vrot.slane %v2246_v28, 4  ;;  %v2965_v4 = vrot.slane %v2963_v33, 7  ;;  %v2975_v25 = vshll.u32 %v9371_v13, 16  ;;  %7795 = vmatpush3.bf16.msra.mxu0 %v8167_v15  ;;  %v2264_v19 = vshrl.u32 %v2044_v47, 16 }
 0x1f4   : > { %v2256_v55 = vor.u32 %v2255_v58, %v2251_v38  ;;  %v2974_v57 = vrot.slane %v2972_v42, 7  ;;  %v2267_v11 = vshll.u32 %v2044_v47, 16  ;;  %7796 = vmatprep.subr.bf16.mxu0 %v8171_v8  ;;  %7711 = vmatmul.mubr.bf16.gmra.mxu0 %v6978_v2  ;;  %v2273_v54 = vshll.u32 %v2045_v1, 16 }
 0x1f5   : > { %v2252_v50 = vsel %vm9021_vm5, %v2247_v60, %v2251_v38  ;;  %v2968_v46 = vor.u32 %v2966_v63, %v2965_v4  ;;  %v2970_v45 = vrot.slane %v2965_v4, 4  ;;  %v2266_v26 = vrot.slane %v2264_v19, 4  ;;  %v2801_v38 = vld [vmem:[#allocation2 + $0x90] sm:$0x8]  ;;  %v11048_v63 = vld [vmem:[#allocation25_spill] sm:$0xff] }
 0x1f6   : > { %v2257_v17 = vrot.slane %v2256_v55, 4  ;;  %v2977_v27 = vor.u32 %v2975_v25, %v2974_v57  ;;  %v2269_v22 = vrot.slane %v2267_v11, 5  ;;  %v2275_v39 = vrot.slane %v2273_v54, 5  ;;  %v9414_v4 = vld [vmem:[#allocation2 + $0x94] sm:$0xf] }
 0x1f7   : > { %v2969_v21 = vsel %vm8938_vm2, %v11046_v12, %v2968_v46  ;;  %v2277_v6 = vshrl.u32 %v2045_v1, 16  ;;  %v2283_v51 = vshll.u32 %v2046_v36, 16  ;;  %7797 = vmatpush3.bf16.msra.mxu0 %v8171_v8  ;;  %v2985_v15 = vshrl.u32 %v9392_v18, 16  ;;  %v9418_v36 = vld [vmem:[#allocation2 + $0x98] sm:$0xf] }
 0x1f8   : > { %v2262_v44 = vsel %vm9021_vm5, %v2257_v17, %v11047_v7  ;;  %v2978_v41 = vsel %vm8938_vm2, %v2970_v45, %v2977_v27  ;;  %v2270_v9 = vor.u32 %v2269_v22, %v2266_v26  ;;  %7878 = vmatprep.subr.bf16.mxu0 %v9388_v49  ;;  %v2988_v32 = vshll.u32 %v9392_v18, 16  ;;  %v2050_v54 = vld [vmem:[#allocation2 + $0xa4] sm:$0xf]  ;;  %v2051_v12 = vld [vmem:[#allocation2 + $0xa8] sm:$0xf] }
 0x1f9   : > { %v6924_v10 = vcombine.low %v2252_v50, %v2262_v44  ;;  %v6979_v5 = vcombine.low %v2969_v21, %v2978_v41  ;;  %v2279_v59 = vrot.slane %v2277_v6, 4  ;;  %v2285_v62 = vrot.slane %v2283_v51, 5  ;;  %v2052_v41 = vld [vmem:[#allocation2 + $0xac] sm:$0x1] }
 0x1fa   : > { %v2271_v61 = vrot.slane %v2270_v9, 4  ;;  %v2987_v16 = vrot.slane %v2985_v15, 7  ;;  %v2994_v37 = vshrl.u32 %v9397_v40, 16  ;;  %v2997_v34 = vshll.u32 %v9397_v40, 16 }
 0x1fb   : > { %7667 = vmatmul.mubr.bf16.gmra.mxu1 %v6924_v10  ;;  %7714 = vmatprep.mubr.bf16.mxu0 %v6979_v5  ;;  %v2280_v14 = vor.u32 %v2279_v59, %v2275_v39  ;;  %v2288_v53 = vshrl.u32 %v2047_v48, 16  ;;  %v2291_v52 = vshll.u32 %v2047_v48, 16  ;;  %v2297_v58 = vshll.u32 %v2048_v24, 16 }
 0x1fc   : > { %v2276_v30 = vsel %vm9021_vm5, %v2271_v61, %v2275_v39  ;;  %v2990_v8 = vor.u32 %v2988_v32, %v2987_v16  ;;  %v2992_v43 = vrot.slane %v2987_v16, 4  ;;  %v2996_v28 = vrot.slane %v2994_v37, 7 }
 0x1fd   : > { %v2281_v33 = vrot.slane %v2280_v14, 4  ;;  %v2290_v47 = vrot.slane %v2288_v53, 4  ;;  %v2293_v35 = vrot.slane %v2291_v52, 5  ;;  %v2301_v2 = vshrl.u32 %v2048_v24, 16  ;;  %v9428_v24 = vld [vmem:[#allocation2 + $0xa4] sm:$0xf] }
 0x1fe   : > { %v2991_v42 = vsel %vm8938_vm2, %v11048_v63, %v2990_v8  ;;  %v2999_v1 = vor.u32 %v2997_v34, %v2996_v28  ;;  %v2307_v60 = vshll.u32 %v2049_v31, 16  ;;  %v2299_v57 = vrot.slane %v2297_v58, 5  ;;  %v9434_v28 = vld [vmem:[#allocation2 + $0xa8] sm:$0xf]  ;;  %v2053_v58 = vld [vmem:[#allocation2 + $0xb4] sm:$0xf] }
 0x1ff   : > { %v2286_v25 = vsel %vm9021_vm5, %v2281_v33, %v2285_v62  ;;  %v2294_v55 = vor.u32 %v2293_v35, %v2290_v47  ;;  %v3002_v19 = vshrl.u32 %v2801_v38, 16  ;;  %v2303_v46 = vrot.slane %v2301_v2, 4  ;;  %v2804_v62 = vld [vmem:[#allocation2 + $0xa0] sm:$0x8] }
 0x200   : > { %v6925_v11 = vcombine.low %v2276_v30, %v2286_v25  ;;  %v3000_v50 = vsel %vm8938_vm2, %v2992_v43, %v2999_v1  ;;  %v2309_v45 = vrot.slane %v2307_v60, 5  ;;  %v3007_v22 = vshrl.u32 %v9414_v4, 16 }
 0x201   : > { %v6980_v17 = vcombine.low %v2991_v42, %v3000_v50  ;;  %v2295_v27 = vrot.slane %v2294_v55, 4  ;;  %v6949_v26 = vrot.slane %v3002_v19, 11  ;;  %v2304_v21 = vor.u32 %v2303_v46, %v2299_v57  ;;  %v2054_v19 = vld [vmem:[#allocation2 + $0xb8] sm:$0xf]  ;;  %v2055_v46 = vld [vmem:[#allocation2 + $0xbc] sm:$0x1] }
 0x202   : > { %7670 = vmatprep.mubr.bf16.mxu1 %v6925_v11  ;;  %v3010_v39 = vshll.u32 %v9414_v4, 16  ;;  %v3016_v6 = vshrl.u32 %v9418_v36, 16  ;;  %v3019_v51 = vshll.u32 %v9418_v36, 16  ;;  %v3009_v44 = vrot.slane %v3007_v22, 7 }
 0x203   : > { %7715 = vmatmul.mubr.bf16.gmra.mxu0 %v6980_v17  ;;  %v2300_v7 = vsel %vm9021_vm5, %v2295_v27, %v2299_v57  ;;  %v2312_v9 = vshrl.u32 %v2050_v54, 16  ;;  %v2315_v15 = vshll.u32 %v2050_v54, 16  ;;  %v2305_v48 = vrot.slane %v2304_v21, 4  ;;  %v9446_v21 = vld [vmem:[#allocation2 + $0xb4] sm:$0xf] }
 0x204   : > { %v3018_v10 = vrot.slane %v3016_v6, 7  ;;  %v2321_v5 = vshll.u32 %v2051_v12, 16  ;;  %v2325_v59 = vshrl.u32 %v2051_v12, 16  ;;  %v3012_v61 = vor.u32 %v3010_v39, %v3009_v44  ;;  %v2807_v12 = vld [vmem:[#allocation2 + $0xb0] sm:$0x8] }
 0x205   : > { %v3014_v16 = vrot.slane %v3009_v44, 4  ;;  %v2314_v32 = vrot.slane %v2312_v9, 4  ;;  %v2317_v37 = vrot.slane %v2315_v15, 5  ;;  %v2310_v14 = vsel %vm9021_vm5, %v2305_v48, %v2309_v45  ;;  %v2056_v48 = vld [vmem:[#allocation2 + $0xc4] sm:$0xf] }
 0x206   : > { %v3021_v34 = vor.u32 %v3019_v51, %v3018_v10  ;;  %v2323_v31 = vrot.slane %v2321_v5, 5  ;;  %v2327_v53 = vrot.slane %v2325_v59, 4  ;;  %v6926_v52 = vcombine.low %v2300_v7, %v2310_v14  ;;  %v9450_v59 = vld [vmem:[#allocation2 + $0xb8] sm:$0xf] }
 0x207   : > { %v3013_v30 = vsel %vm8938_vm2, %v6949_v26, %v3012_v61  ;;  %v2318_v8 = vor.u32 %v2317_v37, %v2314_v32  ;;  %v2331_v43 = vshll.u32 %v2052_v41, 16  ;;  %v3024_v47 = vshrl.u32 %v2804_v62, 16 }
 0x208   : > { %v3022_v38 = vsel %vm8938_vm2, %v3014_v16, %v3021_v34  ;;  %v2328_v33 = vor.u32 %v2327_v53, %v2323_v31  ;;  %v3029_v35 = vshrl.u32 %v9428_v24, 16  ;;  %7671 = vmatmul.mubr.bf16.gmra.mxu1 %v6926_v52  ;;  %v3032_v2 = vshll.u32 %v9428_v24, 16 }
 0x209   : > { %v6981_v63 = vcombine.low %v3013_v30, %v3022_v38  ;;  %v2319_v42 = vrot.slane %v2318_v8, 4  ;;  %v2333_v1 = vrot.slane %v2331_v43, 5  ;;  %v6950_v25 = vrot.slane %v3024_v47, 11  ;;  %v2057_v30 = vld [vmem:[#allocation2 + $0xc8] sm:$0xf] }
 0x20a   : > { %v2329_v60 = vrot.slane %v2328_v33, 4  ;;  %v3031_v55 = vrot.slane %v3029_v35, 7  ;;  %v3038_v57 = vshrl.u32 %v9434_v28, 16  ;;  %v3041_v50 = vshll.u32 %v9434_v28, 16  ;;  %v2058_v33 = vld [vmem:[#allocation2 + $0xcc] sm:$0x1] }
 0x20b   : > { %7718 = vmatprep.mubr.bf16.mxu0 %v6981_v63  ;;  %v2324_v11 = vsel %vm9021_vm5, %v2319_v42, %v2323_v31  ;;  %v2336_v45 = vshrl.u32 %v2053_v58, 16  ;;  %v2339_v54 = vshll.u32 %v2053_v58, 16  ;;  %v2345_v7 = vshll.u32 %v2054_v19, 16 }
 0x20c   : > { %v2334_v17 = vsel %vm9021_vm5, %v2329_v60, %v2333_v1  ;;  %v3034_v27 = vor.u32 %v3032_v2, %v3031_v55  ;;  %v3036_v26 = vrot.slane %v3031_v55, 4  ;;  %v3040_v22 = vrot.slane %v3038_v57, 7  ;;  %v2810_v1 = vld [vmem:[#allocation2 + $0xc0] sm:$0x8] }
 0x20d   : > { %v6927_v39 = vcombine.low %v2324_v11, %v2334_v17  ;;  %v2338_v6 = vrot.slane %v2336_v45, 4  ;;  %v2341_v51 = vrot.slane %v2339_v54, 5  ;;  %v2349_v9 = vshrl.u32 %v2054_v19, 16 }
 0x20e   : > { %v3035_v44 = vsel %vm8938_vm2, %v6950_v25, %v3034_v27  ;;  %v3043_v41 = vor.u32 %v3041_v50, %v3040_v22  ;;  %v2355_v15 = vshll.u32 %v2055_v46, 16  ;;  %v2347_v5 = vrot.slane %v2345_v7, 5  ;;  %v9462_v46 = vld [vmem:[#allocation2 + $0xc4] sm:$0xf]  ;;  %v9466_v27 = vld [vmem:[#allocation2 + $0xc8] sm:$0xf] }
 0x20f   : > { %7674 = vmatprep.mubr.bf16.mxu1 %v6927_v39  ;;  %v2342_v10 = vor.u32 %v2341_v51, %v2338_v6  ;;  %v3046_v62 = vshrl.u32 %v2807_v12, 16  ;;  %v3051_v61 = vshrl.u32 %v9446_v21, 16  ;;  %v2351_v32 = vrot.slane %v2349_v9, 4  ;;  %v2059_v51 = vld [vmem:[#allocation2 + $0xd4] sm:$0xf] }
 0x210   : > { %v3044_v16 = vsel %vm8938_vm2, %v3036_v26, %v3043_v41  ;;  %v2357_v37 = vrot.slane %v2355_v15, 5  ;;  %v3054_v14 = vshll.u32 %v9446_v21, 16  ;;  %v3060_v43 = vshrl.u32 %v9450_v59, 16  ;;  %v2060_v15 = vld [vmem:[#allocation2 + $0xd8] sm:$0xf] }
 0x211   : > { %v6982_v34 = vcombine.low %v3035_v44, %v3044_v16  ;;  %v2343_v31 = vrot.slane %v2342_v10, 4  ;;  %v6951_v53 = vrot.slane %v3046_v62, 11  ;;  %v3053_v52 = vrot.slane %v3051_v61, 7 }
 0x212   : > { %v2352_v8 = vor.u32 %v2351_v32, %v2347_v5  ;;  %v3063_v38 = vshll.u32 %v9450_v59, 16  ;;  %v2360_v47 = vshrl.u32 %v2056_v48, 16  ;;  %v2363_v42 = vshll.u32 %v2056_v48, 16  ;;  %v2061_v32 = vld [vmem:[#allocation2 + $0xdc] sm:$0x1] }
 0x213   : > { %7719 = vmatmul.mubr.bf16.gmra.mxu0 %v6982_v34  ;;  %v2348_v35 = vsel %vm9021_vm5, %v2343_v31, %v2347_v5  ;;  %v3056_v58 = vor.u32 %v3054_v14, %v3053_v52  ;;  %v3058_v63 = vrot.slane %v3053_v52, 4  ;;  %v3062_v60 = vrot.slane %v3060_v43, 7 }
 0x214   : > { %v2353_v2 = vrot.slane %v2352_v8, 4  ;;  %v2362_v25 = vrot.slane %v2360_v47, 4  ;;  %v2369_v55 = vshll.u32 %v2057_v30, 16  ;;  %v2365_v19 = vrot.slane %v2363_v42, 5  ;;  %v9476_v47 = vld [vmem:[#allocation2 + $0xd4] sm:$0xf] }
 0x215   : > { %v3057_v57 = vsel %vm8938_vm2, %v6951_v53, %v3056_v58  ;;  %v2373_v11 = vshrl.u32 %v2057_v30, 16  ;;  %v2379_v50 = vshll.u32 %v2058_v33, 16  ;;  %v3065_v54 = vor.u32 %v3063_v38, %v3062_v60  ;;  %v2813_v30 = vld [vmem:[#allocation2 + $0xd0] sm:$0x8] }
 0x216   : > { %v2358_v45 = vsel %vm9021_vm5, %v2353_v2, %v2357_v37  ;;  %v2371_v17 = vrot.slane %v2369_v55, 5  ;;  %v3068_v26 = vshrl.u32 %v2810_v1, 16  ;;  %v2366_v12 = vor.u32 %v2365_v19, %v2362_v25  ;;  %v9482_v55 = vld [vmem:[#allocation2 + $0xd8] sm:$0xf] }
 0x217   : > { %v6928_v22 = vcombine.low %v2348_v35, %v2358_v45  ;;  %v2375_v39 = vrot.slane %v2373_v11, 4  ;;  %v2381_v6 = vrot.slane %v2379_v50, 5  ;;  %v3066_v7 = vsel %vm8938_vm2, %v3058_v63, %v3065_v54  ;;  %v2062_v45 = vld [vmem:[#allocation2 + $0xe4] sm:$0xf] }
 0x218   : > { %v6952_v44 = vrot.slane %v3068_v26, 11  ;;  %v3073_v41 = vshrl.u32 %v9462_v46, 16  ;;  %v3076_v9 = vshll.u32 %v9462_v46, 16  ;;  %v6983_v48 = vcombine.low %v3057_v57, %v3066_v7  ;;  %v2063_v7 = vld [vmem:[#allocation2 + $0xe8] sm:$0xf] }
 0x219   : > { %7675 = vmatmul.mubr.bf16.gmra.mxu1 %v6928_v22  ;;  %v2367_v10 = vrot.slane %v2366_v12, 4  ;;  %v2376_v5 = vor.u32 %v2375_v39, %v2371_v17  ;;  %v3082_v62 = vshrl.u32 %v9466_v27, 16  ;;  %v3085_v16 = vshll.u32 %v9466_v27, 16 }
 0x21a   : > { %v3075_v61 = vrot.slane %v3073_v41, 7  ;;  %v2384_v37 = vshrl.u32 %v2059_v51, 16  ;;  %v2387_v14 = vshll.u32 %v2059_v51, 16  ;;  %7722 = vmatprep.mubr.bf16.mxu0 %v6983_v48  ;;  %v2393_v52 = vshll.u32 %v2060_v15, 16 }
 0x21b   : > { %v2372_v34 = vsel %vm9021_vm5, %v2367_v10, %v2371_v17  ;;  %v2377_v31 = vrot.slane %v2376_v5, 4  ;;  %v3084_v53 = vrot.slane %v3082_v62, 7  ;;  %v2397_v42 = vshrl.u32 %v2060_v15, 16 }
 0x21c   : > { %v3078_v8 = vor.u32 %v3076_v9, %v3075_v61  ;;  %v3080_v43 = vrot.slane %v3075_v61, 4  ;;  %v2386_v38 = vrot.slane %v2384_v37, 4  ;;  %v2389_v33 = vrot.slane %v2387_v14, 5  ;;  %v2064_v9 = vld [vmem:[#allocation2 + $0xec] sm:$0x1] }
 0x21d   : > { %v2382_v35 = vsel %vm9021_vm5, %v2377_v31, %v2381_v6  ;;  %v3087_v58 = vor.u32 %v3085_v16, %v3084_v53  ;;  %v2395_v63 = vrot.slane %v2393_v52, 5  ;;  %v2403_v25 = vshll.u32 %v2061_v32, 16  ;;  %v2816_v16 = vld [vmem:[#allocation2 + $0xe0] sm:$0x8]  ;;  %v9492_v31 = vld [vmem:[#allocation2 + $0xe4] sm:$0xf] }
 0x21e   : > { %v6929_v1 = vcombine.low %v2372_v34, %v2382_v35  ;;  %v3079_v2 = vsel %vm8938_vm2, %v6952_v44, %v3078_v8  ;;  %v2390_v60 = vor.u32 %v2389_v33, %v2386_v38  ;;  %v2399_v19 = vrot.slane %v2397_v42, 4 }
 0x21f   : > { %v3088_v57 = vsel %vm8938_vm2, %v3080_v43, %v3087_v58  ;;  %v3090_v11 = vshrl.u32 %v2813_v30, 16  ;;  %v3095_v50 = vshrl.u32 %v9476_v47, 16  ;;  %v2405_v26 = vrot.slane %v2403_v25, 5  ;;  %v9498_v58 = vld [vmem:[#allocation2 + $0xe8] sm:$0xf] }
 0x220   : > { %7678 = vmatprep.mubr.bf16.mxu1 %v6929_v1  ;;  %v6984_v54 = vcombine.low %v3079_v2, %v3088_v57  ;;  %v2391_v17 = vrot.slane %v2390_v60, 4  ;;  %v3098_v22 = vshll.u32 %v9476_v47, 16  ;;  %v2400_v12 = vor.u32 %v2399_v19, %v2395_v63  ;;  %v2065_v60 = vld [vmem:[#allocation2 + $0xf4] sm:$0xf] }
 0x221   : > { %v6953_v39 = vrot.slane %v3090_v11, 11  ;;  %v3097_v6 = vrot.slane %v3095_v50, 7  ;;  %v3104_v51 = vshrl.u32 %v9482_v55, 16  ;;  %v3107_v41 = vshll.u32 %v9482_v55, 16  ;;  %v2066_v50 = vld [vmem:[#allocation2 + $0xf8] sm:$0xf] }
 0x222   : > { %7723 = vmatmul.mubr.bf16.gmra.mxu0 %v6984_v54  ;;  %v2396_v44 = vsel %vm9021_vm5, %v2391_v17, %v2395_v63  ;;  %v2408_v15 = vshrl.u32 %v2062_v45, 16  ;;  %v2411_v48 = vshll.u32 %v2062_v45, 16  ;;  %v2401_v10 = vrot.slane %v2400_v12, 4 }
 0x223   : > { %v3100_v5 = vor.u32 %v3098_v22, %v3097_v6  ;;  %v3102_v62 = vrot.slane %v3097_v6, 4  ;;  %v3106_v61 = vrot.slane %v3104_v51, 7  ;;  %v2417_v14 = vshll.u32 %v2063_v7, 16  ;;  %v2067_v22 = vld [vmem:[#allocation2 + $0xfc] sm:$0x1] }
 0x224   : > { %v2410_v32 = vrot.slane %v2408_v15, 4  ;;  %v2413_v37 = vrot.slane %v2411_v48, 5  ;;  %v2421_v34 = vshrl.u32 %v2063_v7, 16  ;;  %v2406_v53 = vsel %vm9021_vm5, %v2401_v10, %v2405_v26  ;;  %v2819_v7 = vld [vmem:[#allocation2 + $0xf0] sm:$0x8] }
 0x225   : > { %v3101_v52 = vsel %vm8938_vm2, %v6953_v39, %v3100_v5  ;;  %v3109_v30 = vor.u32 %v3107_v41, %v3106_v61  ;;  %v2427_v8 = vshll.u32 %v2064_v9, 16  ;;  %v6930_v43 = vcombine.low %v2396_v44, %v2406_v53  ;;  %v9508_v48 = vld [vmem:[#allocation2 + $0xf4] sm:$0xf] }
 0x226   : > { %v2414_v38 = vor.u32 %v2413_v37, %v2410_v32  ;;  %v2419_v33 = vrot.slane %v2417_v14, 5  ;;  %v2423_v35 = vrot.slane %v2421_v34, 4  ;;  %v3112_v1 = vshrl.u32 %v2816_v16, 16  ;;  %v9512_v16 = vld [vmem:[#allocation2 + $0xf8] sm:$0xf] }
 0x227   : > { %v3110_v63 = vsel %vm8938_vm2, %v3102_v62, %v3109_v30  ;;  %v2429_v42 = vrot.slane %v2427_v8, 5  ;;  %v3117_v2 = vshrl.u32 %v9492_v31, 16  ;;  %7679 = vmatmul.mubr.bf16.gmra.mxu1 %v6930_v43  ;;  %v3120_v11 = vshll.u32 %v9492_v31, 16 }
 0x228   : > { %v6985_v25 = vcombine.low %v3101_v52, %v3110_v63  ;;  %v2415_v57 = vrot.slane %v2414_v38, 4  ;;  %v2424_v19 = vor.u32 %v2423_v35, %v2419_v33  ;;  %v6954_v45 = vrot.slane %v3112_v1, 11  ;;  %v2822_v63 = vld [vmem:[#allocation2 + $0x100] sm:$0x8] }
 0x229   : > { %v3119_v54 = vrot.slane %v3117_v2, 7  ;;  %v3126_v17 = vshrl.u32 %v9498_v58, 16  ;;  %v3129_v26 = vshll.u32 %v9498_v58, 16  ;;  %v2432_v6 = vshrl.u32 %v2065_v60, 16 }
 0x22a   : > { %7726 = vmatprep.mubr.bf16.mxu0 %v6985_v25  ;;  %v2420_v12 = vsel %vm9021_vm5, %v2415_v57, %v2419_v33  ;;  %v2425_v39 = vrot.slane %v2424_v19, 4  ;;  %v2435_v51 = vshll.u32 %v2065_v60, 16  ;;  %v2441_v15 = vshll.u32 %v2066_v50, 16  ;;  %v9521_v25 = vld [vmem:[#allocation2 + $0x104] sm:$0xf] }
 0x22b   : > { %v3122_v44 = vor.u32 %v3120_v11, %v3119_v54  ;;  %v3124_v41 = vrot.slane %v3119_v54, 4  ;;  %v3128_v9 = vrot.slane %v3126_v17, 7  ;;  %v2434_v5 = vrot.slane %v2432_v6, 4 }
 0x22c   : > { %v2430_v10 = vsel %vm9021_vm5, %v2425_v39, %v2429_v42  ;;  %v2437_v62 = vrot.slane %v2435_v51, 5  ;;  %v2445_v61 = vshrl.u32 %v2066_v50, 16  ;;  %v2443_v34 = vrot.slane %v2441_v15, 5 }
 0x22d   : > { %v6931_v32 = vcombine.low %v2420_v12, %v2430_v10  ;;  %v3123_v37 = vsel %vm8938_vm2, %v6954_v45, %v3122_v44  ;;  %v3131_v14 = vor.u32 %v3129_v26, %v3128_v9  ;;  %v2451_v30 = vshll.u32 %v2067_v22, 16  ;;  %v9524_v45 = vld [vmem:[#allocation2 + $0x108] sm:$0xf]  ;;  %v8224_v26 = vld [vmem:[#allocation2 + $0x14] sm:$0xf] }
 0x22e   : > { %v2438_v53 = vor.u32 %v2437_v62, %v2434_v5  ;;  %v2447_v52 = vrot.slane %v2445_v61, 4  ;;  %v3134_v8 = vshrl.u32 %v2819_v7, 16  ;;  %v3139_v38 = vshrl.u32 %v9508_v48, 16  ;;  %v8225_v22 = vld [vmem:[#allocation2 + $0x18] sm:$0xf] }
 0x22f   : > { %7682 = vmatprep.mubr.bf16.mxu1 %v6931_v32  ;;  %v3132_v43 = vsel %vm8938_vm2, %v3124_v41, %v3131_v14  ;;  %v3142_v33 = vshll.u32 %v9508_v48, 16  ;;  %v3148_v35 = vshrl.u32 %v9512_v16, 16  ;;  %v2453_v60 = vrot.slane %v2451_v30, 5  ;;  %v3853_v5 = vld [vmem:[#allocation2 + $0x14] sm:$0xf] }
 0x230   : > { %v6986_v42 = vcombine.low %v3123_v37, %v3132_v43  ;;  %v2439_v1 = vrot.slane %v2438_v53, 4  ;;  %v2448_v2 = vor.u32 %v2447_v52, %v2443_v34  ;;  %v6955_v57 = vrot.slane %v3134_v8, 11  ;;  %v3854_v14 = vld [vmem:[#allocation2 + $0x18] sm:$0xf]  ;;  %v8226_v8 = vld [vmem:[#allocation2 + $0x24] sm:$0xf] }
 0x231   : > { %v3141_v19 = vrot.slane %v3139_v38, 7  ;;  %v3150_v11 = vrot.slane %v3148_v35, 7  ;;  %v3151_v50 = vshll.u32 %v9512_v16, 16  ;;  %v7013_v12 = vcombine.low %v8224_v26, %v8225_v22  ;;  %v8227_v43 = vld [vmem:[#allocation2 + $0x28] sm:$0xf] }
 0x232   : > { %7727 = vmatmul.mubr.bf16.gmra.mxu0 %v6986_v42  ;;  %v2444_v54 = vsel %vm9021_vm5, %v2439_v1, %v2443_v34  ;;  %v2449_v17 = vrot.slane %v2448_v2, 4  ;;  %v3156_v39 = vshrl.u32 %v2822_v63, 16  ;;  %v3161_v44 = vshrl.u32 %v9521_v25, 16  ;;  %v3855_v34 = vld [vmem:[#allocation2 + $0x1c] sm:$0x1] }
 0x233   : > { %v3144_v6 = vor.u32 %v3142_v33, %v3141_v19  ;;  %v3146_v51 = vrot.slane %v3141_v19, 4  ;;  %v3153_v7 = vor.u32 %v3151_v50, %v3150_v11  ;;  %v3164_v15 = vshll.u32 %v9521_v25, 16  ;;  %v3856_v19 = vld [vmem:[#allocation2 + $0x24] sm:$0xf]  ;;  %v8229_v26 = vld [vmem:[#allocation2 + $0x38] sm:$0xf] }
 0x234   : > { %v2454_v41 = vsel %vm9021_vm5, %v2449_v17, %v2453_v60  ;;  %v6956_v9 = vrot.slane %v3156_v39, 11  ;;  %v3170_v10 = vshrl.u32 %v9524_v45, 16  ;;  %v3163_v37 = vrot.slane %v3161_v44, 7  ;;  %v8228_v17 = vld [vmem:[#allocation2 + $0x34] sm:$0xf] }
 0x235   : > { %v6932_v62 = vcombine.low %v2444_v54, %v2454_v41  ;;  %v3145_v61 = vsel %vm8938_vm2, %v6955_v57, %v3144_v6  ;;  %v3154_v32 = vsel %vm8938_vm2, %v3146_v51, %v3153_v7  ;;  %v3173_v30 = vshll.u32 %v9524_v45, 16  ;;  %v3857_v39 = vld [vmem:[#allocation2 + $0x28] sm:$0xf]  ;;  %v3858_v6 = vld [vmem:[#allocation2 + $0x2c] sm:$0x1] }
 0x236   : > { %v6987_v53 = vcombine.low %v3145_v61, %v3154_v32  ;;  %v3172_v52 = vrot.slane %v3170_v10, 7  ;;  %v7014_v38 = vcombine.low %v8226_v8, %v8227_v43  ;;  %v3166_v33 = vor.u32 %v3164_v15, %v3163_v37  ;;  %v8231_v8 = vld [vmem:[#allocation2 + $0x48] sm:$0xf] }
 0x237   : > { %7683 = vmatmul.mubr.bf16.gmra.mxu1 %v6932_v62  ;;  %v3168_v35 = vrot.slane %v3163_v37, 4  ;;  %v3902_v63 = vshrl.u32 %v3853_v5, 16  ;;  %v3905_v42 = vshll.u32 %v3853_v5, 16  ;;  %v3911_v2 = vshll.u32 %v3854_v14, 16  ;;  %v3859_v37 = vld [vmem:[#allocation2 + $0x34] sm:$0xf] }
 0x238   : > { %7730 = vmatprep.mubr.bf16.mxu0 %v6987_v53  ;;  %7750 = vmatprep.mubr.bf16.mxu1 %v7013_v12  ;;  %v3175_v1 = vor.u32 %v3173_v30, %v3172_v52  ;;  %v3915_v60 = vshrl.u32 %v3854_v14, 16  ;;  %v3921_v57 = vshll.u32 %v3855_v34, 16  ;;  %v3167_v11 = vsel %vm8938_vm2, %v6956_v9, %v3166_v33  ;;  %v8172_v52 = vld [vmem:[%s8737_s4 + $0x1b0] sm:$0xff]   ;;  %v8230_v30 = vld [vmem:[#allocation2 + $0x44] sm:$0xf] }
 0x239   : > { %v3904_v50 = vrot.slane %v3902_v63, 4  ;;  %v3907_v54 = vrot.slane %v3905_v42, 5  ;;  %v7015_v22 = vcombine.low %v8228_v17, %v8229_v26  ;;  %v3913_v7 = vrot.slane %v3911_v2, 5  ;;  %v3860_v33 = vld [vmem:[#allocation2 + $0x38] sm:$0xf] }
 0x23a   : > { %v3176_v51 = vsel %vm8938_vm2, %v3168_v35, %v3175_v1  ;;  %v3917_v12 = vrot.slane %v3915_v60, 4  ;;  %v3923_v44 = vrot.slane %v3921_v57, 5  ;;  %v3926_v10 = vshrl.u32 %v3856_v19, 16  ;;  %v3861_v57 = vld [vmem:[#allocation2 + $0x3c] sm:$0x1] }
 0x23b   : > { %v6988_v41 = vcombine.low %v3167_v11, %v3176_v51  ;;  %v3908_v15 = vor.u32 %v3907_v54, %v3904_v50  ;;  %v3929_v5 = vshll.u32 %v3856_v19, 16  ;;  %v3935_v9 = vshll.u32 %v3857_v39, 16 }
 0x23c   : > { %v3918_v62 = vor.u32 %v3917_v12, %v3913_v7  ;;  %v3939_v61 = vshrl.u32 %v3857_v39, 16  ;;  %v3945_v32 = vshll.u32 %v3858_v6, 16  ;;  %v3928_v34 = vrot.slane %v3926_v10, 4  ;;  %v3862_v39 = vld [vmem:[#allocation2 + $0x44] sm:$0xf]  ;;  %v8175_v12 = vld [vmem:[%s8737_s4 + $0x1a8] sm:$0xff]  }
 0x23d   : > { %7731 = vmatmul.mubr.bf16.gmra.mxu0 %v6988_v41  ;;  %v3909_v14 = vrot.slane %v3908_v15, 4  ;;  %v3931_v53 = vrot.slane %v3929_v5, 5  ;;  %v7016_v43 = vcombine.low %v8230_v30, %v8231_v8  ;;  %v3937_v63 = vrot.slane %v3935_v9, 5  ;;  %v8233_v9 = vld [vmem:[#allocation2 + $0x58] sm:$0xf] }
 0x23e   : > { %v3919_v35 = vrot.slane %v3918_v62, 4  ;;  %v3941_v42 = vrot.slane %v3939_v61, 4  ;;  %v3947_v1 = vrot.slane %v3945_v32, 5  ;;  %v3950_v19 = vshrl.u32 %v3859_v37, 16  ;;  %v3863_v62 = vld [vmem:[#allocation2 + $0x48] sm:$0xf] }
 0x23f   : > { %7751 = vmatmul.mubr.bf16.vlgmr.msra.gmra.mxu1 %v7014_v38  ;;  %v3914_v2 = vsel %vm9021_vm5, %v3909_v14, %v3913_v7  ;;  %v3932_v60 = vor.u32 %v3931_v53, %v3928_v34  ;;  %v3953_v11 = vshll.u32 %v3859_v37, 16  ;;  %v3959_v17 = vshll.u32 %v3860_v33, 16  ;;  %v3864_v32 = vld [vmem:[#allocation2 + $0x4c] sm:$0x1]  ;;  %v3865_v8 = vld [vmem:[#allocation2 + $0x54] sm:$0xf] }
 0x240   : > { %v3924_v50 = vsel %vm9021_vm5, %v3919_v35, %v3923_v44  ;;  %7831 = vmatpush3.bf16.msra.mxu1 %v9364_v23  ;;  %7754 = vmatprep.mubr.bf16.mxu1 %v7015_v22  ;;  %v3942_v54 = vor.u32 %v3941_v42, %v3937_v63  ;;  %v3963_v26 = vshrl.u32 %v3860_v33, 16  ;;  %v3952_v51 = vrot.slane %v3950_v19, 4  ;;  %v8232_v44 = vld [vmem:[#allocation2 + $0x54] sm:$0xf] }
 0x241   : > { %v7053_v6 = vcombine.low %v3914_v2, %v3924_v50  ;;  %v3933_v38 = vrot.slane %v3932_v60, 4  ;;  %7832 = vmatprep.subr.bf16.mxu1 %v8172_v52  ;;  %v3955_v7 = vrot.slane %v3953_v11, 5  ;;  %v3961_v15 = vrot.slane %v3959_v17, 5  ;;  %v3866_v2 = vld [vmem:[#allocation2 + $0x58] sm:$0xf]  ;;  %v8178_v60 = vld [vmem:[%s8737_s4 + $0x1a0] sm:$0xff]  }
 0x242   : > { %v3943_v41 = vrot.slane %v3942_v54, 4  ;;  %v3965_v10 = vrot.slane %v3963_v26, 4  ;;  %v3969_v5 = vshll.u32 %v3861_v57, 16  ;;  %v7017_v61 = vcombine.low %v8232_v44, %v8233_v9  ;;  %v8188_v54 = vld [vmem:[%s8737_s4 + $0x1f0] sm:$0xff]   ;;  %v3867_v26 = vld [vmem:[#allocation2 + $0x5c] sm:$0x1] }
 0x243   : > { %7798 = vmatprep.mubr.bf16.mxu0 %v7053_v6  ;;  %v3938_v23 = vsel %vm9021_vm5, %v3933_v38, %v3937_v63  ;;  %v3956_v22 = vor.u32 %v3955_v7, %v3952_v51  ;;  %v3974_v37 = vshrl.u32 %v3862_v39, 16  ;;  %v3977_v30 = vshll.u32 %v3862_v39, 16  ;;  %v3869_v9 = vld [vmem:[#allocation2 + $0x68] sm:$0xf] }
 0x244   : > { %v3948_v14 = vsel %vm9021_vm5, %v3943_v41, %v3947_v1  ;;  %v3966_v34 = vor.u32 %v3965_v10, %v3961_v15  ;;  %v3971_v53 = vrot.slane %v3969_v5, 5  ;;  %7833 = vmatpush3.bf16.msra.mxu1 %v8172_v52  ;;  %v3983_v63 = vshll.u32 %v3863_v62, 16 }
 0x245   : > { %v7054_v33 = vcombine.low %v3938_v23, %v3948_v14  ;;  %v3957_v35 = vrot.slane %v3956_v22, 4  ;;  %v3976_v42 = vrot.slane %v3974_v37, 4  ;;  %7834 = vmatprep.subr.bf16.mxu1 %v8175_v12  ;;  %v3979_v19 = vrot.slane %v3977_v30, 5 }
 0x246   : > { %v3967_v57 = vrot.slane %v3966_v34, 4  ;;  %v3987_v11 = vshrl.u32 %v3863_v62, 16  ;;  %v3993_v50 = vshll.u32 %v3864_v32, 16  ;;  %v3985_v52 = vrot.slane %v3983_v63, 5  ;;  %v3870_v34 = vld [vmem:[#allocation2 + $0x6c] sm:$0x1] }
 0x247   : > { %7799 = vmatmul.mubr.bf16.vlgmr.msra.gmra.mxu0 %v7054_v33  ;;  %7755 = vmatmul.mubr.bf16.gmra.mxu1 %v7016_v43  ;;  %v3962_v1 = vsel %vm9021_vm5, %v3957_v35, %v3961_v15  ;;  %v7018_v17 = vcombine.low %v9343_v29, %v9349_v3  ;;  %v3998_v39 = vshrl.u32 %v3865_v8, 16  ;;  %v3980_v38 = vor.u32 %v3979_v19, %v3976_v42  ;;  %v3868_v43 = vld [vmem:[#allocation2 + $0x64] sm:$0xf]  ;;  %v9561_v41 = vpop.f32.mrf.mxu1  ;;  %v8181_v29 = vld [vmem:[%s8737_s4 + $0x198] sm:$0xff]   ;;  %v8184_v19 = vld [vmem:[%s8737_s4 + $0x190] sm:$0xff]  }
 0x248   : > { %v3972_v6 = vsel %vm9021_vm5, %v3967_v57, %v3971_v53  ;;  %7758 = vmatprep.mubr.bf16.mxu1 %v7017_v61  ;;  %v3989_v51 = vrot.slane %v3987_v11, 4  ;;  %v3995_v7 = vrot.slane %v3993_v50, 5  ;;  %7835 = vmatpush3.bf16.msra.mxu1 %v8175_v12  ;;  %v4001_v5 = vshll.u32 %v3865_v8, 16  ;;  %v8190_v61 = vld [vmem:[%s8737_s4 + $0x1e8] sm:$0xff]  }
 0x249   : > { %v7055_v15 = vcombine.low %v3962_v1, %v3972_v6  ;;  %v4000_v10 = vrot.slane %v3998_v39, 4  ;;  %v4007_v62 = vshll.u32 %v3866_v2, 16  ;;  %7836 = vmatprep.subr.bf16.mxu1 %v8178_v60  ;;  %7879 = vmatpush3.bf16.msra.mxu0 %v9388_v49  ;;  %v3981_v3 = vrot.slane %v3980_v38, 4  ;;  %v9566_v12 = vpop.f32.mrf.mxu1  ;;  %v3871_v1 = vld [vmem:[#allocation2 + $0x74] sm:$0xf] }
 0x24a   : > { %v3990_v23 = vor.u32 %v3989_v51, %v3985_v52  ;;  %v4011_v22 = vshrl.u32 %v3866_v2, 16  ;;  %v4017_v44 = vshll.u32 %v3867_v26, 16  ;;  %7880 = vmatprep.subr.bf16.mxu0 %v8188_v54  ;;  %v4003_v32 = vrot.slane %v4001_v5, 5  ;;  %v3872_v51 = vld [vmem:[#allocation2 + $0x78] sm:$0xf] }
 0x24b   : > { %7802 = vmatprep.mubr.bf16.mxu0 %v7055_v15  ;;  %v4009_v37 = vrot.slane %v4007_v62, 5  ;;  %v7019_v14 = vcombine.low %v9367_v20, %v9371_v13  ;;  %v4022_v53 = vshrl.u32 %v3868_v43, 16  ;;  %v3986_v49 = vsel %vm9021_vm5, %v3981_v3, %v3985_v52  ;;  %v9572_v35 = vpop.f32.mrf.mxu1 }
 0x24c   : > { %v3991_v30 = vrot.slane %v3990_v23, 4  ;;  %v4013_v8 = vrot.slane %v4011_v22, 4  ;;  %v4019_v33 = vrot.slane %v4017_v44, 5  ;;  %7837 = vmatpush3.bf16.msra.mxu1 %v8178_v60  ;;  %v4004_v42 = vor.u32 %v4003_v32, %v4000_v10  ;;  %v9579_v60 = vpop.f32.mrf.mxu0  ;;  %v3873_v23 = vld [vmem:[#allocation2 + $0x7c] sm:$0x1] }
 0x24d   : > { %v4024_v63 = vrot.slane %v4022_v53, 4  ;;  %v4025_v2 = vshll.u32 %v3868_v43, 16  ;;  %v4031_v57 = vshll.u32 %v3869_v9, 16  ;;  %7838 = vmatprep.subr.bf16.mxu1 %v8181_v29  ;;  %7881 = vmatpush3.bf16.msra.mxu0 %v8188_v54  ;;  %v4035_v11 = vshrl.u32 %v3869_v9, 16  ;;  %v9577_v52 = vpop.f32.mrf.mxu1  ;;  %v8193_v43 = vld [vmem:[%s8737_s4 + $0x1e0] sm:$0xff]   ;;  %v8189_v9 = vld [vmem:[%s8737_s4 + $0x188] sm:$0xff]  }
 0x24e   : > { %v3996_v20 = vsel %vm9021_vm5, %v3991_v30, %v3995_v7  ;;  %v4014_v13 = vor.u32 %v4013_v8, %v4009_v37  ;;  %v4041_v50 = vshll.u32 %v3870_v34, 16  ;;  %7882 = vmatprep.subr.bf16.mxu0 %v8190_v61  ;;  %v4005_v39 = vrot.slane %v4004_v42, 4  ;;  %v9586_v62 = vpop.f32.mrf.mxu0  ;;  %v8195_v42 = vld [vmem:[%s8737_s4 + $0x1d8] sm:$0xff]  }
 0x24f   : > { %v7056_v26 = vcombine.low %v3986_v49, %v3996_v20  ;;  %7759 = vmatmul.mubr.bf16.gmra.mxu1 %v7018_v17  ;;  %v4027_v6 = vrot.slane %v4025_v2, 5  ;;  %v4033_v38 = vrot.slane %v4031_v57, 5  ;;  %v4037_v7 = vrot.slane %v4035_v11, 4  ;;  %v9584_v5 = vpop.f32.mrf.mxu1  ;;  %v3875_v20 = vld [vmem:[#allocation2 + $0x88] sm:$0xf] }
 0x250   : > { %v4015_v54 = vrot.slane %v4014_v13, 4  ;;  %7762 = vmatprep.mubr.bf16.mxu1 %v7019_v14  ;;  %v4043_v15 = vrot.slane %v4041_v50, 5  ;;  %v7020_v10 = vcombine.low %v9392_v18, %v9397_v40  ;;  %7839 = vmatpush3.bf16.msra.mxu1 %v8181_v29  ;;  %v4010_v17 = vsel %vm9021_vm5, %v4005_v39, %v4009_v37  ;;  %v3874_v14 = vld [vmem:[#allocation2 + $0x84] sm:$0xf]  ;;  %v9595_v53 = vpop.f32.mrf.mxu0 }
 0x251   : > { %7803 = vmatmul.mubr.bf16.gmra.mxu0 %v7056_v26  ;;  %v4028_v3 = vor.u32 %v4027_v6, %v4024_v63  ;;  %v4046_v22 = vshrl.u32 %v3871_v1, 16  ;;  %v4049_v44 = vshll.u32 %v3871_v1, 16  ;;  %7840 = vmatprep.subr.bf16.mxu1 %v8184_v19  ;;  %v4038_v18 = vor.u32 %v4037_v7, %v4033_v38  ;;  %v9593_v34 = vpop.f32.mrf.mxu1  ;;  %v3876_v1 = vld [vmem:[#allocation2 + $0x8c] sm:$0x1]  ;;  %v8194_v39 = vld [vmem:[%s8737_s4 + $0x180] sm:$0xff]  }
 0x252   : > { %v4020_v32 = vsel %vm9021_vm5, %v4015_v54, %v4019_v33  ;;  %v4055_v40 = vshll.u32 %v3872_v51, 16  ;;  %v4059_v29 = vshrl.u32 %v3872_v51, 16  ;;  %7883 = vmatpush3.bf16.msra.mxu0 %v8190_v61  ;;  %v4065_v33 = vshll.u32 %v3873_v23, 16  ;;  %v9605_v6 = vpop.f32.mrf.mxu0 }
 0x253   : > { %v7057_v37 = vcombine.low %v4010_v17, %v4020_v32  ;;  %v4029_v49 = vrot.slane %v4028_v3, 4  ;;  %v4048_v30 = vrot.slane %v4046_v22, 4  ;;  %v4051_v8 = vrot.slane %v4049_v44, 5  ;;  %7884 = vmatprep.subr.bf16.mxu0 %v8193_v43  ;;  %v9598_v13 = vpop.f32.mrf.mxu1  ;;  %v3877_v17 = vld [vmem:[#allocation2 + $0x94] sm:$0xf] }
 0x254   : > { %v4039_v63 = vrot.slane %v4038_v18, 4  ;;  %v4057_v2 = vrot.slane %v4055_v40, 5  ;;  %v4061_v57 = vrot.slane %v4059_v29, 4  ;;  %7841 = vmatpush3.bf16.msra.mxu1 %v8184_v19  ;;  %v7021_v50 = vcombine.low %v9414_v4, %v9418_v36  ;;  %v8197_v22 = vld [vmem:[%s8737_s4 + $0x1d0] sm:$0xff]   ;;  %v3878_v40 = vld [vmem:[#allocation2 + $0x98] sm:$0xf] }
 0x255   : > { %7806 = vmatprep.mubr.bf16.mxu0 %v7057_v37  ;;  %v4034_v61 = vsel %vm9021_vm5, %v4029_v49, %v4033_v38  ;;  %v4052_v11 = vor.u32 %v4051_v8, %v4048_v30  ;;  %v4070_v26 = vshrl.u32 %v3874_v14, 16  ;;  %7842 = vmatprep.subr.bf16.mxu1 %v8189_v9  ;;  %v4067_v54 = vrot.slane %v4065_v33, 5  ;;  %v9609_v38 = vpop.f32.mrf.mxu1  ;;  %v9617_v49 = vld [vmem:[%s8737_s4 + $0x238] sm:$0xff]   ;;  %v3880_v33 = vld [vmem:[#allocation2 + $0xa4] sm:$0xf] }
 0x256   : > { %v4044_v19 = vsel %vm9021_vm5, %v4039_v63, %v4043_v15  ;;  %v4062_v51 = vor.u32 %v4061_v57, %v4057_v2  ;;  %v4073_v7 = vshll.u32 %v3874_v14, 16  ;;  %7885 = vmatpush3.bf16.msra.mxu0 %v8193_v43  ;;  %v4079_v23 = vshll.u32 %v3875_v20, 16  ;;  %v3879_v14 = vld [vmem:[#allocation2 + $0x9c] sm:$0x1] }
 0x257   : > { %v7058_v3 = vcombine.low %v4034_v61, %v4044_v19  ;;  %7763 = vmatmul.mubr.bf16.gmra.mxu1 %v7020_v10  ;;  %v4053_v4 = vrot.slane %v4052_v11, 4  ;;  %v4072_v36 = vrot.slane %v4070_v26, 4  ;;  %7886 = vmatprep.subr.bf16.mxu0 %v8195_v42  ;;  %v4083_v18 = vshrl.u32 %v3875_v20, 16  ;;  %v8198_v11 = vld [vmem:[%s8737_s4 + $0x1c8] sm:$0xff]  }
 0x258   : > { %v4063_v44 = vrot.slane %v4062_v51, 4  ;;  %7766 = vmatprep.mubr.bf16.mxu1 %v7021_v50  ;;  %v4075_v32 = vrot.slane %v4073_v7, 5  ;;  %v4089_v15 = vshll.u32 %v3876_v1, 16  ;;  %7843 = vmatpush3.bf16.msra.mxu1 %v8189_v9  ;;  %v4081_v29 = vrot.slane %v4079_v23, 5  ;;  %v9619_v30 = vpop.f32.mrf.mxu0 }
 0x259   : > { %7807 = vmatmul.mubr.bf16.gmra.mxu0 %v7058_v3  ;;  %v4058_v43 = vsel %vm9021_vm5, %v4053_v4, %v4057_v2  ;;  %v7022_v10 = vcombine.low %v9428_v24, %v9434_v28  ;;  %v4094_v37 = vshrl.u32 %v3877_v17, 16  ;;  %7844 = vmatprep.subr.bf16.mxu1 %v8194_v39  ;;  %v4085_v63 = vrot.slane %v4083_v18, 4 }
 0x25a   : > { %v4068_v8 = vsel %vm9021_vm5, %v4063_v44, %v4067_v54  ;;  %v4076_v9 = vor.u32 %v4075_v32, %v4072_v36  ;;  %v4091_v57 = vrot.slane %v4089_v15, 5  ;;  %7887 = vmatpush3.bf16.msra.mxu0 %v8195_v42  ;;  %v9623_v2 = vpop.f32.mrf.mxu1  ;;  %v4097_v28 = vshll.u32 %v3877_v17, 16  ;;  %v9626_v50 = vpop.f32.mrf.mxu0  ;;  %v3881_v54 = vld [vmem:[#allocation2 + $0xa8] sm:$0xf]  ;;  %v3882_v17 = vld [vmem:[#allocation2 + $0xac] sm:$0x1] }
 0x25b   : > { %v7059_v20 = vcombine.low %v4058_v43, %v4068_v8  ;;  %v4096_v24 = vrot.slane %v4094_v37, 4  ;;  %v4103_v61 = vshll.u32 %v3878_v40, 16  ;;  %7888 = vmatprep.subr.bf16.mxu0 %v8197_v22  ;;  %v4086_v26 = vor.u32 %v4085_v63, %v4081_v29 }
 0x25c   : > { %v4077_v1 = vrot.slane %v4076_v9, 4  ;;  %v4107_v19 = vshrl.u32 %v3878_v40, 16  ;;  %v4113_v51 = vshll.u32 %v3879_v14, 16  ;;  %7845 = vmatpush3.bf16.msra.mxu1 %v8194_v39  ;;  %v9628_v7 = vpop.f32.mrf.mxu1  ;;  %v4099_v42 = vrot.slane %v4097_v28, 5  ;;  %v9633_v23 = vpop.f32.mrf.mxu0  ;;  %v8201_v14 = vld [vmem:[%s8737_s4 + $0x1c0] sm:$0xff]  }
 0x25d   : > { %7810 = vmatprep.mubr.bf16.mxu0 %v7059_v20  ;;  %v4105_v3 = vrot.slane %v4103_v61, 5  ;;  %v7023_v4 = vcombine.low %v9446_v21, %v9450_v59  ;;  %v4118_v36 = vshrl.u32 %v3880_v33, 16  ;;  %7926 = vmatprep.subr.bf16.mxu1 %v9617_v49  ;;  %v4087_v32 = vrot.slane %v4086_v26, 4  ;;  %v3883_v20 = vld [vmem:[#allocation2 + $0xb4] sm:$0xf] }
 0x25e   : > { %v4082_v44 = vsel %vm9021_vm5, %v4077_v1, %v4081_v29  ;;  %v4109_v39 = vrot.slane %v4107_v19, 4  ;;  %v4115_v18 = vrot.slane %v4113_v51, 5  ;;  %7889 = vmatpush3.bf16.msra.mxu0 %v8197_v22  ;;  %v9637_v15 = vpop.f32.mrf.mxu1  ;;  %v4100_v40 = vor.u32 %v4099_v42, %v4096_v24  ;;  %v9640_v37 = vpop.f32.mrf.mxu0 }
 0x25f   : > { %7767 = vmatmul.mubr.bf16.gmra.mxu1 %v7022_v10  ;;  %v4120_v43 = vrot.slane %v4118_v36, 4  ;;  %v4121_v21 = vshll.u32 %v3880_v33, 16  ;;  %v4127_v59 = vshll.u32 %v3881_v54, 16  ;;  %7890 = vmatprep.subr.bf16.mxu0 %v8198_v11  ;;  %v4092_v8 = vsel %vm9021_vm5, %v4087_v32, %v4091_v57  ;;  %v3884_v33 = vld [vmem:[#allocation2 + $0xb8] sm:$0xf] }
 0x260   : > { %v4110_v9 = vor.u32 %v4109_v39, %v4105_v3  ;;  %7770 = vmatprep.mubr.bf16.mxu1 %v7023_v4  ;;  %v4131_v29 = vshrl.u32 %v3881_v54, 16  ;;  %v4137_v63 = vshll.u32 %v3882_v17, 16  ;;  %v9644_v22 = vpop.f32.mrf.mxu1  ;;  %v7060_v28 = vcombine.low %v4082_v44, %v4092_v8  ;;  %v3885_v4 = vld [vmem:[#allocation2 + $0xbc] sm:$0x1] }
 0x261   : > { %v4101_v10 = vrot.slane %v4100_v40, 4  ;;  %v4123_v24 = vrot.slane %v4121_v21, 5  ;;  %v4129_v61 = vrot.slane %v4127_v59, 5  ;;  %v7024_v51 = vcombine.low %v9462_v46, %v9466_v27  ;;  %v3886_v27 = vld [vmem:[#allocation2 + $0xc4] sm:$0xf] }
 0x262   : > { %v4111_v1 = vrot.slane %v4110_v9, 4  ;;  %v4133_v26 = vrot.slane %v4131_v29, 4  ;;  %v4139_v19 = vrot.slane %v4137_v63, 5  ;;  %7891 = vmatpush3.bf16.msra.mxu0 %v8198_v11  ;;  %v9648_v57 = vpop.f32.mrf.mxu1  ;;  %v4142_v17 = vshrl.u32 %v3883_v20, 16 }
 0x263   : > { %7811 = vmatmul.mubr.bf16.gmra.mxu0 %v7060_v28  ;;  %v4106_v54 = vsel %vm9021_vm5, %v4101_v10, %v4105_v3  ;;  %v4124_v42 = vor.u32 %v4123_v24, %v4120_v43  ;;  %v4145_v36 = vshll.u32 %v3883_v20, 16  ;;  %7892 = vmatprep.subr.bf16.mxu0 %v8201_v14  ;;  %v9652_v44 = vpop.f32.mrf.mxu0  ;;  %v4151_v40 = vshll.u32 %v3884_v33, 16  ;;  %v3887_v28 = vld [vmem:[#allocation2 + $0xc8] sm:$0xf] }
 0x264   : > { %v4116_v32 = vsel %vm9021_vm5, %v4111_v1, %v4115_v18  ;;  %v4134_v39 = vor.u32 %v4133_v26, %v4129_v61  ;;  %v4155_v46 = vshrl.u32 %v3884_v33, 16  ;;  %v9656_v11 = vpop.f32.mrf.mxu1  ;;  %v4144_v8 = vrot.slane %v4142_v17, 4  ;;  %v3888_v33 = vld [vmem:[#allocation2 + $0xcc] sm:$0x1] }
 0x265   : > { %v7061_v21 = vcombine.low %v4106_v54, %v4116_v32  ;;  %v4125_v59 = vrot.slane %v4124_v42, 4  ;;  %v4147_v3 = vrot.slane %v4145_v36, 5  ;;  %v9658_v43 = vpop.f32.mrf.mxu0  ;;  %v4153_v29 = vrot.slane %v4151_v40, 5  ;;  %v3889_v36 = vld [vmem:[#allocation2 + $0xd4] sm:$0xf] }
 0x266   : > { %v4135_v9 = vrot.slane %v4134_v39, 4  ;;  %v4157_v63 = vrot.slane %v4155_v46, 4  ;;  %v4161_v20 = vshll.u32 %v3885_v4, 16  ;;  %7893 = vmatpush3.bf16.msra.mxu0 %v8201_v14  ;;  %v7025_v24 = vcombine.low %v9476_v47, %v9482_v55  ;;  %v9666_v54 = vpop.f32.mrf.mxu1 }
 0x267   : > { %7814 = vmatprep.mubr.bf16.mxu0 %v7061_v21  ;;  %v4130_v18 = vsel %vm9021_vm5, %v4125_v59, %v4129_v61  ;;  %7771 = vmatmul.mubr.bf16.gmra.mxu1 %v7024_v51  ;;  %v4148_v10 = vor.u32 %v4147_v3, %v4144_v8  ;;  %v4166_v1 = vshrl.u32 %v3886_v27, 16  ;;  %v9664_v26 = vpop.f32.mrf.mxu0  ;;  %11049 = vst [vmem:[#allocation24_spill] sm:$0xff] %v9666_v54  ;;  %v4169_v17 = vshll.u32 %v3886_v27, 16  ;;  %v3890_v21 = vld [vmem:[#allocation2 + $0xd8] sm:$0xf] }
 0x268   : > { %v4140_v42 = vsel %vm9021_vm5, %v4135_v9, %v4139_v19  ;;  %v4158_v4 = vor.u32 %v4157_v63, %v4153_v29  ;;  %v4163_v14 = vrot.slane %v4161_v20, 5  ;;  %7774 = vmatprep.mubr.bf16.mxu1 %v7025_v24  ;;  %v4175_v39 = vshll.u32 %v3887_v28, 16  ;;  %v3891_v3 = vld [vmem:[#allocation2 + $0xdc] sm:$0x1]  ;;  %v9676_v63 = vpop.f32.mrf.mxu1  ;;  %v3892_v24 = vld [vmem:[#allocation2 + $0xe4] sm:$0xf] }
 0x269   : > { %v7062_v32 = vcombine.low %v4130_v18, %v4140_v42  ;;  %v4149_v61 = vrot.slane %v4148_v10, 4  ;;  %v4168_v51 = vrot.slane %v4166_v1, 4  ;;  %v4171_v47 = vrot.slane %v4169_v17, 5  ;;  %v9670_v59 = vpop.f32.mrf.mxu0  ;;  %11050 = vst [vmem:[#allocation23_spill] sm:$0xff] %v9676_v63 }
 0x26a   : > { %v4159_v40 = vrot.slane %v4158_v4, 4  ;;  %v4179_v55 = vshrl.u32 %v3887_v28, 16  ;;  %v4185_v46 = vshll.u32 %v3888_v33, 16  ;;  %v4177_v8 = vrot.slane %v4175_v39, 5 }
 0x26b   : > { %7815 = vmatmul.mubr.bf16.gmra.mxu0 %v7062_v32  ;;  %v4154_v19 = vsel %vm9021_vm5, %v4149_v61, %v4153_v29  ;;  %v7026_v27 = vcombine.low %v9492_v31, %v9498_v58  ;;  %v4190_v9 = vshrl.u32 %v3889_v36, 16  ;;  %v4172_v28 = vor.u32 %v4171_v47, %v4168_v51  ;;  %v3893_v31 = vld [vmem:[#allocation2 + $0xe8] sm:$0xf]  ;;  %v3894_v51 = vld [vmem:[#allocation2 + $0xec] sm:$0x1] }
 0x26c   : > { %v4164_v20 = vsel %vm9021_vm5, %v4159_v40, %v4163_v14  ;;  %v4181_v18 = vrot.slane %v4179_v55, 4  ;;  %v4187_v10 = vrot.slane %v4185_v46, 5  ;;  %v4193_v42 = vshll.u32 %v3889_v36, 16 }
 0x26d   : > { %v7063_v33 = vcombine.low %v4154_v19, %v4164_v20  ;;  %v4192_v1 = vrot.slane %v4190_v9, 4  ;;  %v4199_v4 = vshll.u32 %v3890_v21, 16  ;;  %v4173_v29 = vrot.slane %v4172_v28, 4  ;;  %v9680_v58 = vpop.f32.mrf.mxu0 }
 0x26e   : > { %v4182_v17 = vor.u32 %v4181_v18, %v4177_v8  ;;  %v4203_v32 = vshrl.u32 %v3890_v21, 16  ;;  %v4209_v61 = vshll.u32 %v3891_v3, 16  ;;  %v4195_v39 = vrot.slane %v4193_v42, 5  ;;  %v9684_v47 = vpop.f32.mrf.mxu1  ;;  %v3895_v42 = vld [vmem:[#allocation2 + $0xf4] sm:$0xf] }
 0x26f   : > { %7818 = vmatprep.mubr.bf16.mxu0 %v7063_v33  ;;  %7775 = vmatmul.mubr.bf16.gmra.mxu1 %v7026_v27  ;;  %v4201_v63 = vrot.slane %v4199_v4, 5  ;;  %v7027_v14 = vcombine.low %v9508_v48, %v9512_v16  ;;  %v4214_v40 = vshrl.u32 %v3892_v24, 16  ;;  %v4178_v36 = vsel %vm9021_vm5, %v4173_v29, %v4177_v8  ;;  %v9688_v19 = vpop.f32.mrf.mxu0 }
 0x270   : > { %v4183_v55 = vrot.slane %v4182_v17, 4  ;;  %v4205_v46 = vrot.slane %v4203_v32, 4  ;;  %v4211_v21 = vrot.slane %v4209_v61, 5  ;;  %v4196_v3 = vor.u32 %v4195_v39, %v4192_v1  ;;  %v9690_v28 = vpop.f32.mrf.mxu1  ;;  %v3896_v1 = vld [vmem:[#allocation2 + $0xf8] sm:$0xf] }
 0x271   : > { %7778 = vmatprep.mubr.bf16.mxu1 %v7027_v14  ;;  %v4216_v27 = vrot.slane %v4214_v40, 4  ;;  %v4217_v9 = vshll.u32 %v3892_v24, 16  ;;  %v4223_v20 = vshll.u32 %v3893_v31, 16  ;;  %v4227_v18 = vshrl.u32 %v3893_v31, 16  ;;  %v9694_v8 = vpop.f32.mrf.mxu0 }
 0x272   : > { %v4188_v48 = vsel %vm9021_vm5, %v4183_v55, %v4187_v10  ;;  %v4206_v16 = vor.u32 %v4205_v46, %v4201_v63  ;;  %v4233_v33 = vshll.u32 %v3894_v51, 16  ;;  %11051 = vst [vmem:[#allocation25_spill] sm:$0xff] %v9694_v8  ;;  %v4197_v29 = vrot.slane %v4196_v3, 4  ;;  %v9696_v61 = vpop.f32.mrf.mxu1 }
 0x273   : > { %v7064_v4 = vcombine.low %v4178_v36, %v4188_v48  ;;  %v4219_v17 = vrot.slane %v4217_v9, 5  ;;  %v4225_v32 = vrot.slane %v4223_v20, 5  ;;  %11052 = vst [vmem:[#allocation26_spill] sm:$0xff] %v9696_v61  ;;  %v4229_v39 = vrot.slane %v4227_v18, 4  ;;  %v9700_v10 = vpop.f32.mrf.mxu0  ;;  %v3897_v36 = vld [vmem:[#allocation2 + $0xfc] sm:$0x1] }
 0x274   : > { %v4207_v24 = vrot.slane %v4206_v16, 4  ;;  %v4235_v14 = vrot.slane %v4233_v33, 5  ;;  %v7028_v40 = vcombine.low %v9521_v25, %v9524_v45  ;;  %11053 = vst [vmem:[#allocation27_spill] sm:$0xff] %v9700_v10  ;;  %v4202_v31 = vsel %vm9021_vm5, %v4197_v29, %v4201_v63  ;;  %v9704_v3 = vpop.f32.mrf.mxu1  ;;  %v4608_v18 = vld [vmem:[#allocation2 + $0x20] sm:$0x8] }
 0x275   : > { %7819 = vmatmul.mubr.bf16.gmra.mxu0 %v7064_v4  ;;  %v4220_v51 = vor.u32 %v4219_v17, %v4216_v27  ;;  %v4238_v55 = vshrl.u32 %v3895_v42, 16  ;;  %v4241_v46 = vshll.u32 %v3895_v42, 16  ;;  %11054 = vst [vmem:[#allocation28_spill] sm:$0xff] %v9704_v3  ;;  %v4230_v20 = vor.u32 %v4229_v39, %v4225_v32  ;;  %v9708_v25 = vld [vmem:[#allocation2 + $0x24] sm:$0xf] }
 0x276   : > { %v4212_v9 = vsel %vm9021_vm5, %v4207_v24, %v4211_v21  ;;  %v4247_v48 = vshll.u32 %v3896_v1, 16  ;;  %v4251_v16 = vshrl.u32 %v3896_v1, 16  ;;  %v4257_v42 = vshll.u32 %v3897_v36, 16  ;;  %v9714_v1 = vld [vmem:[#allocation2 + $0x28] sm:$0xf] }
 0x277   : > { %v7065_v45 = vcombine.low %v4202_v31, %v4212_v9  ;;  %v4221_v33 = vrot.slane %v4220_v51, 4  ;;  %7779 = vmatmul.mubr.bf16.gmra.mxu1 %v7028_v40  ;;  %v4240_v4 = vrot.slane %v4238_v55, 4  ;;  %v4243_v63 = vrot.slane %v4241_v46, 5  ;;  %v3898_v51 = vld [vmem:[#allocation2 + $0x104] sm:$0xf] }
 0x278   : > { %v4231_v27 = vrot.slane %v4230_v20, 4  ;;  %v4249_v29 = vrot.slane %v4247_v48, 5  ;;  %v4253_v17 = vrot.slane %v4251_v16, 4  ;;  %v9710_v10 = vpop.f32.mrf.mxu0  ;;  %v4657_v39 = vshrl.u32 %v4608_v18, 16  ;;  %v9717_v40 = vpop.f32.mrf.mxu1 }
 0x279   : > { %7822 = vmatprep.mubr.bf16.mxu0 %v7065_v45  ;;  %v4226_v21 = vsel %vm9021_vm5, %v4221_v33, %v4225_v32  ;;  %v4244_v24 = vor.u32 %v4243_v63, %v4240_v4  ;;  %v4662_v31 = vshrl.u32 %v9708_v25, 16  ;;  %11055 = vst [vmem:[#allocation29_spill] sm:$0xff] %v9717_v40  ;;  %v4259_v36 = vrot.slane %v4257_v42, 5  ;;  %v3899_v33 = vld [vmem:[#allocation2 + $0x108] sm:$0xf] }
 0x27a   : > { %v4236_v55 = vsel %vm9021_vm5, %v4231_v27, %v4235_v14  ;;  %v4254_v46 = vor.u32 %v4253_v17, %v4249_v29  ;;  %v4665_v9 = vshll.u32 %v9708_v25, 16  ;;  %v9722_v20 = vpop.f32.mrf.mxu0  ;;  %v7077_v16 = vrot.slane %v4657_v39, 11  ;;  %v9724_v18 = vpop.f32.mrf.mxu1  ;;  %v4611_v39 = vld [vmem:[#allocation2 + $0x30] sm:$0x8]  ;;  %v9736_v40 = vld [vmem:[#allocation2 + $0x34] sm:$0xf] }
 0x27b   : > { %11056 = vst [vmem:[#allocation30_spill] sm:$0xff] %v9722_v20  ;;  %v7066_v48 = vcombine.low %v4226_v21, %v4236_v55  ;;  %v4245_v32 = vrot.slane %v4244_v24, 4  ;;  %v4664_v45 = vrot.slane %v4662_v31, 7  ;;  %11057 = vst [vmem:[#allocation31_spill] sm:$0xff] %v9724_v18  ;;  %v4671_v63 = vshrl.u32 %v9714_v1, 16 }
 0x27c   : > { %v4255_v4 = vrot.slane %v4254_v46, 4  ;;  %v4674_v3 = vshll.u32 %v9714_v1, 16  ;;  %v4262_v8 = vshrl.u32 %v3898_v51, 16  ;;  %v9728_v14 = vpop.f32.mrf.mxu0  ;;  %v3900_v21 = vld [vmem:[#allocation2 + $0x10c] sm:$0x1]  ;;  %v4265_v24 = vshll.u32 %v3898_v51, 16  ;;  %v9732_v31 = vpop.f32.mrf.mxu1 }
 0x27d   : > { %11058 = vst [vmem:[#allocation32_spill] sm:$0xff] %v9728_v14  ;;  %7823 = vmatmul.mubr.bf16.gmra.mxu0 %v7066_v48  ;;  %v4250_v27 = vsel %vm9021_vm5, %v4245_v32, %v4249_v29  ;;  %v4667_v17 = vor.u32 %v4665_v9, %v4664_v45  ;;  %v4669_v42 = vrot.slane %v4664_v45, 4  ;;  %11059 = vst [vmem:[#allocation33_spill] sm:$0xff] %v9732_v31  ;;  %v4673_v46 = vrot.slane %v4671_v63, 7  ;;  %v9742_v51 = vld [vmem:[#allocation2 + $0x38] sm:$0xf] }
 0x27e   : > { %v4260_v55 = vsel %vm9021_vm5, %v4255_v4, %v4259_v36  ;;  %v4264_v54 = vrot.slane %v4262_v8, 4  ;;  %v4271_v18 = vshll.u32 %v3899_v33, 16  ;;  %v9738_v14 = vpop.f32.mrf.mxu0  ;;  %v4267_v9 = vrot.slane %v4265_v24, 5  ;;  %v9744_v45 = vpop.f32.mrf.mxu1 }
 0x27f   : > { %11060 = vst [vmem:[#allocation34_spill] sm:$0xff] %v9738_v14  ;;  %v7067_v48 = vcombine.low %v4250_v27, %v4260_v55  ;;  %v4668_v29 = vsel %vm8938_vm2, %v7077_v16, %v4667_v17  ;;  %v4275_v32 = vshrl.u32 %v3899_v33, 16  ;;  %11061 = vst [vmem:[#allocation35_spill] sm:$0xff] %v9744_v45  ;;  %v4676_v31 = vor.u32 %v4674_v3, %v4673_v46  ;;  %v4614_v16 = vld [vmem:[#allocation2 + $0x40] sm:$0x8] }
 0x280   : > { %v4273_v61 = vrot.slane %v4271_v18, 5  ;;  %v4281_v36 = vshll.u32 %v3900_v21, 16  ;;  %v4679_v4 = vshrl.u32 %v4611_v39, 16  ;;  %v9746_v8 = vpop.f32.mrf.mxu0  ;;  %v4268_v63 = vor.u32 %v4267_v9, %v4264_v54  ;;  %v9750_v17 = vpop.f32.mrf.mxu1  ;;  %v9757_v9 = vld [vmem:[#allocation2 + $0x44] sm:$0xf] }
 0x281   : > { %7826 = vmatprep.mubr.bf16.mxu0 %v7067_v48  ;;  %v4277_v20 = vrot.slane %v4275_v32, 4  ;;  %v4684_v27 = vshrl.u32 %v9736_v40, 16  ;;  %v4687_v55 = vshll.u32 %v9736_v40, 16  ;;  %11062 = vst [vmem:[#allocation36_spill] sm:$0xff] %v9750_v17  ;;  %v4677_v33 = vsel %vm8938_vm2, %v4669_v42, %v4676_v31  ;;  %v9762_v17 = vld [vmem:[#allocation2 + $0x48] sm:$0xf] }
 0x282   : > { %v4283_v24 = vrot.slane %v4281_v36, 5  ;;  %v7078_v3 = vrot.slane %v4679_v4, 11  ;;  %v4693_v18 = vshrl.u32 %v9742_v51, 16  ;;  %v9755_v21 = vpop.f32.mrf.mxu0  ;;  %v7109_v39 = vcombine.low %v4668_v29, %v4677_v33  ;;  %v9759_v32 = vpop.f32.mrf.mxu1 }
 0x283   : > { %11063 = vst [vmem:[#allocation37_spill] sm:$0xff] %v9755_v21  ;;  %v4269_v46 = vrot.slane %v4268_v63, 4  ;;  %v4278_v54 = vor.u32 %v4277_v20, %v4273_v61  ;;  %v4686_v48 = vrot.slane %v4684_v27, 7  ;;  %11064 = vst [vmem:[#allocation38_spill] sm:$0xff] %v9759_v32  ;;  %v4696_v14 = vshll.u32 %v9742_v51, 16 }
 0x284   : > { %v4695_v45 = vrot.slane %v4693_v18, 7  ;;  %v4701_v42 = vshrl.u32 %v4614_v16, 16  ;;  %v9764_v31 = vpop.f32.mrf.mxu0  ;;  %7846 = vmatprep.mubr.bf16.mxu1 %v7109_v39  ;;  %v7149_v20 = vcombine.low %v9708_v25, %v9714_v1  ;;  %v9770_v63 = vpop.f32.mrf.mxu1  ;;  %v4706_v32 = vshrl.u32 %v9757_v9, 16  ;;  %v4617_v21 = vld [vmem:[#allocation2 + $0x50] sm:$0x8] }
 0x285   : > { %v4274_v36 = vsel %vm9021_vm5, %v4269_v46, %v4273_v61  ;;  %v4279_v29 = vrot.slane %v4278_v54, 4  ;;  %v4689_v4 = vor.u32 %v4687_v55, %v4686_v48  ;;  %11065 = vst [vmem:[#allocation39_spill] sm:$0xff] %v9770_v63  ;;  %v4691_v27 = vrot.slane %v4686_v48, 4  ;;  %v9781_v1 = vld [vmem:[#allocation2 + $0x54] sm:$0xf] }
 0x286   : > { %v4698_v33 = vor.u32 %v4696_v14, %v4695_v45  ;;  %v7079_v18 = vrot.slane %v4701_v42, 11  ;;  %v9773_v16 = vpop.f32.mrf.mxu0  ;;  %v4709_v55 = vshll.u32 %v9757_v9, 16  ;;  %v4715_v25 = vshrl.u32 %v9762_v17, 16  ;;  %v9783_v14 = vpop.f32.mrf.mxu1 }
 0x287   : > { %11066 = vst [vmem:[#allocation40_spill] sm:$0xff] %v9773_v16  ;;  %v4284_v39 = vsel %vm9021_vm5, %v4279_v29, %v4283_v24  ;;  %v4690_v61 = vsel %vm8938_vm2, %v7078_v3, %v4689_v4  ;;  %11067 = vst [vmem:[#allocation41_spill] sm:$0xff] %v9783_v14  ;;  %v4708_v54 = vrot.slane %v4706_v32, 7  ;;  %v9789_v48 = vadd.f32 %v9579_v60, %v9561_v41  ;;  %v9791_v24 = vld [vmem:[#allocation2 + $0x58] sm:$0xf]  ;;  %v8203_v16 = vld [vmem:[%s8737_s4 + $0x230] sm:$0xff]  }
 0x288   : > { %v7068_v45 = vcombine.low %v4274_v36, %v4284_v39  ;;  %v4699_v46 = vsel %vm8938_vm2, %v4691_v27, %v4698_v33  ;;  %v9793_v3 = vpop.f32.mrf.mxu0  ;;  %v4717_v29 = vrot.slane %v4715_v25, 7  ;;  %v4718_v4 = vshll.u32 %v9762_v17, 16  ;;  %v9797_v14 = vpop.f32.mrf.mxu1  ;;  %v4620_v33 = vld [vmem:[#allocation2 + $0x60] sm:$0x8]  ;;  %v9800_v41 = vld [vmem:[#allocation2 + $0x64] sm:$0xf] }
 0x289   : > { %11068 = vst [vmem:[#allocation42_spill] sm:$0xff] %v9789_v48  ;;  %v7110_v42 = vcombine.low %v4690_v61, %v4699_v46  ;;  %v4723_v0 = vshrl.u32 %v4617_v21, 16  ;;  %11069 = vst [vmem:[#allocation43_spill] sm:$0xff] %v9797_v14  ;;  %v4711_v36 = vor.u32 %v4709_v55, %v4708_v54  ;;  %v4713_v27 = vrot.slane %v4708_v54, 4 }
 0x28a   : > { %7827 = vmatmul.mubr.bf16.gmra.mxu0 %v7068_v45  ;;  %v4728_v32 = vshrl.u32 %v9781_v1, 16  ;;  %v9802_v60 = vpop.f32.mrf.mxu0  ;;  %v4720_v39 = vor.u32 %v4718_v4, %v4717_v29  ;;  %v4731_v25 = vshll.u32 %v9781_v1, 16  ;;  %v4737_v21 = vshrl.u32 %v9791_v24, 16  ;;  %v9806_v46 = vpop.f32.mrf.mxu1 }
 0x28b   : > { %7847 = vmatmul.mubr.bf16.vlgmr.msra.gmra.mxu1 %v7110_v42  ;;  %7894 = vmatprep.mubr.bf16.mxu0 %v7149_v20  ;;  %v7080_v61 = vrot.slane %v4723_v0, 11  ;;  %11070 = vst [vmem:[#allocation44_spill] sm:$0xff] %v9806_v46  ;;  %v4712_v55 = vsel %vm8938_vm2, %v7079_v18, %v4711_v36  ;;  %v4740_v54 = vshll.u32 %v9791_v24, 16  ;;  %v9814_v20 = vadd.f32 %v9586_v62, %v9566_v12  ;;  %v9816_v0 = vld [vmem:[#allocation2 + $0x68] sm:$0xf] }
 0x28c   : > { %7927 = vmatpush3.bf16.msra.mxu1 %v9617_v49  ;;  %v4730_v45 = vrot.slane %v4728_v32, 7  ;;  %v9818_v42 = vpop.f32.mrf.mxu0  ;;  %v4721_v29 = vsel %vm8938_vm2, %v4713_v27, %v4720_v39  ;;  %v4739_v4 = vrot.slane %v4737_v21, 7  ;;  %v4745_v49 = vshrl.u32 %v4620_v33, 16  ;;  %v8206_v18 = vld [vmem:[%s8737_s4 + $0x228] sm:$0xff]   ;;  %v9824_v36 = vpop.f32.mrf.mxu1  ;;  %v4623_v27 = vld [vmem:[#allocation2 + $0x70] sm:$0x8] }
 0x28d   : > { %11071 = vst [vmem:[#allocation45_spill] sm:$0xff] %v9814_v20  ;;  %11072 = vst [vmem:[#allocation46_spill] sm:$0xff] %v9818_v42  ;;  %7928 = vmatprep.subr.bf16.mxu1 %v8203_v16  ;;  %v4750_v46 = vshrl.u32 %v9800_v41, 16  ;;  %v7111_v32 = vcombine.low %v4712_v55, %v4721_v29  ;;  %v4753_v42 = vshll.u32 %v9800_v41, 16  ;;  %v4759_v63 = vshrl.u32 %v9816_v0, 16 }
 0x28e   : > { %v4733_v48 = vor.u32 %v4731_v25, %v4730_v45  ;;  %v4735_v14 = vrot.slane %v4730_v45, 4  ;;  %v9826_v12 = vpop.f32.mrf.mxu0  ;;  %v4742_v62 = vor.u32 %v4740_v54, %v4739_v4  ;;  %v9830_v39 = vpop.f32.mrf.mxu1  ;;  %v7150_v33 = vcombine.low %v9736_v40, %v9742_v51  ;;  %v9838_v55 = vld [vmem:[#allocation2 + $0x74] sm:$0xf]  ;;  %v9845_v51 = vld [vmem:[#allocation2 + $0x78] sm:$0xf] }
 0x28f   : > { %11073 = vst [vmem:[#allocation47_spill] sm:$0xff] %v9826_v12  ;;  %v4752_v20 = vrot.slane %v4750_v46, 7  ;;  %11074 = vst [vmem:[#allocation48_spill] sm:$0xff] %v9830_v39  ;;  %7850 = vmatprep.mubr.bf16.mxu1 %v7111_v32  ;;  %v7151_v25 = vcombine.low %v9757_v9, %v9762_v17  ;;  %v7081_v46 = vrot.slane %v4745_v49, 11  ;;  %v4761_v4 = vrot.slane %v4759_v63, 7 }
 0x290   : > { %v4734_v21 = vsel %vm8938_vm2, %v7080_v61, %v4733_v48  ;;  %7929 = vmatpush3.bf16.msra.mxu1 %v8203_v16  ;;  %v9840_v45 = vpop.f32.mrf.mxu0  ;;  %v4743_v54 = vsel %vm8938_vm2, %v4735_v14, %v4742_v62  ;;  %v4762_v40 = vshll.u32 %v9816_v0, 16  ;;  %v9849_v17 = vadd.f32 %v9619_v30, %v9584_v5  ;;  %v4626_v16 = vld [vmem:[#allocation2 + $0x80] sm:$0x8] }
 0x291   : > { %v4755_v29 = vor.u32 %v4753_v42, %v4752_v20  ;;  %7930 = vmatprep.subr.bf16.mxu1 %v8206_v18  ;;  %v7112_v48 = vcombine.low %v4734_v21, %v4743_v54  ;;  %v4767_v9 = vshrl.u32 %v4623_v27, 16  ;;  %v8209_v61 = vld [vmem:[%s8737_s4 + $0x220] sm:$0xff]   ;;  %v4757_v63 = vrot.slane %v4752_v20, 4  ;;  %v9871_v21 = vld [vmem:[#allocation2 + $0x88] sm:$0xf] }
 0x292   : > { %7895 = vmatmul.mubr.bf16.vlgmr.msra.gmra.mxu0 %v7150_v33  ;;  %11075 = vst [vmem:[#allocation49_spill] sm:$0xff] %v9849_v17  ;;  %v9852_v49 = vpop.f32.mrf.mxu1  ;;  %v9854_v32 = vpop.f32.mrf.mxu0  ;;  %v4764_v14 = vor.u32 %v4762_v40, %v4761_v4  ;;  %v9858_v42 = vadd.f32 %v9595_v53, %v9572_v35  ;;  %v4772_v62 = vshrl.u32 %v9838_v55, 16  ;;  %v9861_v33 = vld [vmem:[#allocation2 + $0x84] sm:$0xf]  ;;  %v9867_v30 = vadd.f32 %v9605_v6, %v9577_v52 }
 0x293   : > { %7898 = vmatprep.mubr.bf16.mxu0 %v7151_v25  ;;  %7851 = vmatmul.mubr.bf16.gmra.mxu1 %v7112_v48  ;;  %v4756_v5 = vsel %vm8938_vm2, %v7081_v46, %v4755_v29  ;;  %v4775_v20 = vshll.u32 %v9838_v55, 16  ;;  %v4781_v27 = vshrl.u32 %v9845_v51, 16  ;;  %v7082_v54 = vrot.slane %v4767_v9, 11  ;;  %v8212_v48 = vld [vmem:[%s8737_s4 + $0x218] sm:$0xff]  }
 0x294   : > { %11076 = vst [vmem:[#allocation50_spill] sm:$0xff] %v9867_v30  ;;  %v9873_v35 = vpop.f32.mrf.mxu1  ;;  %v9875_v53 = vpop.f32.mrf.mxu0  ;;  %v4765_v25 = vsel %vm8938_vm2, %v4757_v63, %v4764_v14  ;;  %v4774_v46 = vrot.slane %v4772_v62, 7  ;;  %7931 = vmatpush3.bf16.msra.mxu1 %v8206_v18  ;;  %v4789_v29 = vshrl.u32 %v4626_v16, 16  ;;  %v4784_v4 = vshll.u32 %v9845_v51, 16  ;;  %v9888_v18 = vld [vmem:[#allocation2 + $0x94] sm:$0xf] }
 0x295   : > { %v7113_v52 = vcombine.low %v4756_v5, %v4765_v25  ;;  %v4783_v6 = vrot.slane %v4781_v27, 7  ;;  %v4794_v40 = vshrl.u32 %v9861_v33, 16  ;;  %7932 = vmatprep.subr.bf16.mxu1 %v8209_v61  ;;  %v7152_v39 = vcombine.low %v9781_v1, %v9791_v24  ;;  %v4629_v27 = vld [vmem:[#allocation2 + $0x90] sm:$0x8] }
 0x296   : > { %v9882_v30 = vpop.f32.mrf.mxu0  ;;  %v4777_v12 = vor.u32 %v4775_v20, %v4774_v46  ;;  %v4797_v63 = vshll.u32 %v9861_v33, 16  ;;  %v4803_v9 = vshrl.u32 %v9871_v21, 16  ;;  %v4779_v16 = vrot.slane %v4774_v46, 4  ;;  %v9890_v25 = vpop.f32.mrf.mxu1  ;;  %v9899_v20 = vld [vmem:[#allocation2 + $0x98] sm:$0xf] }
 0x297   : > { %11077 = vst [vmem:[#allocation51_spill] sm:$0xff] %v9882_v30  ;;  %7854 = vmatprep.mubr.bf16.mxu1 %v7113_v52  ;;  %v4786_v14 = vor.u32 %v4784_v4, %v4783_v6  ;;  %v7083_v62 = vrot.slane %v4789_v29, 11  ;;  %v4796_v5 = vrot.slane %v4794_v40, 7  ;;  %v7153_v30 = vcombine.low %v9800_v41, %v9816_v0  ;;  %v4632_v40 = vld [vmem:[#allocation2 + $0xa0] sm:$0x8] }
 0x298   : > { %v4805_v17 = vrot.slane %v4803_v9, 7  ;;  %v4806_v1 = vshll.u32 %v9871_v21, 16  ;;  %v9897_v24 = vadd.f32 %v9652_v44, %v9623_v2  ;;  %7933 = vmatpush3.bf16.msra.mxu1 %v8209_v61  ;;  %v4778_v46 = vsel %vm8938_vm2, %v7082_v54, %v4777_v12  ;;  %v8215_v61 = vld [vmem:[%s8737_s4 + $0x210] sm:$0xff]   ;;  %v9917_v9 = vld [vmem:[#allocation2 + $0xa4] sm:$0xf] }
 0x299   : > { %v4787_v29 = vsel %vm8938_vm2, %v4779_v16, %v4786_v14  ;;  %v4799_v52 = vor.u32 %v4797_v63, %v4796_v5  ;;  %v4801_v41 = vrot.slane %v4796_v5, 4  ;;  %7934 = vmatprep.subr.bf16.mxu1 %v8212_v48  ;;  %v4811_v44 = vshrl.u32 %v4629_v27, 16 }
 0x29a   : > { %7899 = vmatmul.mubr.bf16.gmra.mxu0 %v7152_v39  ;;  %v9905_v0 = vpop.f32.mrf.mxu0  ;;  %v7114_v6 = vcombine.low %v4778_v46, %v4787_v29  ;;  %v4808_v2 = vor.u32 %v4806_v1, %v4805_v17  ;;  %v4816_v4 = vshrl.u32 %v9888_v18, 16  ;;  %v9911_v39 = vadd.f32 %v9626_v50, %v9593_v34 }
 0x29b   : > { %7902 = vmatprep.mubr.bf16.mxu0 %v7153_v30  ;;  %v4800_v12 = vsel %vm8938_vm2, %v7083_v62, %v4799_v52  ;;  %v4819_v54 = vshll.u32 %v9888_v18, 16  ;;  %v4825_v63 = vshrl.u32 %v9899_v20, 16  ;;  %v9919_v30 = vpop.f32.mrf.mxu1  ;;  %v7084_v34 = vrot.slane %v4811_v44, 11  ;;  %v9926_v62 = vld [vmem:[#allocation2 + $0xa8] sm:$0xf] }
 0x29c   : > { %v9921_v17 = vpop.f32.mrf.mxu0  ;;  %7855 = vmatmul.mubr.bf16.gmra.mxu1 %v7114_v6  ;;  %v4809_v16 = vsel %vm8938_vm2, %v4801_v41, %v4808_v2  ;;  %v4818_v50 = vrot.slane %v4816_v4, 7  ;;  %v4828_v14 = vshll.u32 %v9899_v20, 16  ;;  %v9930_v1 = vadd.f32 %v9658_v43, %v9628_v7  ;;  %v8218_v44 = vld [vmem:[%s8737_s4 + $0x208] sm:$0xff]  }
 0x29d   : > { %v7115_v5 = vcombine.low %v4800_v12, %v4809_v16  ;;  %v4827_v27 = vrot.slane %v4825_v63, 7  ;;  %v4833_v46 = vshrl.u32 %v4632_v40, 16  ;;  %7935 = vmatpush3.bf16.msra.mxu1 %v8212_v48  ;;  %v9936_v52 = vadd.f32 %v9633_v23, %v9598_v13  ;;  %v4635_v40 = vld [vmem:[#allocation2 + $0xb0] sm:$0x8]  ;;  %v9945_v12 = vld [vmem:[#allocation2 + $0xb4] sm:$0xf] }
 0x29e   : > { %v9932_v29 = vpop.f32.mrf.mxu0  ;;  %v7154_v41 = vcombine.low %v9838_v55, %v9845_v51  ;;  %v4821_v6 = vor.u32 %v4819_v54, %v4818_v50  ;;  %v4838_v2 = vshrl.u32 %v9917_v9, 16  ;;  %7936 = vmatprep.subr.bf16.mxu1 %v8215_v61  ;;  %v4823_v4 = vrot.slane %v4818_v50, 4  ;;  %v9951_v63 = vld [vmem:[#allocation2 + $0xb8] sm:$0xf] }
 0x29f   : > { %7858 = vmatprep.mubr.bf16.mxu1 %v7115_v5  ;;  %v4830_v7 = vor.u32 %v4828_v14, %v4827_v27  ;;  %v7155_v43 = vcombine.low %v9861_v33, %v9871_v21  ;;  %v4847_v48 = vshrl.u32 %v9926_v62, 16  ;;  %v7085_v23 = vrot.slane %v4833_v46, 11 }
 0x2a0   : > { %v9947_v13 = vpop.f32.mrf.mxu1  ;;  %v4840_v55 = vrot.slane %v4838_v2, 7  ;;  %v4841_v51 = vshll.u32 %v9917_v9, 16  ;;  %v4850_v54 = vshll.u32 %v9926_v62, 16  ;;  %v4822_v33 = vsel %vm8938_vm2, %v7084_v34, %v4821_v6  ;;  %v9963_v5 = vpop.f32.mrf.mxu0  ;;  %v9969_v6 = vld [vmem:[#allocation2 + $0xc4] sm:$0xf] }
 0x2a1   : > { %v4831_v21 = vsel %vm8938_vm2, %v4823_v4, %v4830_v7  ;;  %v4849_v16 = vrot.slane %v4847_v48, 7  ;;  %v9959_v50 = vadd.f32 %v9680_v58, %v9648_v57  ;;  %7937 = vmatpush3.bf16.msra.mxu1 %v8215_v61  ;;  %11078 = vst [vmem:[#allocation52_spill] sm:$0xff] %v9963_v5  ;;  %v9967_v27 = vadd.f32 %v9640_v37, %v9609_v38  ;;  %v8221_v2 = vld [vmem:[%s8737_s4 + $0x200] sm:$0xff]  }
 0x2a2   : > { %7903 = vmatmul.mubr.bf16.gmra.mxu0 %v7154_v41  ;;  %v9961_v14 = vpop.f32.mrf.mxu1  ;;  %v7116_v46 = vcombine.low %v4822_v33, %v4831_v21  ;;  %v4843_v34 = vor.u32 %v4841_v51, %v4840_v55  ;;  %v4855_v41 = vshrl.u32 %v4635_v40, 16  ;;  %7938 = vmatprep.subr.bf16.mxu1 %v8218_v44  ;;  %v4845_v4 = vrot.slane %v4840_v55, 4  ;;  %v4638_v7 = vld [vmem:[#allocation2 + $0xc0] sm:$0x8]  ;;  %v9978_v40 = vld [vmem:[#allocation2 + $0xc8] sm:$0xf] }
 0x2a3   : > { %11079 = vst [vmem:[#allocation53_spill] sm:$0xff] %v9967_v27  ;;  %7906 = vmatprep.mubr.bf16.mxu0 %v7155_v43  ;;  %v4852_v57 = vor.u32 %v4850_v54, %v4849_v16  ;;  %v4860_v58 = vshrl.u32 %v9945_v12, 16  ;;  %v4869_v61 = vshrl.u32 %v9951_v63, 16  ;;  %v4863_v43 = vshll.u32 %v9945_v12, 16 }
 0x2a4   : > { %7859 = vmatmul.mubr.bf16.gmra.mxu1 %v7116_v46  ;;  %v4844_v38 = vsel %vm8938_vm2, %v7085_v23, %v4843_v34  ;;  %v7086_v37 = vrot.slane %v4855_v41, 11  ;;  %v4872_v48 = vshll.u32 %v9951_v63, 16  ;;  %v9980_v51 = vpop.f32.mrf.mxu1  ;;  %v9986_v21 = vadd.f32 %v9688_v19, %v9656_v11 }
 0x2a5   : > { %v4853_v55 = vsel %vm8938_vm2, %v4845_v4, %v4852_v57  ;;  %v4862_v54 = vrot.slane %v4860_v58, 7  ;;  %v4871_v33 = vrot.slane %v4869_v61, 7  ;;  %7939 = vmatpush3.bf16.msra.mxu1 %v8218_v44  ;;  %v7156_v46 = vcombine.low %v9888_v18, %v9899_v20  ;;  %v4641_v58 = vld [vmem:[#allocation2 + $0xd0] sm:$0x8] }
 0x2a6   : > { %v9988_v23 = vpop.f32.mrf.mxu0  ;;  %v7117_v16 = vcombine.low %v4844_v38, %v4853_v55  ;;  %v4877_v34 = vshrl.u32 %v4638_v7, 16  ;;  %v4882_v41 = vshrl.u32 %v9969_v6, 16  ;;  %7940 = vmatprep.subr.bf16.mxu1 %v8221_v2  ;;  %v4891_v57 = vshrl.u32 %v9978_v40, 16  ;;  %v9997_v38 = vld [vmem:[#allocation2 + $0xd4] sm:$0xf]  ;;  %v9999_v18 = vpop.f32.mrf.mxu1 }
 0x2a7   : > { %v4865_v27 = vor.u32 %v4863_v43, %v4862_v54  ;;  %v4867_v5 = vrot.slane %v4862_v54, 4  ;;  %v4874_v4 = vor.u32 %v4872_v48, %v4871_v33  ;;  %v7157_v11 = vcombine.low %v9917_v9, %v9926_v62  ;;  %11080 = vst [vmem:[#allocation54_spill] sm:$0xff] %v9999_v18  ;;  %v10008_v62 = vld [vmem:[#allocation2 + $0xd8] sm:$0xf] }
 0x2a8   : > { %7862 = vmatprep.mubr.bf16.mxu1 %v7117_v16  ;;  %v7087_v19 = vrot.slane %v4877_v34, 11  ;;  %v4884_v44 = vrot.slane %v4882_v41, 7  ;;  %v4885_v61 = vshll.u32 %v9969_v6, 16  ;;  %v10001_v20 = vpop.f32.mrf.mxu0  ;;  %v4893_v48 = vrot.slane %v4891_v57, 7  ;;  %v4644_v34 = vld [vmem:[#allocation2 + $0xe0] sm:$0x8] }
 0x2a9   : > { %v4866_v7 = vsel %vm8938_vm2, %v7086_v37, %v4865_v27  ;;  %v4875_v43 = vsel %vm8938_vm2, %v4867_v5, %v4874_v4  ;;  %v4894_v9 = vshll.u32 %v9978_v40, 16  ;;  %7941 = vmatpush3.bf16.msra.mxu1 %v8221_v2  ;;  %v10012_v55 = vadd.f32 %v9664_v26, %v9637_v15 }
 0x2aa   : > { %7907 = vmatmul.mubr.bf16.gmra.mxu0 %v7156_v46  ;;  %v7118_v54 = vcombine.low %v4866_v7, %v4875_v43  ;;  %v4887_v33 = vor.u32 %v4885_v61, %v4884_v44  ;;  %v10016_v16 = vadd.f32 %v9710_v10, %v9684_v47  ;;  %v4889_v27 = vrot.slane %v4884_v44, 4  ;;  %v10027_v47 = vld [vmem:[#allocation2 + $0xe4] sm:$0xf]  ;;  %v10031_v4 = vpop.f32.mrf.mxu0 }
 0x2ab   : > { %7910 = vmatprep.mubr.bf16.mxu0 %v7157_v11  ;;  %v4896_v37 = vor.u32 %v4894_v9, %v4893_v48  ;;  %v4899_v5 = vshrl.u32 %v4641_v58, 16  ;;  %v4904_v46 = vshrl.u32 %v9997_v38, 16  ;;  %v10021_v2 = vadd.f32 %v9670_v59, %v9644_v22  ;;  %v10036_v11 = vld [vmem:[#allocation2 + $0xe8] sm:$0xf]  ;;  %v11083_v61 = vld [vmem:[#allocation30_spill] sm:$0xff] }
 0x2ac   : > { %11081 = vst [vmem:[#allocation55_spill] sm:$0xff] %v10016_v16  ;;  %7863 = vmatmul.mubr.bf16.gmra.mxu1 %v7118_v54  ;;  %v4888_v15 = vsel %vm8938_vm2, %v7087_v19, %v4887_v33  ;;  %v4907_v26 = vshll.u32 %v9997_v38, 16  ;;  %v4913_v41 = vshrl.u32 %v10008_v62, 16  ;;  %v4916_v59 = vshll.u32 %v10008_v62, 16 }
 0x2ad   : > { %11082 = vst [vmem:[#allocation56_spill] sm:$0xff] %v10021_v2  ;;  %v10029_v10 = vpop.f32.mrf.mxu1  ;;  %v4897_v57 = vsel %vm8938_vm2, %v4889_v27, %v4896_v37  ;;  %v7088_v58 = vrot.slane %v4899_v5, 11  ;;  %v4906_v22 = vrot.slane %v4904_v46, 7  ;;  %v10040_v7 = vadd.f32 %v11083_v61, %v9690_v28  ;;  %v4647_v37 = vld [vmem:[#allocation2 + $0xf0] sm:$0x8]  ;;  %v11089_v61 = vld [vmem:[#allocation29_spill] sm:$0xff] }
 0x2ae   : > { %v7119_v19 = vcombine.low %v4888_v15, %v4897_v57  ;;  %v4915_v44 = vrot.slane %v4913_v41, 7  ;;  %v4921_v43 = vshrl.u32 %v4644_v34, 16  ;;  %v7158_v9 = vcombine.low %v9945_v12, %v9951_v63  ;;  %v10051_v34 = vld [vmem:[#allocation2 + $0xf4] sm:$0xf]  ;;  %v10053_v41 = vpop.f32.mrf.mxu0 }
 0x2af   : > { %11084 = vst [vmem:[#allocation30_spill] sm:$0xff] %v10040_v7  ;;  %v10042_v48 = vpop.f32.mrf.mxu1  ;;  %v4909_v54 = vor.u32 %v4907_v26, %v4906_v22  ;;  %v7159_v33 = vcombine.low %v9969_v6, %v9978_v40  ;;  %v4926_v27 = vshrl.u32 %v10027_v47, 16  ;;  %v4911_v5 = vrot.slane %v4906_v22, 4  ;;  %11085 = vst [vmem:[#allocation57_spill] sm:$0xff] %v10053_v41  ;;  %v11086_v6 = vld [vmem:[#allocation26_spill] sm:$0xff]  ;;  %v11087_v40 = vld [vmem:[#allocation32_spill] sm:$0xff] }
 0x2b0   : > { %7866 = vmatprep.mubr.bf16.mxu1 %v7119_v19  ;;  %v4918_v46 = vor.u32 %v4916_v59, %v4915_v44  ;;  %v4929_v15 = vshll.u32 %v10027_v47, 16  ;;  %v4935_v28 = vshrl.u32 %v10036_v11, 16  ;;  %v7089_v12 = vrot.slane %v4921_v43, 11  ;;  %v10060_v19 = vld [vmem:[#allocation2 + $0xf8] sm:$0xf] }
 0x2b1   : > { %v4928_v63 = vrot.slane %v4926_v27, 7  ;;  %v4938_v26 = vshll.u32 %v10036_v11, 16  ;;  %v10058_v57 = vadd.f32 %v11087_v40, %v11086_v6  ;;  %v4910_v22 = vsel %vm8938_vm2, %v7088_v58, %v4909_v54 }
 0x2b2   : > { %7911 = vmatmul.mubr.bf16.gmra.mxu0 %v7158_v9  ;;  %v4919_v59 = vsel %vm8938_vm2, %v4911_v5, %v4918_v46  ;;  %v4937_v44 = vrot.slane %v4935_v28, 7  ;;  %v10068_v43 = vadd.f32 %v9746_v8, %v11089_v61  ;;  %v10070_v9 = vpop.f32.mrf.mxu1  ;;  %v7160_v6 = vcombine.low %v9997_v38, %v10008_v62  ;;  %v4650_v46 = vld [vmem:[#allocation2 + $0x100] sm:$0x8]  ;;  %v10084_v62 = vld [vmem:[#allocation2 + $0x108] sm:$0xf] }
 0x2b3   : > { %11088 = vst [vmem:[#allocation26_spill] sm:$0xff] %v10058_v57  ;;  %7914 = vmatprep.mubr.bf16.mxu0 %v7159_v33  ;;  %v7120_v27 = vcombine.low %v4910_v22, %v4919_v59  ;;  %v4931_v41 = vor.u32 %v4929_v15, %v4928_v63  ;;  %v4943_v40 = vshrl.u32 %v4647_v37, 16  ;;  %v10074_v57 = vld [vmem:[#allocation2 + $0x104] sm:$0xf]  ;;  %v4933_v58 = vrot.slane %v4928_v63, 4  ;;  %v11091_v59 = vld [vmem:[#allocation31_spill] sm:$0xff] }
 0x2b4   : > { %11090 = vst [vmem:[#allocation32_spill] sm:$0xff] %v10068_v43  ;;  %v4940_v54 = vor.u32 %v4938_v26, %v4937_v44  ;;  %v4948_v5 = vshrl.u32 %v10051_v34, 16  ;;  %v4957_v33 = vshrl.u32 %v10060_v19, 16  ;;  %v10078_v28 = vpop.f32.mrf.mxu0  ;;  %v4951_v22 = vshll.u32 %v10051_v34, 16  ;;  %v11092_v44 = vld [vmem:[#allocation37_spill] sm:$0xff] }
 0x2b5   : > { %7867 = vmatmul.mubr.bf16.gmra.mxu1 %v7120_v27  ;;  %v4932_v8 = vsel %vm8938_vm2, %v7089_v12, %v4931_v41  ;;  %v7090_v15 = vrot.slane %v4943_v40, 11  ;;  %v4960_v38 = vshll.u32 %v10060_v19, 16  ;;  %v10090_v61 = vadd.f32 %v11092_v44, %v11091_v59  ;;  %v10092_v27 = vpop.f32.mrf.mxu1 }
 0x2b6   : > { %v4941_v37 = vsel %vm8938_vm2, %v4933_v58, %v4940_v54  ;;  %v4950_v63 = vrot.slane %v4948_v5, 7  ;;  %v4959_v26 = vrot.slane %v4957_v33, 7  ;;  %11094 = vst [vmem:[#allocation31_spill] sm:$0xff] %v10092_v27  ;;  %v10094_v43 = vpop.f32.mrf.mxu0  ;;  %v7161_v12 = vcombine.low %v10027_v47, %v10036_v11  ;;  %v4653_v5 = vld [vmem:[#allocation2 + $0x110] sm:$0x8] }
 0x2b7   : > { %11093 = vst [vmem:[#allocation29_spill] sm:$0xff] %v10090_v61  ;;  %v7121_v41 = vcombine.low %v4932_v8, %v4941_v37  ;;  %v4965_v40 = vshrl.u32 %v4650_v46, 16  ;;  %v4970_v2 = vshrl.u32 %v10074_v57, 16  ;;  %v4979_v54 = vshrl.u32 %v10084_v62, 16  ;;  %v11095_v61 = vld [vmem:[#allocation33_spill] sm:$0xff] }
 0x2b8   : > { %v4953_v7 = vor.u32 %v4951_v22, %v4950_v63  ;;  %v4955_v16 = vrot.slane %v4950_v63, 4  ;;  %v4962_v58 = vor.u32 %v4960_v38, %v4959_v26  ;;  %v4973_v44 = vshll.u32 %v10074_v57, 16  ;;  %v10105_v47 = vld [vmem:[#allocation2 + $0x114] sm:$0xf]  ;;  %v10112_v38 = vld [vmem:[#allocation2 + $0x118] sm:$0xf]  ;;  %v10116_v37 = vpop.f32.mrf.mxu0 }
 0x2b9   : > { %7870 = vmatprep.mubr.bf16.mxu1 %v7121_v41  ;;  %v7091_v33 = vrot.slane %v4965_v40, 11  ;;  %v4972_v59 = vrot.slane %v4970_v2, 7  ;;  %v10103_v8 = vadd.f32 %v9764_v31, %v11095_v61  ;;  %v4981_v22 = vrot.slane %v4979_v54, 7  ;;  %11097 = vst [vmem:[#allocation33_spill] sm:$0xff] %v10116_v37  ;;  %v11098_v61 = vld [vmem:[#allocation36_spill] sm:$0xff] }
 0x2ba   : > { %7915 = vmatmul.mubr.bf16.gmra.mxu0 %v7160_v6  ;;  %v4954_v11 = vsel %vm8938_vm2, %v7090_v15, %v4953_v7  ;;  %v4963_v46 = vsel %vm8938_vm2, %v4955_v16, %v4962_v58  ;;  %v4982_v6 = vshll.u32 %v10084_v62, 16  ;;  %v10120_v41 = vadd.f32 %v9793_v3, %v11098_v61  ;;  %v5684_v40 = vld [vmem:[#allocation2 + $0x24] sm:$0xf] }
 0x2bb   : > { %11096 = vst [vmem:[#allocation37_spill] sm:$0xff] %v10103_v8  ;;  %7918 = vmatprep.mubr.bf16.mxu0 %v7161_v12  ;;  %v10114_v2 = vpop.f32.mrf.mxu1  ;;  %v7122_v31 = vcombine.low %v4954_v11, %v4963_v46  ;;  %v4975_v63 = vor.u32 %v4973_v44, %v4972_v59  ;;  %v4977_v26 = vrot.slane %v4972_v59, 4  ;;  %v7162_v16 = vcombine.low %v10051_v34, %v10060_v19  ;;  %v5685_v11 = vld [vmem:[#allocation2 + $0x28] sm:$0xf] }
 0x2bc   : > { %11099 = vst [vmem:[#allocation36_spill] sm:$0xff] %v10120_v41  ;;  %v4984_v7 = vor.u32 %v4982_v6, %v4981_v22  ;;  %v4987_v15 = vshrl.u32 %v4653_v5, 16  ;;  %v4992_v12 = vshrl.u32 %v10105_v47, 16  ;;  %v4995_v59 = vshll.u32 %v10105_v47, 16  ;;  %v5686_v22 = vld [vmem:[#allocation2 + $0x2c] sm:$0x1]  ;;  %v10136_v6 = vpop.f32.mrf.mxu0 }
 0x2bd   : > { %v10125_v58 = vpop.f32.mrf.mxu1  ;;  %7871 = vmatmul.mubr.bf16.gmra.mxu1 %v7122_v31  ;;  %v4976_v54 = vsel %vm8938_vm2, %v7091_v33, %v4975_v63  ;;  %v5001_v44 = vshrl.u32 %v10112_v38, 16  ;;  %v5004_v3 = vshll.u32 %v10112_v38, 16  ;;  %v7163_v46 = vcombine.low %v10074_v57, %v10084_v62  ;;  %11100 = vst [vmem:[#allocation58_spill] sm:$0xff] %v10136_v6  ;;  %v11101_v63 = vld [vmem:[#allocation38_spill] sm:$0xff] }
 0x2be   : > { %v4985_v34 = vsel %vm8938_vm2, %v4977_v26, %v4984_v7  ;;  %v7092_v19 = vrot.slane %v4987_v15, 11  ;;  %v4994_v5 = vrot.slane %v4992_v12, 7  ;;  %v10140_v61 = vadd.f32 %v9802_v60, %v11101_v63  ;;  %v11106_v63 = vld [vmem:[#allocation24_spill] sm:$0xff] }
 0x2bf   : > { %v7123_v31 = vcombine.low %v4976_v54, %v4985_v34  ;;  %v5003_v33 = vrot.slane %v5001_v44, 7  ;;  %v5733_v41 = vshrl.u32 %v5684_v40, 16  ;;  %v5736_v18 = vshll.u32 %v5684_v40, 16  ;;  %v10142_v26 = vpop.f32.mrf.mxu1  ;;  %v11103_v44 = vld [vmem:[#allocation39_spill] sm:$0xff]  ;;  %v11104_v34 = vld [vmem:[#allocation46_spill] sm:$0xff] }
 0x2c0   : > { %11102 = vst [vmem:[#allocation38_spill] sm:$0xff] %v10140_v61  ;;  %v4997_v8 = vor.u32 %v4995_v59, %v4994_v5  ;;  %v4999_v27 = vrot.slane %v4994_v5, 4  ;;  %v5742_v37 = vshll.u32 %v5685_v11, 16  ;;  %v5746_v62 = vshrl.u32 %v5685_v11, 16  ;;  %v5687_v40 = vld [vmem:[#allocation2 + $0x34] sm:$0xf] }
 0x2c1   : > { %7874 = vmatprep.mubr.bf16.mxu1 %v7123_v31  ;;  %v5006_v7 = vor.u32 %v5004_v3, %v5003_v33  ;;  %v5735_v57 = vrot.slane %v5733_v41, 4  ;;  %v5752_v15 = vshll.u32 %v5686_v22, 16  ;;  %v5738_v54 = vrot.slane %v5736_v18, 5  ;;  %v11107_v31 = vld [vmem:[#allocation25_spill] sm:$0xff] }
 0x2c2   : > { %7919 = vmatmul.mubr.bf16.gmra.mxu0 %v7162_v16  ;;  %v4998_v12 = vsel %vm8938_vm2, %v7092_v19, %v4997_v8  ;;  %v5744_v60 = vrot.slane %v5742_v37, 5  ;;  %v10148_v59 = vadd.f32 %v11104_v34, %v11103_v44  ;;  %v10154_v16 = vadd.f32 %v11107_v31, %v11106_v63  ;;  %v5688_v8 = vld [vmem:[#allocation2 + $0x38] sm:$0xf]  ;;  %v5689_v19 = vld [vmem:[#allocation2 + $0x3c] sm:$0x1]  ;;  %v10164_v44 = vpop.f32.mrf.mxu1  ;;  %v11111_v63 = vld [vmem:[#allocation42_spill] sm:$0xff] }
 0x2c3   : > { %7922 = vmatprep.mubr.bf16.mxu0 %v7163_v46  ;;  %v10150_v5 = vpop.f32.mrf.mxu0  ;;  %v5007_v41 = vsel %vm8938_vm2, %v4999_v27, %v5006_v7  ;;  %v5748_v3 = vrot.slane %v5746_v62, 4  ;;  %v5754_v11 = vrot.slane %v5752_v15, 5  ;;  %v5739_v37 = vor.u32 %v5738_v54, %v5735_v57  ;;  %v11108_v46 = vld [vmem:[#allocation43_spill] sm:$0xff]  ;;  %11110 = vst [vmem:[#allocation24_spill] sm:$0xff] %v10164_v44  ;;  %v5690_v54 = vld [vmem:[#allocation2 + $0x44] sm:$0xf] }
 0x2c4   : > { %11105 = vst [vmem:[#allocation39_spill] sm:$0xff] %v10148_v59  ;;  %v7124_v18 = vcombine.low %v4998_v12, %v5007_v41  ;;  %v10160_v22 = vadd.f32 %v9840_v45, %v11108_v46  ;;  %v7164_v33 = vcombine.low %v10105_v47, %v10112_v38  ;;  %v2747_v56 = vadd.f32 %v9852_v49, %v11111_v63  ;;  %v11113_v47 = vld [vmem:[#allocation44_spill] sm:$0xff]  ;;  %v5692_v63 = vld [vmem:[#allocation2 + $0x4c] sm:$0x1] }
 0x2c5   : > { %v5749_v34 = vor.u32 %v5748_v3, %v5744_v60  ;;  %v5757_v27 = vshrl.u32 %v5687_v40, 16  ;;  %v5760_v7 = vshll.u32 %v5687_v40, 16  ;;  %v5740_v62 = vrot.slane %v5739_v37, 4  ;;  %v10168_v31 = vpop.f32.mrf.mxu0  ;;  %v5691_v3 = vld [vmem:[#allocation2 + $0x48] sm:$0xf] }
 0x2c6   : > { %11109 = vst [vmem:[#allocation46_spill] sm:$0xff] %v10160_v22  ;;  %7875 = vmatmul.mubr.bf16.gmra.mxu1 %v7124_v18  ;;  %v5766_v15 = vshll.u32 %v5688_v8, 16  ;;  %v5770_v12 = vshrl.u32 %v5688_v8, 16  ;;  %v5776_v57 = vshll.u32 %v5689_v19, 16  ;;  %11112 = vst [vmem:[#allocation25_spill] sm:$0xff] %v10168_v31  ;;  %v10172_v38 = vadd.f32 %v9854_v32, %v11113_v47  ;;  %v11116_v31 = vld [vmem:[#allocation45_spill] sm:$0xff] }
 0x2c7   : > { %v5750_v45 = vrot.slane %v5749_v34, 4  ;;  %v5759_v41 = vrot.slane %v5757_v27, 4  ;;  %v5762_v46 = vrot.slane %v5760_v7, 5  ;;  %v5745_v49 = vsel %vm9021_vm5, %v5740_v62, %v5744_v60  ;;  %v10180_v22 = vpop.f32.mrf.mxu0 }
 0x2c8   : > { %11114 = vst [vmem:[#allocation43_spill] sm:$0xff] %v10172_v38  ;;  %v5768_v40 = vrot.slane %v5766_v15, 5  ;;  %v5772_v18 = vrot.slane %v5770_v12, 4  ;;  %v5778_v37 = vrot.slane %v5776_v57, 5  ;;  %v10176_v8 = vpop.f32.mrf.mxu1  ;;  %v5781_v27 = vshrl.u32 %v5690_v54, 16 }
 0x2c9   : > { %v5755_v19 = vsel %vm9021_vm5, %v5750_v45, %v5754_v11  ;;  %v5763_v34 = vor.u32 %v5762_v46, %v5759_v41  ;;  %v5784_v7 = vshll.u32 %v5690_v54, 16  ;;  %v5790_v47 = vshll.u32 %v5691_v3, 16  ;;  %v11117_v54 = vld [vmem:[#allocation23_spill] sm:$0xff] }
 0x2ca   : > { %7923 = vmatmul.mubr.bf16.gmra.mxu0 %v7164_v33  ;;  %v7189_v6 = vcombine.low %v5745_v49, %v5755_v19  ;;  %v5773_v32 = vor.u32 %v5772_v18, %v5768_v40  ;;  %v5794_v38 = vshrl.u32 %v5691_v3, 16  ;;  %v5783_v62 = vrot.slane %v5781_v27, 4  ;;  %v10184_v33 = vpop.f32.mrf.mxu1  ;;  %v11118_v45 = vld [vmem:[#allocation27_spill] sm:$0xff]  ;;  %v5695_v19 = vld [vmem:[#allocation2 + $0x5c] sm:$0x1]  ;;  %v11121_v27 = vld [vmem:[#allocation28_spill] sm:$0xff] }
 0x2cb   : > { %v5764_v60 = vrot.slane %v5763_v34, 4  ;;  %v5786_v15 = vrot.slane %v5784_v7, 5  ;;  %v5800_v12 = vshll.u32 %v5692_v63, 16  ;;  %v5792_v59 = vrot.slane %v5790_v47, 5  ;;  %v5694_v63 = vld [vmem:[#allocation2 + $0x58] sm:$0xf]  ;;  %v10200_v34 = vpop.f32.mrf.mxu0 }
 0x2cc   : > { %7942 = vmatprep.mubr.bf16.mxu1 %v7189_v6  ;;  %v5774_v57 = vrot.slane %v5773_v32, 4  ;;  %v5796_v61 = vrot.slane %v5794_v38, 4  ;;  %v2745_v11 = vadd.f32 %v9873_v35, %v11116_v31  ;;  %v10188_v41 = vadd.f32 %v11118_v45, %v11117_v54  ;;  %v5693_v6 = vld [vmem:[#allocation2 + $0x54] sm:$0xf]  ;;  %11120 = vst [vmem:[#allocation44_spill] sm:$0xff] %v10200_v34 }
 0x2cd   : > { %v5769_v46 = vsel %vm9021_vm5, %v5764_v60, %v5768_v40  ;;  %v5787_v3 = vor.u32 %v5786_v15, %v5783_v62  ;;  %v10194_v49 = vadd.f32 %v9875_v53, %v9824_v36  ;;  %v5802_v35 = vrot.slane %v5800_v12, 5  ;;  %v11122_v40 = vld [vmem:[#allocation34_spill] sm:$0xff]  ;;  %v5697_v45 = vld [vmem:[#allocation2 + $0x68] sm:$0xf] }
 0x2ce   : > { %11119 = vst [vmem:[#allocation42_spill] sm:$0xff] %v10188_v41  ;;  %v5779_v38 = vsel %vm9021_vm5, %v5774_v57, %v5778_v37  ;;  %v5797_v18 = vor.u32 %v5796_v61, %v5792_v59  ;;  %v2748_v31 = vadd.f32 %v9890_v25, %v9858_v42  ;;  %v10204_v7 = vadd.f32 %v11122_v40, %v11121_v27  ;;  %v11123_v37 = vld [vmem:[#allocation49_spill] sm:$0xff]  ;;  %v5696_v42 = vld [vmem:[#allocation2 + $0x64] sm:$0xf]  ;;  %v10211_v25 = vpop.f32.mrf.mxu1 }
 0x2cf   : > { %v7190_v32 = vcombine.low %v5769_v46, %v5779_v38  ;;  %v5788_v36 = vrot.slane %v5787_v3, 4  ;;  %v10207_v53 = vadd.f32 %v9905_v0, %v2747_v56  ;;  %v2751_v61 = vadd.f32 %v9947_v13, %v11123_v37  ;;  %v5698_v3 = vld [vmem:[#allocation2 + $0x6c] sm:$0x1] }
 0x2d0   : > { %v5798_v47 = vrot.slane %v5797_v18, 4  ;;  %v5805_v60 = vshrl.u32 %v5693_v6, 16  ;;  %v5808_v62 = vshll.u32 %v5693_v6, 16  ;;  %v5814_v12 = vshll.u32 %v5694_v63, 16 }
 0x2d1   : > { %7943 = vmatmul.mubr.bf16.vlgmr.msra.gmra.mxu1 %v7190_v32  ;;  %v5793_v15 = vsel %vm9021_vm5, %v5788_v36, %v5792_v59  ;;  %v5818_v57 = vshrl.u32 %v5694_v63, 16  ;;  %v5824_v54 = vshll.u32 %v5695_v19, 16  ;;  %v10218_v13 = vadd.f32 %v9921_v17, %v2745_v11  ;;  %v10222_v36 = vpop.f32.mrf.mxu1 }
 0x2d2   : > { %v5803_v0 = vsel %vm9021_vm5, %v5798_v47, %v5802_v35  ;;  %v5807_v56 = vrot.slane %v5805_v60, 4  ;;  %v5810_v46 = vrot.slane %v5808_v62, 5  ;;  %v5816_v18 = vrot.slane %v5814_v12, 5 }
 0x2d3   : > { %v10220_v6 = vpop.f32.mrf.mxu0  ;;  %v7191_v38 = vcombine.low %v5793_v15, %v5803_v0  ;;  %v5820_v27 = vrot.slane %v5818_v57, 4  ;;  %v5826_v40 = vrot.slane %v5824_v54, 5  ;;  %v5829_v32 = vshrl.u32 %v5696_v42, 16  ;;  %v11124_v57 = vld [vmem:[#allocation35_spill] sm:$0xff]  ;;  %v11125_v54 = vld [vmem:[#allocation40_spill] sm:$0xff] }
 0x2d4   : > { %v5811_v59 = vor.u32 %v5810_v46, %v5807_v56  ;;  %v5832_v63 = vshll.u32 %v5696_v42, 16  ;;  %v5838_v19 = vshll.u32 %v5697_v45, 16  ;;  %v5842_v47 = vshrl.u32 %v5697_v45, 16  ;;  %v5699_v45 = vld [vmem:[#allocation2 + $0x74] sm:$0xf] }
 0x2d5   : > { %7946 = vmatprep.mubr.bf16.mxu1 %v7191_v38  ;;  %v5821_v35 = vor.u32 %v5820_v27, %v5816_v18  ;;  %v5848_v37 = vshll.u32 %v5698_v3, 16  ;;  %v2749_v17 = vadd.f32 %v9961_v14, %v9911_v39  ;;  %v10226_v11 = vpop.f32.mrf.mxu0  ;;  %v5831_v62 = vrot.slane %v5829_v32, 4  ;;  %v11126_v3 = vld [vmem:[#allocation41_spill] sm:$0xff]  ;;  %v11127_v38 = vld [vmem:[#allocation47_spill] sm:$0xff] }
 0x2d6   : > { %v5812_v60 = vrot.slane %v5811_v59, 4  ;;  %v5834_v15 = vrot.slane %v5832_v63, 5  ;;  %v5840_v12 = vrot.slane %v5838_v19, 5  ;;  %v10230_v0 = vadd.f32 %v11125_v54, %v11124_v57  ;;  %v5700_v32 = vld [vmem:[#allocation2 + $0x78] sm:$0xf] }
 0x2d7   : > { %v5822_v42 = vrot.slane %v5821_v35, 4  ;;  %v5844_v56 = vrot.slane %v5842_v47, 4  ;;  %v10233_v46 = vadd.f32 %v9932_v29, %v2748_v31  ;;  %v10237_v27 = vadd.f32 %v11127_v38, %v11126_v3  ;;  %v5701_v47 = vld [vmem:[#allocation2 + $0x7c] sm:$0x1]  ;;  %v10250_v57 = vpop.f32.mrf.mxu0 }
 0x2d8   : > { %v5835_v39 = vor.u32 %v5834_v15, %v5831_v62  ;;  %v5850_v14 = vrot.slane %v5848_v37, 5  ;;  %v2752_v59 = vadd.f32 %v9980_v51, %v9936_v52  ;;  %v5817_v19 = vsel %vm9021_vm5, %v5812_v60, %v5816_v18  ;;  %v5702_v60 = vld [vmem:[#allocation2 + $0x84] sm:$0xf] }
 0x2d9   : > { %v10241_v63 = vpop.f32.mrf.mxu1  ;;  %v5827_v29 = vsel %vm9021_vm5, %v5822_v42, %v5826_v40  ;;  %v5845_v31 = vor.u32 %v5844_v56, %v5840_v12  ;;  %v10248_v35 = vadd.f32 %v9988_v23, %v2751_v61  ;;  %v2755_v52 = vadd.f32 %v10029_v10, %v9897_v24  ;;  %v5703_v56 = vld [vmem:[#allocation2 + $0x88] sm:$0xf] }
 0x2da   : > { %v7192_v37 = vcombine.low %v5817_v19, %v5827_v29  ;;  %v5836_v62 = vrot.slane %v5835_v39, 4  ;;  %v5853_v51 = vshrl.u32 %v5699_v45, 16  ;;  %v5856_v54 = vshll.u32 %v5699_v45, 16  ;;  %v10263_v19 = vpop.f32.mrf.mxu0 }
 0x2db   : > { %v5846_v15 = vrot.slane %v5845_v31, 4  ;;  %v5862_v3 = vshll.u32 %v5700_v32, 16  ;;  %v5866_v18 = vshrl.u32 %v5700_v32, 16  ;;  %v10254_v38 = vpop.f32.mrf.mxu1  ;;  %v5872_v40 = vshll.u32 %v5701_v47, 16  ;;  %v5704_v32 = vld [vmem:[#allocation2 + $0x8c] sm:$0x1] }
 0x2dc   : > { %7947 = vmatmul.mubr.bf16.gmra.mxu1 %v7192_v37  ;;  %v5841_v23 = vsel %vm9021_vm5, %v5836_v62, %v5840_v12  ;;  %v5855_v61 = vrot.slane %v5853_v51, 4  ;;  %v10259_v42 = vadd.f32 %v10001_v20, %v2749_v17  ;;  %v5858_v10 = vrot.slane %v5856_v54, 5 }
 0x2dd   : > { %v5851_v24 = vsel %vm9021_vm5, %v5846_v15, %v5850_v14  ;;  %v5864_v45 = vrot.slane %v5862_v3, 5  ;;  %v5868_v39 = vrot.slane %v5866_v18, 4  ;;  %v5874_v31 = vrot.slane %v5872_v40, 5  ;;  %v10265_v20 = vpop.f32.mrf.mxu1 }
 0x2de   : > { %11128 = vst [vmem:[#allocation22_spill] sm:$0xff] %v10259_v42  ;;  %v7193_v29 = vcombine.low %v5841_v23, %v5851_v24  ;;  %v5877_v37 = vshrl.u32 %v5702_v60, 16  ;;  %v5880_v34 = vshll.u32 %v5702_v60, 16  ;;  %v5859_v12 = vor.u32 %v5858_v10, %v5855_v61  ;;  %v11129_v60 = vld [vmem:[#allocation48_spill] sm:$0xff]  ;;  %v11130_v61 = vld [vmem:[#allocation51_spill] sm:$0xff] }
 0x2df   : > { %v5869_v62 = vor.u32 %v5868_v39, %v5864_v45  ;;  %v5886_v47 = vshll.u32 %v5703_v56, 16  ;;  %v5890_v51 = vshrl.u32 %v5703_v56, 16  ;;  %v5896_v14 = vshll.u32 %v5704_v32, 16  ;;  %v5705_v39 = vld [vmem:[#allocation2 + $0x94] sm:$0xf] }
 0x2e0   : > { %7950 = vmatprep.mubr.bf16.mxu1 %v7193_v29  ;;  %v5879_v17 = vrot.slane %v5877_v37, 4  ;;  %v5882_v41 = vrot.slane %v5880_v34, 5  ;;  %v2753_v15 = vadd.f32 %v10042_v48, %v9930_v1  ;;  %v5860_v54 = vrot.slane %v5859_v12, 4  ;;  %v5706_v37 = vld [vmem:[#allocation2 + $0x98] sm:$0xf] }
 0x2e1   : > { %v5870_v3 = vrot.slane %v5869_v62, 4  ;;  %v5888_v18 = vrot.slane %v5886_v47, 5  ;;  %v5892_v23 = vrot.slane %v5890_v51, 4  ;;  %v10273_v24 = vadd.f32 %v11130_v61, %v11129_v60  ;;  %v5707_v12 = vld [vmem:[#allocation2 + $0x9c] sm:$0x1]  ;;  %v10284_v62 = vpop.f32.mrf.mxu1 }
 0x2e2   : > { %v10269_v40 = vpop.f32.mrf.mxu0  ;;  %v5883_v56 = vor.u32 %v5882_v41, %v5879_v17  ;;  %v10276_v10 = vadd.f32 %v10031_v4, %v2752_v59  ;;  %v2756_v34 = vadd.f32 %v10070_v9, %v10012_v55  ;;  %v5865_v1 = vsel %vm9021_vm5, %v5860_v54, %v5864_v45  ;;  %v11132_v41 = vld [vmem:[#allocation50_spill] sm:$0xff]  ;;  %v5709_v60 = vld [vmem:[#allocation2 + $0xa8] sm:$0xf] }
 0x2e3   : > { %v5875_v48 = vsel %vm9021_vm5, %v5870_v3, %v5874_v31  ;;  %v5893_v32 = vor.u32 %v5892_v23, %v5888_v18  ;;  %v5898_v29 = vrot.slane %v5896_v14, 5  ;;  %v2746_v4 = vadd.f32 %v9919_v30, %v11132_v41  ;;  %v5708_v17 = vld [vmem:[#allocation2 + $0xa4] sm:$0xf] }
 0x2e4   : > { %11131 = vst [vmem:[#allocation45_spill] sm:$0xff] %v10276_v10  ;;  %v7194_v59 = vcombine.low %v5865_v1, %v5875_v48  ;;  %v5884_v47 = vrot.slane %v5883_v56, 4  ;;  %v10289_v55 = vadd.f32 %v10078_v28, %v2755_v52  ;;  %v2759_v45 = vadd.f32 %v10114_v2, %v9959_v50  ;;  %v10293_v14 = vpop.f32.mrf.mxu0  ;;  %v5710_v2 = vld [vmem:[#allocation2 + $0xac] sm:$0x1] }
 0x2e5   : > { %v5894_v9 = vrot.slane %v5893_v32, 4  ;;  %v5901_v51 = vshrl.u32 %v5705_v39, 16  ;;  %v5904_v31 = vshll.u32 %v5705_v39, 16  ;;  %v5910_v3 = vshll.u32 %v5706_v37, 16 }
 0x2e6   : > { %11133 = vst [vmem:[#allocation23_spill] sm:$0xff] %v10289_v55  ;;  %7951 = vmatmul.mubr.bf16.gmra.mxu1 %v7194_v59  ;;  %v5889_v54 = vsel %vm9021_vm5, %v5884_v47, %v5888_v18  ;;  %v5914_v30 = vshrl.u32 %v5706_v37, 16  ;;  %v5920_v23 = vshll.u32 %v5707_v12, 16  ;;  %v10300_v50 = vadd.f32 %v10094_v43, %v2753_v15  ;;  %v10304_v59 = vpop.f32.mrf.mxu0  ;;  %v11145_v55 = vld [vmem:[#allocation56_spill] sm:$0xff] }
 0x2e7   : > { %v5899_v28 = vsel %vm9021_vm5, %v5894_v9, %v5898_v29  ;;  %v5903_v52 = vrot.slane %v5901_v51, 4  ;;  %v5906_v61 = vrot.slane %v5904_v31, 5  ;;  %v10302_v56 = vpop.f32.mrf.mxu1  ;;  %v5912_v1 = vrot.slane %v5910_v3, 5 }
 0x2e8   : > { %11134 = vst [vmem:[#allocation27_spill] sm:$0xff] %v10300_v50  ;;  %v7195_v39 = vcombine.low %v5889_v54, %v5899_v28  ;;  %v5916_v48 = vrot.slane %v5914_v30, 4  ;;  %v5922_v32 = vrot.slane %v5920_v23, 5  ;;  %v5925_v41 = vshrl.u32 %v5708_v17, 16  ;;  %v11135_v30 = vld [vmem:[#allocation52_spill] sm:$0xff] }
 0x2e9   : > { %v5907_v18 = vor.u32 %v5906_v61, %v5903_v52  ;;  %v5928_v37 = vshll.u32 %v5708_v17, 16  ;;  %v5934_v12 = vshll.u32 %v5709_v60, 16  ;;  %v5938_v47 = vshrl.u32 %v5709_v60, 16  ;;  %v10308_v15 = vpop.f32.mrf.mxu1  ;;  %v11136_v52 = vld [vmem:[#allocation33_spill] sm:$0xff] }
 0x2ea   : > { %7954 = vmatprep.mubr.bf16.mxu1 %v7195_v39  ;;  %v5917_v29 = vor.u32 %v5916_v48, %v5912_v1  ;;  %v5944_v9 = vshll.u32 %v5710_v2, 16  ;;  %v2757_v43 = vadd.f32 %v10125_v58, %v9986_v21  ;;  %v5927_v31 = vrot.slane %v5925_v41, 4  ;;  %v5711_v39 = vld [vmem:[#allocation2 + $0xb4] sm:$0xf]  ;;  %v11138_v60 = vld [vmem:[#allocation53_spill] sm:$0xff]  ;;  %v11139_v2 = vld [vmem:[#allocation54_spill] sm:$0xff] }
 0x2eb   : > { %v5908_v51 = vrot.slane %v5907_v18, 4  ;;  %v5930_v54 = vrot.slane %v5928_v37, 5  ;;  %v5936_v3 = vrot.slane %v5934_v12, 5  ;;  %v10311_v23 = vadd.f32 %v11135_v30, %v2746_v4  ;;  %v5712_v41 = vld [vmem:[#allocation2 + $0xb8] sm:$0xf]  ;;  %v10322_v37 = vpop.f32.mrf.mxu0  ;;  %v10331_v30 = vpop.f32.mrf.mxu1 }
 0x2ec   : > { %v5918_v17 = vrot.slane %v5917_v29, 4  ;;  %v5940_v28 = vrot.slane %v5938_v47, 4  ;;  %v10314_v61 = vadd.f32 %v11136_v52, %v2756_v34  ;;  %v10318_v48 = vadd.f32 %v11139_v2, %v11138_v60  ;;  %v5713_v47 = vld [vmem:[#allocation2 + $0xbc] sm:$0x1] }
 0x2ed   : > { %v5931_v21 = vor.u32 %v5930_v54, %v5927_v31  ;;  %v5946_v58 = vrot.slane %v5944_v9, 5  ;;  %v2760_v18 = vadd.f32 %v10142_v26, %v10154_v16  ;;  %v5913_v4 = vsel %vm9021_vm5, %v5908_v51, %v5912_v1  ;;  %v11141_v54 = vld [vmem:[#allocation55_spill] sm:$0xff]  ;;  %v5714_v51 = vld [vmem:[#allocation2 + $0xc4] sm:$0xf] }
 0x2ee   : > { %11137 = vst [vmem:[#allocation28_spill] sm:$0xff] %v10314_v61  ;;  %v5923_v34 = vsel %vm9021_vm5, %v5918_v17, %v5922_v32  ;;  %v5941_v12 = vor.u32 %v5940_v28, %v5936_v3  ;;  %v10329_v29 = vadd.f32 %v10150_v5, %v2759_v45  ;;  %v2763_v26 = vadd.f32 %v10176_v8, %v11141_v54  ;;  %v11142_v17 = vld [vmem:[#allocation25_spill] sm:$0xff]  ;;  %v10344_v54 = vpop.f32.mrf.mxu1 }
 0x2ef   : > { %v7196_v9 = vcombine.low %v5913_v4, %v5923_v34  ;;  %v5932_v31 = vrot.slane %v5931_v21, 4  ;;  %v5949_v16 = vshrl.u32 %v5711_v39, 16  ;;  %v5952_v60 = vshll.u32 %v5711_v39, 16  ;;  %v5715_v4 = vld [vmem:[#allocation2 + $0xc8] sm:$0xf] }
 0x2f0   : > { %11140 = vst [vmem:[#allocation34_spill] sm:$0xff] %v10329_v29  ;;  %v5942_v52 = vrot.slane %v5941_v12, 4  ;;  %v5958_v2 = vshll.u32 %v5712_v41, 16  ;;  %v5962_v1 = vshrl.u32 %v5712_v41, 16  ;;  %v5968_v45 = vshll.u32 %v5713_v47, 16 }
 0x2f1   : > { %7955 = vmatmul.mubr.bf16.gmra.mxu1 %v7196_v9  ;;  %v5937_v32 = vsel %vm9021_vm5, %v5932_v31, %v5936_v3  ;;  %v5951_v5 = vrot.slane %v5949_v16, 4  ;;  %v10338_v28 = vadd.f32 %v11142_v17, %v2757_v43  ;;  %v5954_v34 = vrot.slane %v5952_v60, 5  ;;  %v5716_v41 = vld [vmem:[#allocation2 + $0xcc] sm:$0x1] }
 0x2f2   : > { %v10340_v21 = vpop.f32.mrf.mxu0  ;;  %v5947_v8 = vsel %vm9021_vm5, %v5942_v52, %v5946_v58  ;;  %v5960_v39 = vrot.slane %v5958_v2, 5  ;;  %v5964_v12 = vrot.slane %v5962_v1, 4  ;;  %v5970_v29 = vrot.slane %v5968_v45, 5  ;;  %v11144_v52 = vld [vmem:[#allocation30_spill] sm:$0xff] }
 0x2f3   : > { %11143 = vst [vmem:[#allocation49_spill] sm:$0xff] %v10338_v28  ;;  %v7197_v9 = vcombine.low %v5937_v32, %v5947_v8  ;;  %v5973_v3 = vshrl.u32 %v5714_v51, 16  ;;  %v5976_v31 = vshll.u32 %v5714_v51, 16  ;;  %v5955_v43 = vor.u32 %v5954_v34, %v5951_v5  ;;  %v11146_v5 = vld [vmem:[#allocation31_spill] sm:$0xff] }
 0x2f4   : > { %v10346_v47 = vpop.f32.mrf.mxu0  ;;  %v5965_v16 = vor.u32 %v5964_v12, %v5960_v39  ;;  %v5982_v17 = vshll.u32 %v5715_v4, 16  ;;  %v5986_v28 = vshrl.u32 %v5715_v4, 16  ;;  %v5992_v58 = vshll.u32 %v5716_v41, 16  ;;  %v11148_v41 = vld [vmem:[#allocation26_spill] sm:$0xff] }
 0x2f5   : > { %7958 = vmatprep.mubr.bf16.mxu1 %v7197_v9  ;;  %v5975_v61 = vrot.slane %v5973_v3, 4  ;;  %v5978_v50 = vrot.slane %v5976_v31, 5  ;;  %v2761_v60 = vadd.f32 %v10184_v33, %v11144_v52  ;;  %v5956_v1 = vrot.slane %v5955_v43, 4  ;;  %v5717_v33 = vld [vmem:[#allocation2 + $0xd4] sm:$0xf] }
 0x2f6   : > { %v10350_v2 = vpop.f32.mrf.mxu0  ;;  %v5966_v32 = vrot.slane %v5965_v16, 4  ;;  %v5984_v45 = vrot.slane %v5982_v17, 5  ;;  %v5988_v8 = vrot.slane %v5986_v28, 4  ;;  %v10356_v34 = vadd.f32 %v11146_v5, %v11145_v55  ;;  %v5718_v16 = vld [vmem:[#allocation2 + $0xd8] sm:$0xf]  ;;  %v11150_v52 = vld [vmem:[#allocation32_spill] sm:$0xff] }
 0x2f7   : > { %v10352_v51 = vpop.f32.mrf.mxu1  ;;  %v5979_v4 = vor.u32 %v5978_v50, %v5975_v61  ;;  %v10359_v12 = vadd.f32 %v10180_v22, %v2760_v18  ;;  %v2764_v9 = vadd.f32 %v10211_v25, %v11148_v41  ;;  %v5961_v3 = vsel %vm9021_vm5, %v5956_v1, %v5960_v39  ;;  %v5719_v17 = vld [vmem:[#allocation2 + $0xdc] sm:$0x1] }
 0x2f8   : > { %v5971_v28 = vsel %vm9021_vm5, %v5966_v32, %v5970_v29  ;;  %v5989_v31 = vor.u32 %v5988_v8, %v5984_v45  ;;  %v5994_v43 = vrot.slane %v5992_v58, 5  ;;  %v10369_v50 = vpop.f32.mrf.mxu0  ;;  %v2762_v25 = vadd.f32 %v10222_v36, %v10204_v7  ;;  %v5720_v32 = vld [vmem:[#allocation2 + $0xe4] sm:$0xf]  ;;  %v5721_v7 = vld [vmem:[#allocation2 + $0xe8] sm:$0xf] }
 0x2f9   : > { %11147 = vst [vmem:[#allocation35_spill] sm:$0xff] %v10359_v12  ;;  %v10367_v55 = vpop.f32.mrf.mxu1  ;;  %v7198_v22 = vcombine.low %v5961_v3, %v5971_v28  ;;  %v5980_v61 = vrot.slane %v5979_v4, 4  ;;  %v10374_v18 = vadd.f32 %v10220_v6, %v2763_v26  ;;  %v2767_v29 = vadd.f32 %v10241_v63, %v11150_v52 }
 0x2fa   : > { %v5990_v39 = vrot.slane %v5989_v31, 4  ;;  %v5997_v1 = vshrl.u32 %v5717_v33, 16  ;;  %v6000_v58 = vshll.u32 %v5717_v33, 16  ;;  %v6006_v4 = vshll.u32 %v5718_v16, 16  ;;  %v5722_v33 = vld [vmem:[#allocation2 + $0xec] sm:$0x1] }
 0x2fb   : > { %11149 = vst [vmem:[#allocation40_spill] sm:$0xff] %v10374_v18  ;;  %v10378_v8 = vpop.f32.mrf.mxu1  ;;  %7959 = vmatmul.mubr.bf16.gmra.mxu1 %v7198_v22  ;;  %v5985_v5 = vsel %vm9021_vm5, %v5980_v61, %v5984_v45  ;;  %v6010_v41 = vshrl.u32 %v5718_v16, 16  ;;  %v6016_v3 = vshll.u32 %v5719_v17, 16  ;;  %v10385_v63 = vadd.f32 %v10226_v11, %v2761_v60 }
 0x2fc   : > { %v5995_v6 = vsel %vm9021_vm5, %v5990_v39, %v5994_v43  ;;  %v5999_v36 = vrot.slane %v5997_v1, 4  ;;  %v6002_v26 = vrot.slane %v6000_v58, 5  ;;  %v6008_v52 = vrot.slane %v6006_v4, 5  ;;  %v11152_v1 = vld [vmem:[#allocation29_spill] sm:$0xff] }
 0x2fd   : > { %11151 = vst [vmem:[#allocation41_spill] sm:$0xff] %v10385_v63  ;;  %v10387_v28 = vpop.f32.mrf.mxu1  ;;  %v10389_v31 = vpop.f32.mrf.mxu0  ;;  %v7199_v22 = vcombine.low %v5985_v5, %v5995_v6  ;;  %v6012_v45 = vrot.slane %v6010_v41, 4  ;;  %v6018_v61 = vrot.slane %v6016_v3, 5  ;;  %v6021_v17 = vshrl.u32 %v5720_v32, 16 }
 0x2fe   : > { %v6003_v16 = vor.u32 %v6002_v26, %v5999_v36  ;;  %v6024_v18 = vshll.u32 %v5720_v32, 16  ;;  %v6030_v12 = vshll.u32 %v5721_v7, 16  ;;  %v6034_v60 = vshrl.u32 %v5721_v7, 16 }
 0x2ff   : > { %v10391_v10 = vpop.f32.mrf.mxu1  ;;  %v10393_v43 = vpop.f32.mrf.mxu0  ;;  %7962 = vmatprep.mubr.bf16.mxu1 %v7199_v22  ;;  %v6013_v11 = vor.u32 %v6012_v45, %v6008_v52  ;;  %v6040_v39 = vshll.u32 %v5722_v33, 16  ;;  %v2765_v58 = vadd.f32 %v10254_v38, %v11152_v1  ;;  %v6023_v5 = vrot.slane %v6021_v17, 4  ;;  %v5723_v22 = vld [vmem:[#allocation2 + $0xf4] sm:$0xf]  ;;  %v11153_v38 = vld [vmem:[#allocation37_spill] sm:$0xff] }
 0x300   : > { %v6004_v63 = vrot.slane %v6003_v16, 4  ;;  %v6026_v4 = vrot.slane %v6024_v18, 5  ;;  %v6032_v41 = vrot.slane %v6030_v12, 5  ;;  %v6036_v36 = vrot.slane %v6034_v60, 4  ;;  %v5724_v18 = vld [vmem:[#allocation2 + $0xf8] sm:$0xf] }
 0x301   : > { %v10397_v3 = vpop.f32.mrf.mxu1  ;;  %v10399_v6 = vpop.f32.mrf.mxu0  ;;  %v6014_v32 = vrot.slane %v6013_v11, 4  ;;  %v6042_v26 = vrot.slane %v6040_v39, 5  ;;  %v10402_v42 = vadd.f32 %v10250_v57, %v2764_v9  ;;  %v2768_v45 = vadd.f32 %v10265_v20, %v11153_v38 }
 0x302   : > { %v6009_v7 = vsel %vm9021_vm5, %v6004_v63, %v6008_v52  ;;  %v6027_v33 = vor.u32 %v6026_v4, %v6023_v5  ;;  %v10409_v12 = vadd.f32 %v10263_v19, %v2762_v25  ;;  %v6037_v9 = vor.u32 %v6036_v36, %v6032_v41  ;;  %v5725_v52 = vld [vmem:[#allocation2 + $0xfc] sm:$0x1]  ;;  %v11156_v19 = vld [vmem:[#allocation36_spill] sm:$0xff]  ;;  %v5727_v36 = vld [vmem:[#allocation2 + $0x108] sm:$0xf] }
 0x303   : > { %v10411_v16 = vpop.f32.mrf.mxu1  ;;  %v10413_v17 = vpop.f32.mrf.mxu0  ;;  %v6019_v57 = vsel %vm9021_vm5, %v6014_v32, %v6018_v61  ;;  %v2766_v11 = vadd.f32 %v10284_v62, %v10230_v0  ;;  %v10420_v63 = vadd.f32 %v10269_v40, %v2767_v29  ;;  %v2771_v25 = vadd.f32 %v10302_v56, %v11156_v19  ;;  %v5726_v32 = vld [vmem:[#allocation2 + $0x104] sm:$0xf] }
 0x304   : > { %11154 = vst [vmem:[#allocation47_spill] sm:$0xff] %v10409_v12  ;;  %v7200_v20 = vcombine.low %v6009_v7, %v6019_v57  ;;  %v6028_v60 = vrot.slane %v6027_v33, 4  ;;  %v6045_v39 = vshrl.u32 %v5723_v22, 16  ;;  %v6038_v5 = vrot.slane %v6037_v9, 4  ;;  %v5728_v9 = vld [vmem:[#allocation2 + $0x10c] sm:$0x1] }
 0x305   : > { %11155 = vst [vmem:[#allocation48_spill] sm:$0xff] %v10420_v63  ;;  %v10424_v1 = vpop.f32.mrf.mxu1  ;;  %v6048_v4 = vshll.u32 %v5723_v22, 16  ;;  %v6054_v38 = vshll.u32 %v5724_v18, 16  ;;  %v6058_v61 = vshrl.u32 %v5724_v18, 16  ;;  %v6064_v62 = vshll.u32 %v5725_v52, 16 }
 0x306   : > { %7963 = vmatmul.mubr.bf16.gmra.mxu1 %v7200_v20  ;;  %v6033_v0 = vsel %vm9021_vm5, %v6028_v60, %v6032_v41  ;;  %v6047_v40 = vrot.slane %v6045_v39, 4  ;;  %v10429_v29 = vadd.f32 %v10293_v14, %v2765_v58  ;;  %v6043_v22 = vsel %vm9021_vm5, %v6038_v5, %v6042_v26  ;;  %v11160_v5 = vld [vmem:[#allocation38_spill] sm:$0xff] }
 0x307   : > { %v10431_v7 = vpop.f32.mrf.mxu0  ;;  %v10433_v56 = vpop.f32.mrf.mxu1  ;;  %v6050_v33 = vrot.slane %v6048_v4, 5  ;;  %v6056_v18 = vrot.slane %v6054_v38, 5  ;;  %v6060_v57 = vrot.slane %v6058_v61, 4  ;;  %v7201_v20 = vcombine.low %v6033_v0, %v6043_v22 }
 0x308   : > { %11157 = vst [vmem:[#allocation51_spill] sm:$0xff] %v10429_v29  ;;  %11158 = vst [vmem:[#allocation50_spill] sm:$0xff] %v10431_v7  ;;  %v6066_v19 = vrot.slane %v6064_v62, 5  ;;  %v6069_v41 = vshrl.u32 %v5726_v32, 16  ;;  %v6072_v60 = vshll.u32 %v5726_v32, 16  ;;  %v6078_v7 = vshll.u32 %v5727_v36, 16 }
 0x309   : > { %v10437_v52 = vpop.f32.mrf.mxu0  ;;  %v10439_v14 = vpop.f32.mrf.mxu1  ;;  %v6051_v58 = vor.u32 %v6050_v33, %v6047_v40  ;;  %v6061_v39 = vor.u32 %v6060_v57, %v6056_v18  ;;  %v6082_v29 = vshrl.u32 %v5727_v36, 16  ;;  %7966 = vmatprep.mubr.bf16.mxu1 %v7201_v20  ;;  %v6088_v26 = vshll.u32 %v5728_v9, 16  ;;  %v11161_v36 = vld [vmem:[#allocation39_spill] sm:$0xff]  ;;  %v5729_v9 = vld [vmem:[#allocation2 + $0x114] sm:$0xf] }
 0x30a   : > { %11159 = vst [vmem:[#allocation52_spill] sm:$0xff] %v10437_v52  ;;  %v6071_v63 = vrot.slane %v6069_v41, 4  ;;  %v6074_v12 = vrot.slane %v6072_v60, 5  ;;  %v2769_v4 = vadd.f32 %v10308_v15, %v11160_v5  ;;  %v6080_v62 = vrot.slane %v6078_v7, 5 }
 0x30b   : > { %v10443_v38 = vpop.f32.mrf.mxu0  ;;  %v10445_v61 = vpop.f32.mrf.mxu1  ;;  %v6052_v32 = vrot.slane %v6051_v58, 4  ;;  %v6062_v0 = vrot.slane %v6061_v39, 4  ;;  %v6084_v22 = vrot.slane %v6082_v29, 4  ;;  %v6090_v40 = vrot.slane %v6088_v26, 5 }
 0x30c   : > { %v6075_v52 = vor.u32 %v6074_v12, %v6071_v63  ;;  %v10448_v33 = vadd.f32 %v10304_v59, %v2768_v45  ;;  %v2772_v57 = vadd.f32 %v10331_v30, %v11161_v36  ;;  %v10461_v12 = vadd.f32 %v10322_v37, %v2766_v11  ;;  %v5730_v59 = vld [vmem:[#allocation2 + $0x118] sm:$0xf]  ;;  %v5731_v45 = vld [vmem:[#allocation2 + $0x11c] sm:$0x1] }
 0x30d   : > { %v10452_v20 = vpop.f32.mrf.mxu0  ;;  %v10454_v15 = vpop.f32.mrf.mxu1  ;;  %v6057_v41 = vsel %vm9021_vm5, %v6052_v32, %v6056_v18  ;;  %v6067_v7 = vsel %vm9021_vm5, %v6062_v0, %v6066_v19  ;;  %v6085_v29 = vor.u32 %v6084_v22, %v6080_v62  ;;  %v2770_v30 = vadd.f32 %v10344_v54, %v10237_v27  ;;  %v11162_v18 = vld [vmem:[#allocation46_spill] sm:$0xff] }
 0x30e   : > { %v7202_v63 = vcombine.low %v6057_v41, %v6067_v7  ;;  %v6076_v60 = vrot.slane %v6075_v52, 4  ;;  %v10466_v58 = vadd.f32 %v10340_v21, %v2771_v25  ;;  %v2775_v5 = vadd.f32 %v10352_v51, %v11162_v18 }
 0x30f   : > { %v7760_v39 = vpop.f32.mrf.mxu1  ;;  %v6086_v26 = vrot.slane %v6085_v29, 4  ;;  %v6093_v19 = vshrl.u32 %v5729_v9, 16  ;;  %v6096_v32 = vshll.u32 %v5729_v9, 16  ;;  %v6102_v11 = vshll.u32 %v5730_v59, 16 }
 0x310   : > { %7967 = vmatmul.mubr.bf16.gmra.mxu1 %v7202_v63  ;;  %v6081_v37 = vsel %vm9021_vm5, %v6076_v60, %v6080_v62  ;;  %v6106_v0 = vshrl.u32 %v5730_v59, 16  ;;  %v6112_v52 = vshll.u32 %v5731_v45, 16  ;;  %v10477_v36 = vadd.f32 %v10346_v47, %v2769_v4  ;;  %v11163_v45 = vld [vmem:[#allocation43_spill] sm:$0xff] }
 0x311   : > { %v10472_v22 = vpop.f32.mrf.mxu0  ;;  %v3726_v27 = vpop.f32.mrf.mxu1  ;;  %v6091_v21 = vsel %vm9021_vm5, %v6086_v26, %v6090_v40  ;;  %v6095_v54 = vrot.slane %v6093_v19, 4  ;;  %v6098_v25 = vrot.slane %v6096_v32, 5  ;;  %v6104_v9 = vrot.slane %v6102_v11, 5  ;;  %v11167_v11 = vld [vmem:[#allocation42_spill] sm:$0xff] }
 0x312   : > { %v7203_v51 = vcombine.low %v6081_v37, %v6091_v21  ;;  %v6108_v41 = vrot.slane %v6106_v0, 4  ;;  %v6114_v7 = vrot.slane %v6112_v52, 5  ;;  %v2773_v63 = vadd.f32 %v10367_v55, %v11163_v45  ;;  %v11168_v0 = vld [vmem:[#allocation24_spill] sm:$0xff]  ;;  %v11169_v52 = vld [vmem:[#allocation45_spill] sm:$0xff]  ;;  %v11171_v21 = vld [vmem:[#allocation27_spill] sm:$0xff] }
 0x313   : > { %v10479_v29 = vpop.f32.mrf.mxu0  ;;  %v7761_v62 = vpop.f32.mrf.mxu1  ;;  %v6099_v59 = vor.u32 %v6098_v25, %v6095_v54  ;;  %v10484_v60 = vadd.f32 %v10350_v2, %v2772_v57  ;;  %v2776_v40 = vadd.f32 %v10378_v8, %v10194_v49  ;;  %v10489_v4 = vadd.f32 %v10369_v50, %v2770_v30  ;;  %v11166_v30 = vld [vmem:[#allocation22_spill] sm:$0xff] }
 0x314   : > { %7970 = vmatprep.mubr.bf16.mxu1 %v7203_v51  ;;  %v6109_v47 = vor.u32 %v6108_v41, %v6104_v9  ;;  %v2774_v26 = vadd.f32 %v10387_v28, %v10273_v24  ;;  %v10494_v18 = vadd.f32 %v10389_v31, %v2775_v5  ;;  %v10500_v2 = vadd.f32 %v10391_v10, %v10207_v53  ;;  %v11172_v51 = vld [vmem:[#allocation44_spill] sm:$0xff] }
 0x315   : > { %v10496_v19 = vpop.f32.mrf.mxu0  ;;  %v3729_v55 = vpop.f32.mrf.mxu1  ;;  %v6100_v32 = vrot.slane %v6099_v59, 4  ;;  %v10503_v49 = vadd.f32 %v10393_v43, %v2773_v63  ;;  %v10507_v50 = vadd.f32 %v10397_v3, %v10218_v13  ;;  %v10510_v24 = vadd.f32 %v10399_v6, %v2776_v40  ;;  %v11164_v43 = vld [vmem:[#allocation57_spill] sm:$0xff]  ;;  %v11165_v6 = vld [vmem:[#allocation58_spill] sm:$0xff]  ;;  %v11173_v41 = vld [vmem:[#allocation28_spill] sm:$0xff] }
 0x316   : > { %v6110_v8 = vrot.slane %v6109_v47, 4  ;;  %v10514_v28 = vadd.f32 %v10411_v16, %v10233_v46  ;;  %v10517_v31 = vadd.f32 %v10413_v17, %v2774_v26  ;;  %v3472_v57 = vadd.f32 %v11164_v43, %v10318_v48  ;;  %v11174_v63 = vld [vmem:[#allocation34_spill] sm:$0xff] }
 0x317   : > { %v10519_v53 = vpop.f32.mrf.mxu0  ;;  %v7764_v10 = vpop.f32.mrf.mxu1  ;;  %v6105_v13 = vsel %vm9021_vm5, %v6100_v32, %v6104_v9  ;;  %v10527_v3 = vadd.f32 %v10424_v1, %v10311_v23  ;;  %v10531_v46 = vadd.f32 %v10433_v56, %v10248_v35  ;;  %v3476_v16 = vadd.f32 %v11165_v6, %v10356_v34  ;;  %v11170_v34 = vld [vmem:[#allocation23_spill] sm:$0xff] }
 0x318   : > { %v6115_v17 = vsel %vm9021_vm5, %v6110_v8, %v6114_v7  ;;  %v10539_v48 = vadd.f32 %v10439_v14, %v11166_v30  ;;  %v2758_v23 = vadd.f32 %v11168_v0, %v11167_v11  ;;  %v10545_v35 = vadd.f32 %v10445_v61, %v11169_v52  ;;  %v11179_v52 = vld [vmem:[#allocation47_spill] sm:$0xff] }
 0x319   : > { %v7808_v5 = vpop.f32.mrf.mxu0  ;;  %v3742_v37 = vpop.f32.mrf.mxu1  ;;  %v7204_v1 = vcombine.low %v6105_v13, %v6115_v17  ;;  %v10548_v56 = vadd.f32 %v10454_v15, %v3472_v57  ;;  %v3831_v44 = vadd.f32 %v7760_v39, %v11170_v34  ;;  %v3829_v54 = vadd.f32 %v3726_v27, %v11171_v21  ;;  %v11175_v15 = vld [vmem:[#allocation49_spill] sm:$0xff]  ;;  %v11176_v27 = vld [vmem:[#allocation35_spill] sm:$0xff] }
 0x31a   : > { %v3480_v9 = vadd.f32 %v11172_v51, %v2758_v23  ;;  %v3832_v7 = vadd.f32 %v7761_v62, %v11173_v41  ;;  %v3830_v59 = vadd.f32 %v3729_v55, %v3476_v16  ;;  %v3835_v61 = vadd.f32 %v7764_v10, %v11174_v63  ;;  %v11177_v62 = vld [vmem:[#allocation40_spill] sm:$0xff]  ;;  %v11178_v17 = vld [vmem:[#allocation41_spill] sm:$0xff] }
 0x31b   : > { %v4480_v25 = vpop.f32.mrf.mxu0  ;;  %v7765_v14 = vpop.f32.mrf.mxu1  ;;  %7971 = vmatmul.mubr.bf16.gmra.mxu1 %v7204_v1  ;;  %v10554_v45 = vadd.f32 %v7808_v5, %v3831_v44  ;;  %v3833_v47 = vadd.f32 %v3742_v37, %v11175_v15 }
 0x31c   : > { %v10557_v40 = vadd.f32 %v4480_v25, %v3829_v54  ;;  %v3836_v8 = vadd.f32 %v7765_v14, %v11176_v27  ;;  %v11180_v25 = vld [vmem:[#allocation48_spill] sm:$0xff] }
 0x31d   : > { %v7809_v26 = vpop.f32.mrf.mxu0  ;;  %v3745_v39 = vpop.f32.mrf.mxu1 }
 0x31e   : > { %v10560_v32 = vadd.f32 %v7809_v26, %v3832_v7  ;;  %v3834_v43 = vadd.f32 %v3745_v39, %v3480_v9  ;;  %v11181_v7 = vld [vmem:[#allocation51_spill] sm:$0xff] }
 0x31f   : > { %v4483_v57 = vpop.f32.mrf.mxu0  ;;  %v7768_v13 = vpop.f32.mrf.mxu1 }
 0x320   : > { %v10563_v6 = vadd.f32 %v4483_v57, %v3830_v59  ;;  %v3839_v55 = vadd.f32 %v7768_v13, %v11177_v62 }
 0x321   : > { %v3758_v16 = vpop.f32.mrf.mxu1 }
 0x322   : > { %v3837_v10 = vadd.f32 %v3758_v16, %v11178_v17 }
 0x323   : > { %v7812_v30 = vpop.f32.mrf.mxu0  ;;  %v7769_v5 = vpop.f32.mrf.mxu1 }
 0x324   : > { %v10567_v11 = vadd.f32 %v7812_v30, %v3835_v61  ;;  %v3840_v37 = vadd.f32 %v7769_v5, %v10402_v42 }
 0x325   : > { %v4496_v0 = vpop.f32.mrf.mxu0  ;;  %v3761_v23 = vpop.f32.mrf.mxu1 }
 0x326   : > { %v10570_v1 = vadd.f32 %v4496_v0, %v3833_v47  ;;  %v3838_v34 = vadd.f32 %v3761_v23, %v11179_v52 }
 0x327   : > { %v7813_v44 = vpop.f32.mrf.mxu0  ;;  %v7772_v21 = vpop.f32.mrf.mxu1 }
 0x328   : > { %v10573_v54 = vadd.f32 %v7813_v44, %v3836_v8  ;;  %v3843_v14 = vadd.f32 %v7772_v21, %v11180_v25 }
 0x329   : > { %v4499_v51 = vpop.f32.mrf.mxu0  ;;  %v3774_v9 = vpop.f32.mrf.mxu1 }
 0x32a   : > { %v10576_v41 = vadd.f32 %v4499_v51, %v3834_v43  ;;  %v3841_v59 = vadd.f32 %v3774_v9, %v11181_v7 }
 0x32b   : > { %v7816_v63 = vpop.f32.mrf.mxu0  ;;  %v7773_v42 = vpop.f32.mrf.mxu1 }
 0x32c   : > { %v10579_v61 = vadd.f32 %v7816_v63, %v3839_v55  ;;  %v3844_v15 = vadd.f32 %v7773_v42, %v10448_v33 }
 0x32d   : > { %v4512_v47 = vpop.f32.mrf.mxu0  ;;  %v3777_v26 = vpop.f32.mrf.mxu1 }
 0x32e   : > { %v10582_v39 = vadd.f32 %v4512_v47, %v3837_v10  ;;  %v3842_v27 = vadd.f32 %v3777_v26, %v10461_v12 }
 0x32f   : > { %v7817_v8 = vpop.f32.mrf.mxu0  ;;  %v7776_v57 = vpop.f32.mrf.mxu1 }
 0x330   : > { %v10585_v13 = vadd.f32 %v7817_v8, %v3840_v37  ;;  %v3847_v43 = vadd.f32 %v7776_v57, %v10466_v58 }
 0x331   : > { %v4515_v62 = vpop.f32.mrf.mxu0  ;;  %v3790_v16 = vpop.f32.mrf.mxu1 }
 0x332   : > { %v10588_v17 = vadd.f32 %v4515_v62, %v3838_v34  ;;  %v3845_v55 = vadd.f32 %v3790_v16, %v10477_v36 }
 0x333   : > { %v7777_v30 = vpop.f32.mrf.mxu1 }
 0x334   : > { %v3848_v33 = vadd.f32 %v7777_v30, %v10484_v60 }
 0x335   : > { %v7820_v5 = vpop.f32.mrf.mxu0  ;;  %v3793_v10 = vpop.f32.mrf.mxu1 }
 0x336   : > { %v10592_v0 = vadd.f32 %v7820_v5, %v3843_v14  ;;  %v3846_v12 = vadd.f32 %v3793_v10, %v10489_v4 }
 0x337   : > { %v4528_v23 = vpop.f32.mrf.mxu0  ;;  %v7780_v37 = vpop.f32.mrf.mxu1 }
 0x338   : > { %v10595_v52 = vadd.f32 %v4528_v23, %v3841_v59  ;;  %v3851_v58 = vadd.f32 %v7780_v37, %v10494_v18 }
 0x339   : > { %v7821_v44 = vpop.f32.mrf.mxu0  ;;  %v3806_v34 = vpop.f32.mrf.mxu1 }
 0x33a   : > { %v10598_v21 = vadd.f32 %v7821_v44, %v3844_v15  ;;  %v3849_v36 = vadd.f32 %v3806_v34, %v10503_v49 }
 0x33b   : > { %v4531_v25 = vpop.f32.mrf.mxu0  ;;  %v7781_v60 = vpop.f32.mrf.mxu1 }
 0x33c   : > { %v10601_v51 = vadd.f32 %v4531_v25, %v3842_v27  ;;  %v3852_v14 = vadd.f32 %v7781_v60, %v10510_v24 }
 0x33d   : > { %v7824_v9 = vpop.f32.mrf.mxu0  ;;  %v3809_v4 = vpop.f32.mrf.mxu1 }
 0x33e   : > { %v10604_v7 = vadd.f32 %v7824_v9, %v3847_v43  ;;  %v3850_v59 = vadd.f32 %v3809_v4, %v10517_v31 }
 0x33f   : > { %v4544_v63 = vpop.f32.mrf.mxu0 }
 0x340   : > { %v10607_v18 = vadd.f32 %v4544_v63, %v3845_v55 }
 0x341   : > { %v7825_v42 = vpop.f32.mrf.mxu0 }
 0x342   : > { %v10609_v15 = vadd.f32 %v7825_v42, %v3848_v33 }
 0x343   : > { %v4547_v47 = vpop.f32.mrf.mxu0 }
 0x344   : > { %v10611_v49 = vadd.f32 %v4547_v47, %v3846_v12 }
 0x34a   : > { %v7828_v26 = vpop.f32.mrf.mxu0 }
 0x34b   : > { %v10613_v27 = vadd.f32 %v7828_v26, %v3851_v58  ;;  %v10615_v8 = vpop.f32.mrf.mxu1 }
 0x34c   : > { %v4560_v24 = vpop.f32.mrf.mxu0 }
 0x34d   : > { %v10617_v57 = vadd.f32 %v4560_v24, %v3849_v36  ;;  %v10619_v43 = vpop.f32.mrf.mxu1 }
 0x34e   : > { %v7829_v31 = vpop.f32.mrf.mxu0 }
 0x34f   : > { %v10621_v62 = vadd.f32 %v7829_v31, %v3852_v14  ;;  %v10623_v16 = vpop.f32.mrf.mxu1 }
 0x350   : > { %v4563_v55 = vpop.f32.mrf.mxu0 }
 0x351   : > { %v10625_v30 = vadd.f32 %v4563_v55, %v3850_v59  ;;  %v10627_v33 = vpop.f32.mrf.mxu1 }
 0x352   : > { %v7896_v25 = vpop.f32.mrf.mxu0 }
 0x353   : > { %v10629_v5 = vpop.f32.mrf.mxu1 }
 0x354   : > { %v5525_v59 = vpop.f32.mrf.mxu0 }
 0x355   : > { %v10631_v10 = vpop.f32.mrf.mxu1 }
 0x356   : > { %v7897_v47 = vpop.f32.mrf.mxu0 }
 0x357   : > { %v10633_v12 = vpop.f32.mrf.mxu1 }
 0x358   : > { %v5528_v31 = vpop.f32.mrf.mxu0 }
 0x359   : > { %v10635_v23 = vpop.f32.mrf.mxu1 }
 0x35c   : > { %v7856_v37 = vpop.f32.mrf.mxu1 }
 0x35d   : > { %v10638_v58 = vadd.f32 %v7856_v37, %v10554_v45 }
 0x35e   : > { %v5203_v44 = vpop.f32.mrf.mxu1 }
 0x35f   : > { %v10641_v34 = vadd.f32 %v5203_v44, %v10557_v40  ;;  %v10667_v44 = vpop.f32.mrf.mxu0 }
 0x360   : > { %v7857_v36 = vpop.f32.mrf.mxu1 }
 0x361   : > { %v10644_v60 = vadd.f32 %v7857_v36, %v10560_v32 }
 0x362   : > { %v5206_v14 = vpop.f32.mrf.mxu1 }
 0x363   : > { %v10647_v9 = vadd.f32 %v5206_v14, %v10563_v6 }
 0x364   : > { %v7860_v4 = vpop.f32.mrf.mxu1 }
 0x365   : > { %v10650_v63 = vadd.f32 %v7860_v4, %v10567_v11 }
 0x366   : > { %v5219_v45 = vpop.f32.mrf.mxu1 }
 0x367   : > { %v10653_v42 = vadd.f32 %v5219_v45, %v10570_v1 }
 0x368   : > { %v7861_v40 = vpop.f32.mrf.mxu1 }
 0x369   : > { %v10656_v26 = vadd.f32 %v7861_v40, %v10573_v54 }
 0x36a   : > { %v5222_v32 = vpop.f32.mrf.mxu1 }
 0x36b   : > { %v10659_v24 = vadd.f32 %v5222_v32, %v10576_v41  ;;  %v10675_v41 = vpop.f32.mrf.mxu0 }
 0x36c   : > { %v7864_v6 = vpop.f32.mrf.mxu1 }
 0x36d   : > { %v10662_v55 = vadd.f32 %v7864_v6, %v10579_v61  ;;  %v10683_v40 = vpop.f32.mrf.mxu0 }
 0x36e   : > { %v5235_v11 = vpop.f32.mrf.mxu1 }
 0x36f   : > { %v10665_v37 = vadd.f32 %v5235_v11, %v10582_v39  ;;  %v10691_v11 = vpop.f32.mrf.mxu0 }
 0x370   : > { %v7865_v1 = vpop.f32.mrf.mxu1 }
 0x371   : > { %v10670_v36 = vadd.f32 %v7865_v1, %v10585_v13 }
 0x372   : > { %v5238_v54 = vpop.f32.mrf.mxu1 }
 0x373   : > { %v10673_v14 = vadd.f32 %v5238_v54, %v10588_v17 }
 0x375   : > { %v7868_v4 = vpop.f32.mrf.mxu1 }
 0x376   : > { %v10678_v61 = vadd.f32 %v7868_v4, %v10592_v0  ;;  %v10699_v4 = vpop.f32.mrf.mxu0 }
 0x377   : > { %v5251_v45 = vpop.f32.mrf.mxu1 }
 0x378   : > { %v10681_v39 = vadd.f32 %v5251_v45, %v10595_v52 }
 0x379   : > { %v7869_v32 = vpop.f32.mrf.mxu1 }
 0x37a   : > { %v10686_v13 = vadd.f32 %v7869_v32, %v10598_v21 }
 0x37b   : > { %v5254_v6 = vpop.f32.mrf.mxu1 }
 0x37c   : > { %v10689_v17 = vadd.f32 %v5254_v6, %v10601_v51  ;;  %v10707_v6 = vpop.f32.mrf.mxu0 }
 0x37d   : > { %v7872_v1 = vpop.f32.mrf.mxu1 }
 0x37e   : > { %11182 = vst [vmem:[#allocation33_spill] sm:$0xff] %v10689_v17  ;;  %v10694_v0 = vadd.f32 %v7872_v1, %v10604_v7 }
 0x37f   : > { %v5267_v54 = vpop.f32.mrf.mxu1 }
 0x380   : > { %v10697_v52 = vadd.f32 %v5267_v54, %v10607_v18  ;;  %v10712_v18 = vpop.f32.mrf.mxu0 }
 0x381   : > { %v7873_v45 = vpop.f32.mrf.mxu1 }
 0x382   : > { %11183 = vst [vmem:[#allocation53_spill] sm:$0xff] %v10697_v52  ;;  %v10702_v21 = vadd.f32 %v7873_v45, %v10609_v15 }
 0x383   : > { %v5270_v32 = vpop.f32.mrf.mxu1 }
 0x384   : > { %11184 = vst [vmem:[#allocation54_spill] sm:$0xff] %v10702_v21  ;;  %v10705_v51 = vadd.f32 %v5270_v32, %v10611_v49  ;;  %v11188_v49 = vld [vmem:[#allocation50_spill] sm:$0xff] }
 0x385   : > { %v4577_v45 = vadd.f32 %v11188_v49, %v10500_v2 }
 0x386   : > { %11185 = vst [vmem:[#allocation55_spill] sm:$0xff] %v10705_v51  ;;  %v7876_v17 = vpop.f32.mrf.mxu1  ;;  %v10722_v51 = vpop.f32.mrf.mxu0 }
 0x387   : > { %v10710_v7 = vadd.f32 %v7876_v17, %v10613_v27  ;;  %v11190_v17 = vld [vmem:[#allocation52_spill] sm:$0xff]  ;;  %v5300_v21 = vadd.f32 %v10615_v8, %v4577_v45 }
 0x388   : > { %v5283_v1 = vpop.f32.mrf.mxu1 }
 0x389   : > { %11186 = vst [vmem:[#allocation25_spill] sm:$0xff] %v10710_v7  ;;  %v10715_v54 = vadd.f32 %v5283_v1, %v10617_v57  ;;  %v4575_v7 = vadd.f32 %v11190_v17, %v10507_v50  ;;  %v4578_v57 = vadd.f32 %v10443_v38, %v10514_v28  ;;  %v10733_v1 = vpop.f32.mrf.mxu0  ;;  %v4576_v50 = vadd.f32 %v10452_v20, %v10527_v3 }
 0x38a   : > { %v7877_v52 = vpop.f32.mrf.mxu1  ;;  %v4581_v3 = vadd.f32 %v10472_v22, %v10531_v46  ;;  %v4582_v46 = vadd.f32 %v10496_v19, %v10545_v35 }
 0x38b   : > { %v10718_v15 = vadd.f32 %v7877_v52, %v10621_v62  ;;  %v5298_v62 = vadd.f32 %v10619_v43, %v4575_v7  ;;  %v5654_v52 = vadd.f32 %v7896_v25, %v5300_v21  ;;  %v5301_v8 = vadd.f32 %v10623_v16, %v4578_v57  ;;  %v10747_v7 = vpop.f32.mrf.mxu0 }
 0x38c   : > { %v5286_v32 = vpop.f32.mrf.mxu1  ;;  %v5299_v28 = vadd.f32 %v10627_v33, %v4576_v50 }
 0x38d   : > { %11187 = vst [vmem:[#allocation30_spill] sm:$0xff] %v10718_v15  ;;  %v10725_v27 = vadd.f32 %v5286_v32, %v10625_v30  ;;  %v10740_v30 = vld [vmem:[%s359_s1] ss:$0 sm:$0xff]  ;;  %v5652_v49 = vadd.f32 %v5525_v59, %v5298_v62  ;;  %v5655_v43 = vadd.f32 %v7897_v47, %v5301_v8  ;;  %v4579_v62 = vadd.f32 %v10479_v29, %v10539_v48 }
 0x38e   : > { %v5653_v17 = vadd.f32 %v5528_v31, %v5299_v28  ;;  %v5304_v31 = vadd.f32 %v10629_v5, %v4581_v3  ;;  %v8235_v29 = vld [vmem:[%s8739_s9] sm:$0xff] }
 0x38f   : > { %11189 = vst [vmem:[#allocation56_spill] sm:$0xff] %v10725_v27 }
 0x391   : > { %v7944_v2 = vpop.f32.mrf.mxu1 }
 0x392   : > { %v6408_v45 = vadd.f32 %v7944_v2, %v5654_v52  ;;  %v10756_v52 = vpop.f32.mrf.mxu0  ;;  %v8234_v2 = vld [vmem:[%s8739_s9 + $0x10] sm:$0xff] }
 0x393   : > { %v6279_v38 = vpop.f32.mrf.mxu1 }
 0x394   : > { %v6447_v25 = vadd.f32 %v10740_v30, %v6408_v45  ;;  %v6406_v21 = vadd.f32 %v6279_v38, %v5652_v49  ;;  %v5658_v45 = vadd.f32 %v10667_v44, %v5304_v31  ;;  %v10770_v19 = vpop.f32.mrf.mxu0 }
 0x395   : > { %v7945_v32 = vpop.f32.mrf.mxu1 }
 0x396   : > { %v6479_v27 = vmul.f32 0.1, %v6447_v25  ;;  %v6445_v15 = vadd.f32 %v10740_v30, %v6406_v21  ;;  %v6409_v20 = vadd.f32 %v7945_v32, %v5655_v43  ;;  %v5305_v43 = vadd.f32 %v10633_v12, %v4582_v46 }
 0x397   : > { %v6282_v16 = vpop.f32.mrf.mxu1 }
 0x398   : > { %v6511_v59 = vmax.f32 %v6447_v25, %v6479_v27  ;;  %v6477_v33 = vmul.f32 0.1, %v6445_v15  ;;  %v6448_v47 = vadd.f32 %v10740_v30, %v6409_v20  ;;  %v6407_v57 = vadd.f32 %v6282_v16, %v5653_v17 }
 0x399   : > { %v5302_v27 = vadd.f32 %v10631_v10, %v4579_v62  ;;  %v8236_v10 = vld [vmem:[%s8739_s9 + $0x18] sm:$0xff]  ;;  %v5659_v20 = vadd.f32 %v10683_v40, %v5305_v43 }
 0x39a   : > { %v6543_v50 = vadd.f32 %v8234_v2, %v6511_v59  ;;  %v6509_v8 = vmax.f32 %v6445_v15, %v6477_v33  ;;  %v6480_v49 = vmul.f32 0.1, %v6448_v47  ;;  %v6446_v22 = vadd.f32 %v10740_v30, %v6407_v57  ;;  %v10780_v59 = vpop.f32.mrf.mxu0 }
 0x39b   : > { %v4580_v15 = vadd.f32 %v10519_v53, %v10548_v56  ;;  %v5656_v25 = vadd.f32 %v10675_v41, %v5302_v27  ;;  %v8237_v56 = vld [vmem:[%s8739_s9 + $0x8] sm:$0xff] }
 0x39c   : > { %6575 = vst [vmem:[%s8739_s9 + $0x10] sm:$0xff] %v6543_v50  ;;  %v6541_v48 = vadd.f32 %v8235_v29, %v6509_v8  ;;  %v6512_v5 = vmax.f32 %v6448_v47, %v6480_v49  ;;  %v6478_v38 = vmul.f32 0.1, %v6446_v22  ;;  %v7948_v28 = vpop.f32.mrf.mxu1  ;;  %v5662_v50 = vadd.f32 %v10699_v4, %v10638_v58  ;;  %v10787_v8 = vpop.f32.mrf.mxu0 }
 0x39d   : > { %v6412_v35 = vadd.f32 %v7948_v28, %v5658_v45  ;;  %v5303_v17 = vadd.f32 %v10635_v23, %v4580_v15  ;;  %v5660_v45 = vadd.f32 %v10707_v6, %v10641_v34  ;;  %v5663_v28 = vadd.f32 %v10712_v18, %v10644_v60 }
 0x39e   : > { %6573 = vst [vmem:[%s8739_s9] sm:$0xff] %v6541_v48  ;;  %v6544_v44 = vadd.f32 %v8236_v10, %v6512_v5  ;;  %v6510_v21 = vmax.f32 %v6446_v22, %v6478_v38  ;;  %v6295_v32 = vpop.f32.mrf.mxu1  ;;  %v8239_v48 = vld [vmem:[%s8739_s9 + $0x20] sm:$0xff]  ;;  %v10797_v43 = vpop.f32.mrf.mxu0 }
 0x39f   : > { %v6451_v3 = vadd.f32 %v10740_v30, %v6412_v35  ;;  %v6410_v53 = vadd.f32 %v6295_v32, %v5656_v25  ;;  %v5657_v16 = vadd.f32 %v10691_v11, %v5303_v17  ;;  %v8238_v11 = vld [vmem:[%s8739_s9 + $0x30] sm:$0xff]  ;;  %v8240_v25 = vld [vmem:[%s8739_s9 + $0x38] sm:$0xff]  ;;  %v8241_v32 = vld [vmem:[%s8739_s9 + $0x28] sm:$0xff] }
 0x3a0   : > { %6576 = vst [vmem:[%s8739_s9 + $0x18] sm:$0xff] %v6544_v44  ;;  %v6542_v12 = vadd.f32 %v8237_v56, %v6510_v21  ;;  %v7949_v41 = vpop.f32.mrf.mxu1  ;;  %v5661_v44 = vadd.f32 %v10722_v51, %v10647_v9  ;;  %v8242_v9 = vld [vmem:[%s8739_s9 + $0x50] sm:$0xff] }
 0x3a1   : > { %v6483_v33 = vmul.f32 0.1, %v6451_v3  ;;  %v6449_v47 = vadd.f32 %v10740_v30, %v6410_v53  ;;  %v6413_v57 = vadd.f32 %v7949_v41, %v5659_v20  ;;  %v10807_v53 = vpop.f32.mrf.mxu0 }
 0x3a2   : > { %6574 = vst [vmem:[%s8739_s9 + $0x8] sm:$0xff] %v6542_v12  ;;  %v6298_v23 = vpop.f32.mrf.mxu1 }
 0x3a3   : > { %v6515_v40 = vmax.f32 %v6451_v3, %v6483_v33  ;;  %v6481_v62 = vmul.f32 0.1, %v6449_v47  ;;  %v6452_v31 = vadd.f32 %v10740_v30, %v6413_v57  ;;  %v6411_v2 = vadd.f32 %v6298_v23, %v5657_v16 }
 0x3a4   : > { %v5666_v23 = vadd.f32 %v10733_v1, %v10650_v63  ;;  %v5667_v1 = vadd.f32 %v10756_v52, %v10656_v26 }
 0x3a5   : > { %v6547_v49 = vadd.f32 %v8238_v11, %v6515_v40  ;;  %v6513_v22 = vmax.f32 %v6449_v47, %v6481_v62  ;;  %v6484_v46 = vmul.f32 0.1, %v6452_v31  ;;  %v6450_v27 = vadd.f32 %v10740_v30, %v6411_v2  ;;  %v10815_v40 = vpop.f32.mrf.mxu0  ;;  %v8243_v62 = vld [vmem:[%s8739_s9 + $0x40] sm:$0xff] }
 0x3a6   : > { %v7952_v29 = vpop.f32.mrf.mxu1 }
 0x3a7   : > { %6579 = vst [vmem:[%s8739_s9 + $0x30] sm:$0xff] %v6547_v49  ;;  %v6545_v5 = vadd.f32 %v8239_v48, %v6513_v22  ;;  %v6516_v58 = vmax.f32 %v6452_v31, %v6484_v46  ;;  %v6482_v4 = vmul.f32 0.1, %v6450_v27  ;;  %v6416_v38 = vadd.f32 %v7952_v29, %v5662_v50  ;;  %v8244_v46 = vld [vmem:[%s8739_s9 + $0x58] sm:$0xff] }
 0x3a8   : > { %v6311_v15 = vpop.f32.mrf.mxu1  ;;  %v5664_v49 = vadd.f32 %v10747_v7, %v10653_v42  ;;  %v5665_v7 = vadd.f32 %v10770_v19, %v10659_v24 }
 0x3a9   : > { %6577 = vst [vmem:[%s8739_s9 + $0x20] sm:$0xff] %v6545_v5  ;;  %v6548_v35 = vadd.f32 %v8240_v25, %v6516_v58  ;;  %v6514_v34 = vmax.f32 %v6450_v27, %v6482_v4  ;;  %v6455_v6 = vadd.f32 %v10740_v30, %v6416_v38  ;;  %v6414_v10 = vadd.f32 %v6311_v15, %v5660_v45  ;;  %v10826_v5 = vpop.f32.mrf.mxu0  ;;  %v8245_v58 = vld [vmem:[%s8739_s9 + $0x48] sm:$0xff] }
 0x3aa   : > { %v7953_v21 = vpop.f32.mrf.mxu1 }
 0x3ab   : > { %6580 = vst [vmem:[%s8739_s9 + $0x38] sm:$0xff] %v6548_v35  ;;  %v6546_v17 = vadd.f32 %v8241_v32, %v6514_v34  ;;  %v6487_v60 = vmul.f32 0.1, %v6455_v6  ;;  %v6453_v18 = vadd.f32 %v10740_v30, %v6414_v10  ;;  %v6417_v20 = vadd.f32 %v7953_v21, %v5663_v28  ;;  %v7917_v10 = vpop.f32.mrf.mxu0 }
 0x3ac   : > { %v6314_v3 = vpop.f32.mrf.mxu1 }
 0x3ad   : > { %6578 = vst [vmem:[%s8739_s9 + $0x28] sm:$0xff] %v6546_v17  ;;  %v6519_v56 = vmax.f32 %v6455_v6, %v6487_v60  ;;  %v6485_v12 = vmul.f32 0.1, %v6453_v18  ;;  %v6456_v41 = vadd.f32 %v10740_v30, %v6417_v20  ;;  %v6415_v16 = vadd.f32 %v6314_v3, %v5661_v44  ;;  %v8246_v44 = vld [vmem:[%s8739_s9 + $0x70] sm:$0xff] }
 0x3ae   : > { %v5670_v6 = vadd.f32 %v10780_v59, %v10662_v55  ;;  %v5668_v17 = vadd.f32 %v10787_v8, %v10665_v37 }
 0x3af   : > { %v6551_v51 = vadd.f32 %v8242_v9, %v6519_v56  ;;  %v6517_v33 = vmax.f32 %v6453_v18, %v6485_v12  ;;  %v6488_v47 = vmul.f32 0.1, %v6456_v41  ;;  %v6454_v57 = vadd.f32 %v10740_v30, %v6415_v16  ;;  %v8247_v18 = vld [vmem:[%s8739_s9 + $0x60] sm:$0xff]  ;;  %v5608_v12 = vpop.f32.mrf.mxu0  ;;  %v8248_v16 = vld [vmem:[%s8739_s9 + $0x78] sm:$0xff] }
 0x3b0   : > { %v5671_v56 = vadd.f32 %v10797_v43, %v10670_v36 }
 0x3b1   : > { %6583 = vst [vmem:[%s8739_s9 + $0x50] sm:$0xff] %v6551_v51  ;;  %v6549_v31 = vadd.f32 %v8243_v62, %v6517_v33  ;;  %v6520_v2 = vmax.f32 %v6456_v41, %v6488_v47  ;;  %v6486_v50 = vmul.f32 0.1, %v6454_v57  ;;  %v7956_v11 = vpop.f32.mrf.mxu1  ;;  %v5669_v33 = vadd.f32 %v10807_v53, %v10673_v14  ;;  %v8250_v14 = vld [vmem:[%s8739_s9 + $0x90] sm:$0xff] }
 0x3b2   : > { %v6420_v22 = vadd.f32 %v7956_v11, %v5666_v23 }
 0x3b3   : > { %6581 = vst [vmem:[%s8739_s9 + $0x40] sm:$0xff] %v6549_v31  ;;  %v6552_v27 = vadd.f32 %v8244_v46, %v6520_v2  ;;  %v6518_v45 = vmax.f32 %v6454_v57, %v6486_v50  ;;  %v6327_v63 = vpop.f32.mrf.mxu1  ;;  %v8249_v57 = vld [vmem:[%s8739_s9 + $0x68] sm:$0xff]  ;;  %v7920_v31 = vpop.f32.mrf.mxu0 }
 0x3b4   : > { %v6459_v29 = vadd.f32 %v10740_v30, %v6420_v22  ;;  %v6418_v48 = vadd.f32 %v6327_v63, %v5664_v49  ;;  %v5674_v63 = vadd.f32 %v10815_v40, %v10678_v61  ;;  %v5675_v61 = vadd.f32 %v7917_v10, %v10686_v13 }
 0x3b5   : > { %6584 = vst [vmem:[%s8739_s9 + $0x58] sm:$0xff] %v6552_v27  ;;  %v6550_v4 = vadd.f32 %v8245_v58, %v6518_v45  ;;  %v7957_v42 = vpop.f32.mrf.mxu1 }
 0x3b6   : > { %v6491_v38 = vmul.f32 0.1, %v6459_v29  ;;  %v6457_v28 = vadd.f32 %v10740_v30, %v6418_v48  ;;  %v6421_v15 = vadd.f32 %v7957_v42, %v5667_v1  ;;  %v5621_v1 = vpop.f32.mrf.mxu0 }
 0x3b7   : > { %6582 = vst [vmem:[%s8739_s9 + $0x48] sm:$0xff] %v6550_v4  ;;  %v6330_v26 = vpop.f32.mrf.mxu1 }
 0x3b8   : > { %v6523_v52 = vmax.f32 %v6459_v29, %v6491_v38  ;;  %v6489_v25 = vmul.f32 0.1, %v6457_v28  ;;  %v6460_v35 = vadd.f32 %v10740_v30, %v6421_v15  ;;  %v6419_v34 = vadd.f32 %v6330_v26, %v5665_v7  ;;  %v8251_v29 = vld [vmem:[%s8739_s9 + $0x80] sm:$0xff]  ;;  %v7921_v40 = vpop.f32.mrf.mxu0 }
 0x3b9   : > { %v5672_v7 = vadd.f32 %v10826_v5, %v10681_v39 }
 0x3ba   : > { %v6555_v24 = vadd.f32 %v8246_v44, %v6523_v52  ;;  %v6521_v19 = vmax.f32 %v6457_v28, %v6489_v25  ;;  %v6492_v21 = vmul.f32 0.1, %v6460_v35  ;;  %v6458_v32 = vadd.f32 %v10740_v30, %v6419_v34  ;;  %v8252_v28 = vld [vmem:[%s8739_s9 + $0x98] sm:$0xff]  ;;  %v8253_v34 = vld [vmem:[%s8739_s9 + $0x88] sm:$0xff]  ;;  %v5624_v13 = vpop.f32.mrf.mxu0 }
 0x3bb   : > { %v7960_v60 = vpop.f32.mrf.mxu1 }
 0x3bc   : > { %6587 = vst [vmem:[%s8739_s9 + $0x70] sm:$0xff] %v6555_v24  ;;  %v6553_v20 = vadd.f32 %v8247_v18, %v6521_v19  ;;  %v6524_v3 = vmax.f32 %v6460_v35, %v6492_v21  ;;  %v6490_v55 = vmul.f32 0.1, %v6458_v32  ;;  %v6424_v59 = vadd.f32 %v7960_v60, %v5670_v6  ;;  %v11192_v24 = vld [vmem:[#allocation33_spill] sm:$0xff] }
 0x3bd   : > { %v6343_v41 = vpop.f32.mrf.mxu1  ;;  %v5673_v39 = vadd.f32 %v5608_v12, %v11192_v24 }
 0x3be   : > { %6585 = vst [vmem:[%s8739_s9 + $0x60] sm:$0xff] %v6553_v20  ;;  %v6556_v9 = vadd.f32 %v8248_v16, %v6524_v3  ;;  %v6522_v51 = vmax.f32 %v6458_v32, %v6490_v55  ;;  %v6463_v37 = vadd.f32 %v10740_v30, %v6424_v59  ;;  %v6422_v8 = vadd.f32 %v6343_v41, %v5668_v17  ;;  %v8254_v3 = vld [vmem:[%s8739_s9 + $0xb0] sm:$0xff]  ;;  %v11193_v41 = vld [vmem:[#allocation53_spill] sm:$0xff] }
 0x3bf   : > { %v7961_v47 = vpop.f32.mrf.mxu1  ;;  %v5678_v20 = vadd.f32 %v7920_v31, %v10694_v0  ;;  %v5676_v16 = vadd.f32 %v5621_v1, %v11193_v41 }
 0x3c0   : > { %6588 = vst [vmem:[%s8739_s9 + $0x78] sm:$0xff] %v6556_v9  ;;  %v6554_v23 = vadd.f32 %v8249_v57, %v6522_v51  ;;  %v6495_v62 = vmul.f32 0.1, %v6463_v37  ;;  %v6461_v36 = vadd.f32 %v10740_v30, %v6422_v8  ;;  %v6425_v43 = vadd.f32 %v7961_v47, %v5671_v56  ;;  %v7924_v51 = vpop.f32.mrf.mxu0  ;;  %v11194_v57 = vld [vmem:[#allocation54_spill] sm:$0xff] }
 0x3c1   : > { %v6346_v2 = vpop.f32.mrf.mxu1 }
 0x3c2   : > { %6586 = vst [vmem:[%s8739_s9 + $0x68] sm:$0xff] %v6554_v23  ;;  %v6527_v50 = vmax.f32 %v6463_v37, %v6495_v62  ;;  %v6493_v11 = vmul.f32 0.1, %v6461_v36  ;;  %v6464_v49 = vadd.f32 %v10740_v30, %v6425_v43  ;;  %v6423_v22 = vadd.f32 %v6346_v2, %v5669_v33  ;;  %v8255_v37 = vld [vmem:[%s8739_s9 + $0xa0] sm:$0xff] }
 0x3c3   : > { %v5679_v23 = vadd.f32 %v7921_v40, %v11194_v57  ;;  %v8259_v40 = vld [vmem:[%s8739_s9 + $0xc0] sm:$0xff] }
 0x3c4   : > { %v6559_v53 = vadd.f32 %v8250_v14, %v6527_v50  ;;  %v6525_v46 = vmax.f32 %v6461_v36, %v6493_v11  ;;  %v6496_v27 = vmul.f32 0.1, %v6464_v49  ;;  %v6462_v45 = vadd.f32 %v10740_v30, %v6423_v22  ;;  %v8256_v36 = vld [vmem:[%s8739_s9 + $0xb8] sm:$0xff]  ;;  %v11195_v11 = vld [vmem:[#allocation55_spill] sm:$0xff]  ;;  %v5637_v14 = vpop.f32.mrf.mxu0 }
 0x3c6   : > { %6591 = vst [vmem:[%s8739_s9 + $0x90] sm:$0xff] %v6559_v53  ;;  %v6557_v48 = vadd.f32 %v8251_v29, %v6525_v46  ;;  %v6528_v58 = vmax.f32 %v6464_v49, %v6496_v27  ;;  %v6494_v4 = vmul.f32 0.1, %v6462_v45  ;;  %v7964_v42 = vpop.f32.mrf.mxu1  ;;  %v5677_v49 = vadd.f32 %v5624_v13, %v11195_v11  ;;  %v8257_v53 = vld [vmem:[%s8739_s9 + $0xa8] sm:$0xff]  ;;  %v11197_v13 = vld [vmem:[#allocation30_spill] sm:$0xff] }
 0x3c7   : > { %v6428_v38 = vadd.f32 %v7964_v42, %v5674_v63  ;;  %v7925_v42 = vpop.f32.mrf.mxu0 }
 0x3c8   : > { %6589 = vst [vmem:[%s8739_s9 + $0x80] sm:$0xff] %v6557_v48  ;;  %v6560_v15 = vadd.f32 %v8252_v28, %v6528_v58  ;;  %v6526_v26 = vmax.f32 %v6462_v45, %v6494_v4  ;;  %v6359_v52 = vpop.f32.mrf.mxu1 }
 0x3c9   : > { %v6467_v25 = vadd.f32 %v10740_v30, %v6428_v38  ;;  %v6426_v35 = vadd.f32 %v6359_v52, %v5672_v7  ;;  %v8258_v7 = vld [vmem:[%s8739_s9 + $0xd0] sm:$0xff]  ;;  %v11196_v52 = vld [vmem:[#allocation25_spill] sm:$0xff] }
 0x3ca   : > { %6592 = vst [vmem:[%s8739_s9 + $0x98] sm:$0xff] %v6560_v15  ;;  %v6558_v6 = vadd.f32 %v8253_v34, %v6526_v26  ;;  %v7965_v44 = vpop.f32.mrf.mxu1 }
 0x3cb   : > { %v6499_v5 = vmul.f32 0.1, %v6467_v25  ;;  %v6465_v19 = vadd.f32 %v10740_v30, %v6426_v35  ;;  %v6429_v21 = vadd.f32 %v7965_v44, %v5675_v61  ;;  %v5682_v61 = vadd.f32 %v7924_v51, %v11196_v52 }
 0x3cc   : > { %6590 = vst [vmem:[%s8739_s9 + $0x88] sm:$0xff] %v6558_v6  ;;  %v6362_v32 = vpop.f32.mrf.mxu1  ;;  %v5680_v44 = vadd.f32 %v5637_v14, %v10715_v54 }
 0x3cd   : > { %v6531_v10 = vmax.f32 %v6467_v25, %v6499_v5  ;;  %v6497_v17 = vmul.f32 0.1, %v6465_v19  ;;  %v6468_v60 = vadd.f32 %v10740_v30, %v6429_v21  ;;  %v6427_v18 = vadd.f32 %v6362_v32, %v5673_v39  ;;  %v5640_v39 = vpop.f32.mrf.mxu0  ;;  %v8260_v5 = vld [vmem:[%s8739_s9 + $0xd8] sm:$0xff] }
 0x3cf   : > { %v6563_v55 = vadd.f32 %v8254_v3, %v6531_v10  ;;  %v6529_v59 = vmax.f32 %v6465_v19, %v6497_v17  ;;  %v6500_v56 = vmul.f32 0.1, %v6468_v60  ;;  %v6466_v12 = vadd.f32 %v10740_v30, %v6427_v18  ;;  %v8261_v18 = vld [vmem:[%s8739_s9 + $0xc8] sm:$0xff] }
 0x3d0   : > { %v7968_v9 = vpop.f32.mrf.mxu1  ;;  %v5683_v10 = vadd.f32 %v7925_v42, %v11197_v13 }
 0x3d1   : > { %6595 = vst [vmem:[%s8739_s9 + $0xb0] sm:$0xff] %v6563_v55  ;;  %v6561_v8 = vadd.f32 %v8255_v37, %v6529_v59  ;;  %v6532_v33 = vmax.f32 %v6468_v60, %v6500_v56  ;;  %v6498_v47 = vmul.f32 0.1, %v6466_v12  ;;  %v6432_v0 = vadd.f32 %v7968_v9, %v5678_v20  ;;  %v11198_v55 = vld [vmem:[#allocation56_spill] sm:$0xff] }
 0x3d2   : > { %v6375_v62 = vpop.f32.mrf.mxu1  ;;  %v5681_v54 = vadd.f32 %v5640_v39, %v11198_v55 }
 0x3d3   : > { %6593 = vst [vmem:[%s8739_s9 + $0xa0] sm:$0xff] %v6561_v8  ;;  %v6564_v43 = vadd.f32 %v8256_v36, %v6532_v33  ;;  %v6530_v31 = vmax.f32 %v6466_v12, %v6498_v47  ;;  %v6471_v2 = vadd.f32 %v10740_v30, %v6432_v0  ;;  %v6430_v50 = vadd.f32 %v6375_v62, %v5676_v16  ;;  %v8262_v8 = vld [vmem:[%s8739_s9 + $0xf0] sm:$0xff] }
 0x3d4   : > { %v7969_v22 = vpop.f32.mrf.mxu1 }
 0x3d5   : > { %6596 = vst [vmem:[%s8739_s9 + $0xb8] sm:$0xff] %v6564_v43  ;;  %v6562_v46 = vadd.f32 %v8257_v53, %v6530_v31  ;;  %v6503_v27 = vmul.f32 0.1, %v6471_v2  ;;  %v6469_v45 = vadd.f32 %v10740_v30, %v6430_v50  ;;  %v6433_v63 = vadd.f32 %v7969_v22, %v5679_v23  ;;  %v8263_v23 = vld [vmem:[%s8739_s9 + $0xe0] sm:$0xff]  ;;  %v8264_v31 = vld [vmem:[%s8739_s9 + $0xf8] sm:$0xff] }
 0x3d6   : > { %v6378_v1 = vpop.f32.mrf.mxu1 }
 0x3d7   : > { %6594 = vst [vmem:[%s8739_s9 + $0xa8] sm:$0xff] %v6562_v46  ;;  %v6535_v29 = vmax.f32 %v6471_v2, %v6503_v27  ;;  %v6501_v48 = vmul.f32 0.1, %v6469_v45  ;;  %v6472_v58 = vadd.f32 %v10740_v30, %v6433_v63  ;;  %v6431_v4 = vadd.f32 %v6378_v1, %v5677_v49 }
 0x3d9   : > { %v6567_v38 = vadd.f32 %v8258_v7, %v6535_v29  ;;  %v6533_v28 = vmax.f32 %v6469_v45, %v6501_v48  ;;  %v6504_v15 = vmul.f32 0.1, %v6472_v58  ;;  %v6470_v26 = vadd.f32 %v10740_v30, %v6431_v4 }
 0x3db   : > { %6599 = vst [vmem:[%s8739_s9 + $0xd0] sm:$0xff] %v6567_v38  ;;  %v6565_v25 = vadd.f32 %v8259_v40, %v6533_v28  ;;  %v6536_v35 = vmax.f32 %v6472_v58, %v6504_v15  ;;  %v6502_v34 = vmul.f32 0.1, %v6470_v26  ;;  %v7972_v6 = vpop.f32.mrf.mxu1 }
 0x3dc   : > { %v6436_v24 = vadd.f32 %v7972_v6, %v5682_v61 }
 0x3dd   : > { %6597 = vst [vmem:[%s8739_s9 + $0xc0] sm:$0xff] %v6565_v25  ;;  %v6568_v19 = vadd.f32 %v8260_v5, %v6536_v35  ;;  %v6534_v21 = vmax.f32 %v6470_v26, %v6502_v34  ;;  %v6391_v32 = vpop.f32.mrf.mxu1 }
 0x3de   : > { %v6475_v17 = vadd.f32 %v10740_v30, %v6436_v24  ;;  %v6434_v60 = vadd.f32 %v6391_v32, %v5680_v44 }
 0x3df   : > { %6600 = vst [vmem:[%s8739_s9 + $0xd8] sm:$0xff] %v6568_v19  ;;  %v6566_v20 = vadd.f32 %v8261_v18, %v6534_v21  ;;  %v7973_v3 = vpop.f32.mrf.mxu1 }
 0x3e0   : > { %v6507_v59 = vmul.f32 0.1, %v6475_v17  ;;  %v6473_v56 = vadd.f32 %v10740_v30, %v6434_v60  ;;  %v6437_v12 = vadd.f32 %v7973_v3, %v5683_v10 }
 0x3e1   : > { %6598 = vst [vmem:[%s8739_s9 + $0xc8] sm:$0xff] %v6566_v20  ;;  %v6394_v41 = vpop.f32.mrf.mxu1 }
 0x3e2   : > { %v6539_v16 = vmax.f32 %v6475_v17, %v6507_v59  ;;  %v6505_v9 = vmul.f32 0.1, %v6473_v56  ;;  %v6476_v51 = vadd.f32 %v10740_v30, %v6437_v12  ;;  %v6435_v37 = vadd.f32 %v6394_v41, %v5681_v54 }
 0x3e4   : > { %v6571_v33 = vadd.f32 %v8262_v8, %v6539_v16  ;;  %v6537_v47 = vmax.f32 %v6473_v56, %v6505_v9  ;;  %v6508_v0 = vmul.f32 0.1, %v6476_v51  ;;  %v6474_v57 = vadd.f32 %v10740_v30, %v6435_v37  ;;  %v8265_v30 = vld [vmem:[%s8739_s9 + $0xe8] sm:$0xff] }
 0x3e6   : > { %6603 = vst [vmem:[%s8739_s9 + $0xf0] sm:$0xff] %v6571_v33  ;;  %v6569_v62 = vadd.f32 %v8263_v23, %v6537_v47  ;;  %v6540_v36 = vmax.f32 %v6476_v51, %v6508_v0  ;;  %v6506_v43 = vmul.f32 0.1, %v6474_v57 }
 0x3e8   : > { %6601 = vst [vmem:[%s8739_s9 + $0xe0] sm:$0xff] %v6569_v62  ;;  %v6572_v2 = vadd.f32 %v8264_v31, %v6540_v36  ;;  %v6538_v50 = vmax.f32 %v6474_v57, %v6506_v43 }
 0x3ea   : > { %6604 = vst [vmem:[%s8739_s9 + $0xf8] sm:$0xff] %v6572_v2  ;;  %v6570_v11 = vadd.f32 %v8265_v30, %v6538_v50 }
 0x3ec   : > { %6602 = vst [vmem:[%s8739_s9 + $0xe8] sm:$0xff] %v6570_v11 }
 0x3ed   : > { %8363 = shalt.err (!%p8360_p10)
}
 0x3ee   : > { %s8364_s13 = scalar_lea.hbm %s10916_s25, 4096  ;;  %s8368_s9 = scalar_lea.hbm %s11200_s6, 8192 }
 0x3ef   : > { %p8365_p4 = scmp.ne.s32.totalorder %s10916_s25, %s8364_s13  ;;  %p8369_p11 = scmp.lt.s32.totalorder %s10916_s25, %s11200_s6 }
 0x3f0   : > { %p8370_p9 = scmp.lt.s32.totalorder %s8368_s9, %s8364_s13 }
 0x3f1   : > { %p8366_p3 = pnand %p8365_p4, %p11201_p12 }
 0x3f2   : > { %p8371_p7 = por %p8370_p9, %p8369_p11 }
 0x3f3   : > { %p8367_p5 = pneg %p8366_p3 }
 0x3f5   : > { %p8372_p13 = pnand %p8371_p7, %p8367_p5 }
 0x3f7   : > { %8375 = shalt.err (!%p8372_p13)
}
 0x3f8   : > { %s8485_s7 = smov 128   ;;  %s8486_s20 = smov 8  }
 0x3f9   : > { %7983 = dma.vmem_to_hbm [thread:$0]  (%p11201_p12), %s10918_s14, 4096, %s10916_s25, %s6606_s17, %s8485_s7, %s8485_s7, %s8486_s20  }
 0x3fa PF: > { %s11202_s30 = sld [smem:[#allocation14_spill]]  ;;  %p8000_p1 = scmp.ge.s32.totalorder %s8474_s28, 2 }
 0x3fb   : > { %p11203_p6 = scmp.ne.s32.totalorder %s11024_s12, 0 }
 0x3fd   : > { %p7996_p8 = pnand %p8000_p1, %p11203_p6 }
 0x3ff   : > { %p7997_p0 = pneg %p7996_p8 }
 0x400   : > { %s6634_s10 = sand.u32 1, %s11202_s30  }
 0x401   : > { %s6635_s11 = scalar_lea.sflag [#allocation5], %s6634_s10 }
 0x402   : > { %8429 = dma.done.wait (%p7997_p0), %s6635_s11, 4096  }
 0x403   : > { %8431 = vsyncadd (%p7997_p0), %s6635_s11, 4294963200  ;;  %s24_s28 = sadd.s32 1, %s8474_s28   ;;  %s11204_s16 = sld [smem:[#allocation13_spill]] }
 0x404   : > { %p21_p2 = scmp.ge.s32.totalorder %s24_s28, 6   ;;  %s11205_s20 = sld [smem:[#allocation19_spill]] }
 0x405   : > { %s11206_s8 = sld [smem:[#allocation21_spill]]  ;;  %s11210_s18 = smov %s8438_s19 }
 0x406   : > { %s11207_s25 = sld [smem:[#allocation17_spill]]  ;;  %s11212_s21 = smov %s8450_s22 }
 0x407   : > { %s11208_s14 = sld [smem:[#allocation18_spill]]  ;;  %s11213_s22 = smov %s8454_s23 }
 0x408   : > { %s11209_s27 = sld [smem:[#allocation20_spill]]  ;;  %s11215_s24 = smov %s8466_s26 }
 0x409   : > { %s11211_s19 = smov %s11204_s16  ;;  %23 = sbr.rel (!%p21_p2) target bundleno = 17 (0x11), region = 129 }
 0x40b   : > { %s11214_s23 = smov %s11206_s8 }
 0x40d   : > { %s11216_s26 = smov %s11208_s14 }
 0x40e   :  { %6640 = vsyncpa [#allocation4], 1 }
 0x40f   :  { %6642 = vsyncpa [#allocation4 + $0x1], 1 }
 0x410   :  { %6643 = vsyncpa [#allocation7], 1 }
 0x411   :  { %6645 = vsyncpa [#allocation7 + $0x1], 1 }
 0x412   :  { %6646 = vsyncpa [#allocation5], 1 }
 0x413   :  { %6648 = vsyncpa [#allocation5 + $0x1], 1 }

</bundles_post_ra>
